<compile_context>
chip_gen: v7x
topology: tpu7x:2x2x1
jax: 0.10.0
libtpu: 0.0.40
codegen_flags: <defaults>
</compile_context>

<pallas_src>
import functools

import numpy as np

import jax
import jax.numpy as jnp
from jax import lax
from jax.experimental import pallas as pl
from jax.experimental.pallas import tpu as pltpu

NEG_SLOPE = 0.01   # torch.nn.LeakyReLU default
LN_EPS = 1e-5      # torch.nn.LayerNorm default
MASK_NEG = -1e9


# ------------------------------- the megakernel ------------------------------

def _critic_kernel(state_ref, pars_ref, slab_ref, wide_ref, emb_ref, out_ref,
                   *, meta, cfg):
    E = cfg["embed_dim"]
    H = cfg["num_heads"]
    B = cfg["batch"]
    n_pars = cfg["n_pars"]

    def ld(ent):                      # static slice out of the main slab
        off, r, c = ent
        return slab_ref[off:off + r, :c]

    def ldw(ent):                     # static slice out of the wide slab
        off, r, c = ent
        return wide_ref[off:off + r, :c]

    def leaky(x):
        return jnp.where(x > 0, x, NEG_SLOPE * x)

    def layer_norm(x, g_ent, b_ent):
        mu = jnp.mean(x, axis=-1, keepdims=True)
        xc = x - mu
        var = jnp.mean(xc * xc, axis=-1, keepdims=True)
        return xc * lax.rsqrt(var + LN_EPS) * ld(g_ent) + ld(b_ent)

    def linear(x, w_ent, b_ent, act=False):
        y = jnp.dot(x, ld(w_ent), preferred_element_type=jnp.float32) + ld(b_ent)
        return leaky(y) if act else y

    def sdpa(q, k, v, bias):
        # q:(Nq,E) k,v:(Nk,E); bias:(Nq,Nk) additive same-batch mask.
        dh = E // H
        outs = []
        for h in range(H):
            qh = q[:, h * dh:(h + 1) * dh]
            kh = k[:, h * dh:(h + 1) * dh]
            vh = v[:, h * dh:(h + 1) * dh]
            s = lax.dot_general(qh, kh, (((1,), (1,)), ((), ())),
                                preferred_element_type=jnp.float32) + bias
            s = s - jnp.max(s, axis=-1, keepdims=True)
            p = jnp.exp(s)
            p = p * pl.reciprocal(jnp.sum(p, axis=-1, keepdims=True), approx=True)
            outs.append(jnp.dot(p, vh, preferred_element_type=jnp.float32))
        return jnp.concatenate(outs, axis=-1)

    def self_mha(x, m, bias):
        qkv = jnp.dot(x, ld(m["wqkv"]),
                      preferred_element_type=jnp.float32) + ld(m["bqkv"])
        o = sdpa(qkv[:, :E], qkv[:, E:2 * E], qkv[:, 2 * E:], bias)
        return jnp.dot(o, ld(m["wo"]), preferred_element_type=jnp.float32) + ld(m["bo"])

    def cross_mha(x, mem, m, bias):
        q = jnp.dot(x, ld(m["wq"]), preferred_element_type=jnp.float32) + ld(m["bq"])
        kv = jnp.dot(mem, ld(m["wkv"]),
                     preferred_element_type=jnp.float32) + ld(m["bkv"])
        o = sdpa(q, kv[:, :E], kv[:, E:], bias)
        return jnp.dot(o, ld(m["wo"]), preferred_element_type=jnp.float32) + ld(m["bo"])

    def encoder_layer(x, m, bias):
        a = self_mha(x, m["attn"], bias)
        x = layer_norm(x + a, m["ln1g"], m["ln1b"])
        f = linear(linear(x, m["ff1w"], m["ff1b"], act=True), m["ff2w"], m["ff2b"])
        return layer_norm(x + f, m["ln2g"], m["ln2b"])

    def decoder_layer(x, mem, m, self_bias, cross_bias):
        a = self_mha(x, m["self"], self_bias)
        x = layer_norm(x + a, m["ln1g"], m["ln1b"])
        a = cross_mha(x, mem, m["cross"], cross_bias)
        x = layer_norm(x + a, m["ln2g"], m["ln2b"])
        f = linear(linear(x, m["ff1w"], m["ff1b"], act=True), m["ff2w"], m["ff2b"])
        return layer_norm(x + f, m["ln3g"], m["ln3b"])

    # Attention bias masks: precomputed host-side, loaded once, reused.
    enc_bias = ld(meta["masks"]["enc"])
    init_self_bias = ld(meta["masks"]["init_self"])
    init_cross_bias = ld(meta["masks"]["init_cross"])
    fin_self_bias = ld(meta["masks"]["fin_self"])
    fin_cross_bias = ld(meta["masks"]["fin_cross"])

    def pars_encoder(m):
        # Direct dynamic row gathers from the packed embedding table.
        rows = []
        for i in range(n_pars):
            for b in range(B):
                idx = pars_ref[i * B + b] + m["emb_base"]
                rows.append(emb_ref[idx])                 # (1, E)
        x = jnp.concatenate(rows, axis=0) + ld(m["pos"])  # (n_pars*B, E)
        for lm in m["layers"]:
            x = encoder_layer(x, lm, enc_bias)
        return x

    # ---- initial state encoder: Unflatten -> Linear(1,E) -> LeakyReLU ------
    x = leaky(state_ref[...] * ld(meta["init_state_w"]) + ld(meta["init_state_b"]))
    x = x + ld(meta["init_pos"])                          # (S*B, E)

    mem = pars_encoder(meta["init_pars_enc"])             # (n_pars*B, E)
    for lm in meta["init_dec"]:
        x = decoder_layer(x, mem, lm, init_self_bias, init_cross_bias)

    # ---- Flatten + first dim-reduction Linear, fused as masked matmuls -----
    #   y = SelB @ ((x @ W_wide) * M) @ I_stack + b1       (all precomputed)
    mm = meta["mlp"]
    z = jnp.dot(x, ldw(mm["w_wide"]), preferred_element_type=jnp.float32)
    z = z * ldw(mm["mask"])
    zr = jnp.dot(ld(mm["selb"]), z, preferred_element_type=jnp.float32)
    y = lax.dot_general(zr, ldw(mm["istack_t"]), (((1,), (1,)), ((), ())),
                        preferred_element_type=jnp.float32) + ld(mm["b1"])
    y = leaky(y)                                          # (B, hidden0)
    for lin_m in mm["rest"]:
        y = linear(y, lin_m["w"], lin_m["b"], act=True)   # -> (B, latent)

    # ---- Unflatten -> Linear(1,E) (no activation) + positional -------------
    um = meta["unflat"]
    g = jnp.dot(ld(um["sel"]), y, preferred_element_type=jnp.float32)   # (L*B, latent)
    col = jnp.sum(g * ld(um["lanemask"]), axis=-1, keepdims=True)       # (L*B, 1)
    x = col * ld(um["w"]) + ld(um["b"])                                 # (L*B, E)
    x = x + ld(meta["final_pos"])

    # ---- final parameter encoder + decoder layers ---------------------------
    mem = pars_encoder(meta["final_pars_enc"])
    for lm in meta["final_dec"]:
        x = decoder_layer(x, mem, lm, fin_self_bias, fin_cross_bias)

    # ---- Flatten + final Linear(latent*E, 1), fused --------------------------
    fm = meta["final"]
    t = jnp.sum(x * ld(fm["w_per_row"]), axis=-1, keepdims=True)        # (L*B, 1)
    out = jnp.dot(ld(fm["selb"]), t,
                  preferred_element_type=jnp.float32) + ld(fm["b"])     # (B, 1)
    out_ref[...] = out


def critic_forward(main_slab, wide_slab, emb_tables, state, pars, *, meta, cfg):
    B = cfg["batch"]
    S = cfg["state_dim"]
    # l-major row ordering everywhere: row = position * B + batch.
    state_col = state.T.reshape(S * B, 1).astype(jnp.float32)
    offs = jnp.asarray(meta["cat_offsets"], dtype=jnp.int32)
    pars_flat = (pars.astype(jnp.int32) + offs[None, :]).T.reshape(-1)

    kernel = functools.partial(_critic_kernel, meta=meta, cfg=cfg)
    vmem = pl.BlockSpec(memory_space=pltpu.MemorySpace.VMEM)
    smem = pl.BlockSpec(memory_space=pltpu.MemorySpace.SMEM)
    return pl.pallas_call(
        kernel,
        out_shape=jax.ShapeDtypeStruct((B, 1), jnp.float32),
        in_specs=[vmem, smem, vmem, vmem, vmem],
        out_specs=vmem,
    )(state_col, pars_flat, main_slab, wide_slab, emb_tables)


# ----------------------- host-side one-time weight packing -------------------

class _Packer:
    """Packs many small 2-D f32 arrays into one (rows, lanes) slab.

    Row offsets are 8-aligned so every in-kernel static slice is sublane-tile
    aligned.  Returns (offset, rows, cols) descriptors (static Python ints).
    """

    def __init__(self, lanes):
        self.lanes = lanes
        self.rows = 0
        self.items = []

    def add(self, arr):
        arr = np.asarray(arr, np.float32)
        if arr.ndim == 1:
            arr = arr[None, :]
        r, c = arr.shape
        assert c <= self.lanes, (c, self.lanes)
        off = self.rows
        self.rows += ((r + 7) // 8) * 8
        self.items.append((off, arr))
        return (off, r, c)

    def build(self):
        slab = np.zeros((max(self.rows, 8), self.lanes), np.float32)
        for off, arr in self.items:
            slab[off:off + arr.shape[0], :arr.shape[1]] = arr
        return jnp.asarray(slab)


def prepare_params(params, cfg):
    """One-time host transform: fold attention scale into Q weights, pre-tile
    positional tables, build attention-bias masks and flatten/unflatten
    selector matrices, and pack everything into two contiguous VMEM slabs plus
    one embedding table."""
    E = cfg["embed_dim"]
    H = cfg["num_heads"]
    B = cfg["batch"]
    S = cfg["state_dim"]
    L = cfg["latent_dim"]
    pars_dims = cfg["pars_dims"]
    n_pars = len(pars_dims)
    H1 = cfg["hidden_neurons"][0]
    dh = E // H
    scale = 1.0 / np.sqrt(dh)

    p = jax.tree_util.tree_map(lambda a: np.asarray(a, np.float32), params)

    main = _Packer(128)
    wide = _Packer(S * H1)

    def pack_self_mha(m):
        wqkv = np.array(m["wqkv"])
        bqkv = np.array(m["bqkv"])
        wqkv[:, :E] *= scale            # fold 1/sqrt(dh) into the Q projection
        bqkv[:, :E] *= scale
        return {"wqkv": main.add(wqkv), "bqkv": main.add(bqkv),
                "wo": main.add(m["wo"]), "bo": main.add(m["bo"])}

    def pack_cross_mha(m):
        return {"wq": main.add(np.array(m["wq"]) * scale),
                "bq": main.add(np.array(m["bq"]) * scale),
                "wkv": main.add(m["wkv"]), "bkv": main.add(m["bkv"]),
                "wo": main.add(m["wo"]), "bo": main.add(m["bo"])}

    def pack_enc_layer(m):
        return {"attn": pack_self_mha(m["attn"]),
                "ln1g": main.add(m["ln1"]["g"]), "ln1b": main.add(m["ln1"]["b"]),
                "ff1w": main.add(m["ff1"]["w"]), "ff1b": main.add(m["ff1"]["b"]),
                "ff2w": main.add(m["ff2"]["w"]), "ff2b": main.add(m["ff2"]["b"]),
                "ln2g": main.add(m["ln2"]["g"]), "ln2b": main.add(m["ln2"]["b"])}

    def pack_dec_layer(m):
        return {"self": pack_self_mha(m["self"]),
                "ln1g": main.add(m["ln1"]["g"]), "ln1b": main.add(m["ln1"]["b"]),
                "cross": pack_cross_mha(m["cross"]),
                "ln2g": main.add(m["ln2"]["g"]), "ln2b": main.add(m["ln2"]["b"]),
                "ff1w": main.add(m["ff1"]["w"]), "ff1b": main.add(m["ff1"]["b"]),
                "ff2w": main.add(m["ff2"]["w"]), "ff2b": main.add(m["ff2"]["b"]),
                "ln3g": main.add(m["ln3"]["g"]), "ln3b": main.add(m["ln3"]["b"])}

    def tile_pos(pos):   # (Len, E) -> (Len*B, E) with row = l*B + b
        return np.repeat(np.asarray(pos, np.float32), B, axis=0)

    def pack_pars_enc(m):
        return {"pos": main.add(tile_pos(m["pos"])),
                "layers": [pack_enc_layer(lm) for lm in m["layers"]]}

    def batch_bias(lq, lk):   # additive same-batch mask, l-major rows/cols
        rb = np.arange(lq * B)[:, None] % B
        cb = np.arange(lk * B)[None, :] % B
        return np.where(rb == cb, 0.0, MASK_NEG).astype(np.float32)

    meta = {}
    meta["init_pars_enc"] = pack_pars_enc(p["init_pars_enc"])
    meta["init_state_w"] = main.add(p["init_state_w"])
    meta["init_state_b"] = main.add(p["init_state_b"])
    meta["init_pos"] = main.add(tile_pos(p["init_pos"]))
    meta["init_dec"] = [pack_dec_layer(m) for m in p["init_dec"]]

    # Flatten (B,S,E)->(B,S*E) fused with the first MLP layer:
    #   y = SelB @ ((x @ W_wide) * M) @ I_stack + b1
    w1 = p["mlp"][0]["w"]                                      # (S*E, H1)
    w_wide = np.transpose(w1.reshape(S, E, H1), (1, 0, 2)).reshape(E, S * H1)
    rpos = np.arange(S * B)[:, None] // B                      # row -> position
    lblk = np.arange(S * H1)[None, :] // H1                    # lane -> block
    m_wide = (rpos == lblk).astype(np.float32)                 # (S*B, S*H1)
    istack_t = np.tile(np.eye(H1, dtype=np.float32), (1, S))   # (H1, S*H1)
    selb = (np.arange(B)[:, None] == np.arange(S * B)[None, :] % B).astype(np.float32)
    meta["mlp"] = {
        "w_wide": wide.add(w_wide), "mask": wide.add(m_wide),
        "istack_t": wide.add(istack_t),
        "selb": main.add(selb), "b1": main.add(p["mlp"][0]["b"]),
        "rest": [{"w": main.add(m["w"]), "b": main.add(m["b"])}
                 for m in p["mlp"][1:]],
    }

    # Unflatten (B,latent)->(latent*B,1) via selector matmul + lane mask.
    LB = L * B
    sel_u = (np.arange(LB)[:, None] % B == np.arange(B)[None, :]).astype(np.float32)
    lanemask = (np.arange(LB)[:, None] // B == np.arange(L)[None, :]).astype(np.float32)
    meta["unflat"] = {"sel": main.add(sel_u), "lanemask": main.add(lanemask),
                      "w": main.add(p["final_inc_w"]), "b": main.add(p["final_inc_b"])}
    meta["final_pos"] = main.add(tile_pos(p["final_pos"]))

    meta["final_pars_enc"] = pack_pars_enc(p["final_pars_enc"])
    meta["final_dec"] = [pack_dec_layer(m) for m in p["final_dec"]]

    # Final flatten + Linear(latent*E, 1): per-row weights + batch selector.
    wf = p["final_w"].reshape(L, E)
    meta["final"] = {"w_per_row": main.add(np.repeat(wf, B, axis=0)),
                     "selb": main.add((np.arange(B)[:, None] ==
                                       np.arange(LB)[None, :] % B).astype(np.float32)),
                     "b": main.add(p["final_b"])}

    meta["masks"] = {"enc": main.add(batch_bias(n_pars, n_pars)),
                     "init_self": main.add(batch_bias(S, S)),
                     "init_cross": main.add(batch_bias(S, n_pars)),
                     "fin_self": main.add(batch_bias(L, L)),
                     "fin_cross": main.add(batch_bias(L, n_pars))}

    meta["cat_offsets"] = tuple(int(x) for x in np.cumsum([0] + list(pars_dims))[:n_pars])

    # Concatenated categorical embedding tables, stored (2P, 1, E) so the
    # kernel can gather rows with a dynamic leading-dim index.
    P_total = int(sum(pars_dims))
    emb_tables = np.concatenate(
        [np.asarray(p["init_pars_enc"]["emb"], np.float32),
         np.asarray(p["final_pars_enc"]["emb"], np.float32)],
        axis=0).reshape(2 * P_total, 1, E)
    meta["init_pars_enc"]["emb_base"] = 0
    meta["final_pars_enc"]["emb_base"] = P_total

    return main.build(), wide.build(), jnp.asarray(emb_tables), meta


# --------------------------- parameter init (deterministic) ------------------

def _uniform(key, shape, fan_in):
    lim = 1.0 / (fan_in ** 0.5)
    return jax.random.uniform(key, shape, jnp.float32, -lim, lim)


def init_linear(key, fan_in, fan_out):
    kw, kb = jax.random.split(key)
    return {"w": _uniform(kw, (fan_in, fan_out), fan_in),
            "b": _uniform(kb, (1, fan_out), fan_in)}


def init_ln(E):
    return {"g": jnp.ones((1, E), jnp.float32), "b": jnp.zeros((1, E), jnp.float32)}


def init_self_mha(key, E):
    ks = jax.random.split(key, 4)
    return {"wqkv": _uniform(ks[0], (E, 3 * E), E), "bqkv": _uniform(ks[1], (1, 3 * E), E),
            "wo": _uniform(ks[2], (E, E), E), "bo": _uniform(ks[3], (1, E), E)}


def init_cross_mha(key, E):
    ks = jax.random.split(key, 6)
    return {"wq": _uniform(ks[0], (E, E), E), "bq": _uniform(ks[1], (1, E), E),
            "wkv": _uniform(ks[2], (E, 2 * E), E), "bkv": _uniform(ks[3], (1, 2 * E), E),
            "wo": _uniform(ks[4], (E, E), E), "bo": _uniform(ks[5], (1, E), E)}


def init_encoder_layer(key, E, hidden):
    ks = jax.random.split(key, 3)
    return {"attn": init_self_mha(ks[0], E), "ln1": init_ln(E),
            "ff1": init_linear(ks[1], E, hidden), "ff2": init_linear(ks[2], hidden, E),
            "ln2": init_ln(E)}


def init_decoder_layer(key, E, hidden):
    ks = jax.random.split(key, 4)
    return {"self": init_self_mha(ks[0], E), "ln1": init_ln(E),
            "cross": init_cross_mha(ks[1], E), "ln2": init_ln(E),
            "ff1": init_linear(ks[2], E, hidden), "ff2": init_linear(ks[3], hidden, E),
            "ln3": init_ln(E)}


def init_pars_encoder(key, E, pars_dims, num_layers):
    P = sum(pars_dims)
    n = len(pars_dims)
    ks = jax.random.split(key, 2 + num_layers)
    return {"emb": jax.random.normal(ks[0], (P, E), jnp.float32),
            "pos": 0.02 * jax.random.normal(ks[1], (n, E), jnp.float32),
            "layers": [init_encoder_layer(ks[2 + i], E, E) for i in range(num_layers)]}


def init_critic_params(key, state_dim, hidden_neurons, E, latent_dim, pars_dims):
    ks = jax.random.split(key, 12)
    mlp_dims = [state_dim * E] + list(hidden_neurons) + [latent_dim]
    kmlp = jax.random.split(ks[4], len(mlp_dims) - 1)
    return {
        "init_pars_enc": init_pars_encoder(ks[0], E, pars_dims, 2),
        "init_state_w": _uniform(ks[1], (1, E), 1),
        "init_state_b": _uniform(jax.random.fold_in(ks[1], 1), (1, E), 1),
        "init_pos": 0.02 * jax.random.normal(ks[2], (state_dim, E), jnp.float32),
        "init_dec": [init_decoder_layer(ks[3], E, E)],
        "mlp": [init_linear(kmlp[i], mlp_dims[i], mlp_dims[i + 1])
                for i in range(len(mlp_dims) - 1)],
        "final_inc_w": _uniform(ks[5], (1, E), 1),
        "final_inc_b": _uniform(jax.random.fold_in(ks[5], 1), (1, E), 1),
        "final_pos": 0.02 * jax.random.normal(ks[6], (latent_dim, E), jnp.float32),
        "final_pars_enc": init_pars_encoder(ks[7], E, pars_dims, 2),
        "final_dec": [init_decoder_layer(ks[8], E, E), init_decoder_layer(ks[9], E, E)],
        "final_w": _uniform(ks[10], (latent_dim * E, 1), latent_dim * E),
        "final_b": _uniform(ks[11], (1, 1), latent_dim * E),
    }


# ------------------------------------ main -----------------------------------

if __name__ == "__main__":
    state_dim, embed_dim, latent_dim = 16, 8, 4
    hidden_neurons = [32, 32]
    pars_dims = (10, 12)
    num_heads = 2
    batch = 2

    key = jax.random.PRNGKey(0)
    kp, ks, kpar = jax.random.split(key, 3)
    params = init_critic_params(kp, state_dim, hidden_neurons, embed_dim,
                                latent_dim, pars_dims)
    state = jax.random.normal(ks, (batch, state_dim), jnp.float32)
    pars = jnp.stack(
        [jax.random.randint(jax.random.fold_in(kpar, i), (batch,), 0, pars_dims[i])
         for i in range(len(pars_dims))], axis=1).astype(jnp.int32)

    # TODO(synk): ParameterEncoder / PositionalEmbedding / DecoderLayer internals
    # were not provided in the source repo; a standard reconstruction is used.
    cfg = dict(state_dim=state_dim, latent_dim=latent_dim, embed_dim=embed_dim,
               num_heads=num_heads, pars_dims=tuple(pars_dims),
               hidden_neurons=tuple(hidden_neurons), batch=batch,
               n_pars=len(pars_dims))

    # One-time host-side packing of all weights into contiguous VMEM slabs.
    main_slab, wide_slab, emb_tables, meta = prepare_params(params, cfg)

    fwd = jax.jit(functools.partial(critic_forward, meta=meta, cfg=cfg))
    out = jax.block_until_ready(fwd(main_slab, wide_slab, emb_tables, state, pars))
    assert out.shape == (batch, 1) and out.dtype == jnp.float32
    print("KERNEL_OK")
</pallas_src>

<mosaic_0001>
module attributes {stable_mosaic.version = 11 : i64} {
  func.func @_critic_kernel(%arg0: memref<32x1xf32, #tpu.memory_space<vmem>>, %arg1: memref<4xi32, #tpu.memory_space<smem>>, %arg2: memref<1176x128xf32, #tpu.memory_space<vmem>>, %arg3: memref<72x512xf32, #tpu.memory_space<vmem>>, %arg4: memref<44x1x8xf32, #tpu.memory_space<vmem>>, %arg5: memref<2x1xf32, #tpu.memory_space<vmem>>) attributes {dimension_semantics = [], scalar_prefetch = 0 : i64, scratch_operands = 0 : i64, tpu.core_type = #tpu.core_type<tc>} {
    %c1088 = arith.constant 1088 : index
    %c0 = arith.constant 0 : index
    %0 = vector.load %arg2[%c1088, %c0] : memref<1176x128xf32, #tpu.memory_space<vmem>>, vector<4x4xf32>
    %c1096 = arith.constant 1096 : index
    %c0_0 = arith.constant 0 : index
    %1 = vector.load %arg2[%c1096, %c0_0] : memref<1176x128xf32, #tpu.memory_space<vmem>>, vector<32x32xf32>
    %c1128 = arith.constant 1128 : index
    %c0_1 = arith.constant 0 : index
    %2 = vector.load %arg2[%c1128, %c0_1] : memref<1176x128xf32, #tpu.memory_space<vmem>>, vector<32x4xf32>
    %c1160 = arith.constant 1160 : index
    %c0_2 = arith.constant 0 : index
    %3 = vector.load %arg2[%c1160, %c0_2] : memref<1176x128xf32, #tpu.memory_space<vmem>>, vector<8x8xf32>
    %c1168 = arith.constant 1168 : index
    %c0_3 = arith.constant 0 : index
    %4 = vector.load %arg2[%c1168, %c0_3] : memref<1176x128xf32, #tpu.memory_space<vmem>>, vector<8x4xf32>
    %c0_4 = arith.constant 0 : index
    %c0_5 = arith.constant 0 : index
    %5 = vector.load %arg0[%c0_4, %c0_5] : memref<32x1xf32, #tpu.memory_space<vmem>>, vector<32x1xf32>
    %c200 = arith.constant 200 : index
    %c0_6 = arith.constant 0 : index
    %6 = vector.load %arg2[%c200, %c0_6] : memref<1176x128xf32, #tpu.memory_space<vmem>>, vector<1x8xf32>
    %7 = vector.broadcast %5 : vector<32x1xf32> to vector<32x8xf32>
    %8 = vector.broadcast %6 : vector<1x8xf32> to vector<32x8xf32>
    %9 = arith.mulf %7, %8 : vector<32x8xf32>
    %c208 = arith.constant 208 : index
    %c0_7 = arith.constant 0 : index
    %10 = vector.load %arg2[%c208, %c0_7] : memref<1176x128xf32, #tpu.memory_space<vmem>>, vector<1x8xf32>
    %11 = vector.broadcast %10 : vector<1x8xf32> to vector<32x8xf32>
    %12 = arith.addf %9, %11 : vector<32x8xf32>
    %cst = arith.constant 0.000000e+00 : f32
    %13 = vector.broadcast %cst : f32 to vector<32x8xf32>
    %14 = arith.cmpf ogt, %12, %13 : vector<32x8xf32>
    %cst_8 = arith.constant 0.00999999977 : f32
    %15 = vector.broadcast %cst_8 : f32 to vector<32x8xf32>
    %16 = arith.mulf %15, %12 : vector<32x8xf32>
    %17 = arith.select %14, %12, %16 : vector<32x8xi1>, vector<32x8xf32>
    %c216 = arith.constant 216 : index
    %c0_9 = arith.constant 0 : index
    %18 = vector.load %arg2[%c216, %c0_9] : memref<1176x128xf32, #tpu.memory_space<vmem>>, vector<32x8xf32>
    %19 = arith.addf %17, %18 : vector<32x8xf32>
    %c0_10 = arith.constant 0 : index
    %20 = memref.load %arg1[%c0_10] : memref<4xi32, #tpu.memory_space<smem>>
    %c0_i32 = arith.constant 0 : i32
    %21 = arith.addi %20, %c0_i32 : i32
    %22 = arith.index_cast %21 : i32 to index
    %c0_11 = arith.constant 0 : index
    %c0_12 = arith.constant 0 : index
    %23 = vector.load %arg4[%22, %c0_11, %c0_12] : memref<44x1x8xf32, #tpu.memory_space<vmem>>, vector<1x1x8xf32>
    %24 = vector.shape_cast %23 : vector<1x1x8xf32> to vector<1x8xf32>
    %c1 = arith.constant 1 : index
    %25 = memref.load %arg1[%c1] : memref<4xi32, #tpu.memory_space<smem>>
    %c0_i32_13 = arith.constant 0 : i32
    %26 = arith.addi %25, %c0_i32_13 : i32
    %27 = arith.index_cast %26 : i32 to index
    %c0_14 = arith.constant 0 : index
    %c0_15 = arith.constant 0 : index
    %28 = vector.load %arg4[%27, %c0_14, %c0_15] : memref<44x1x8xf32, #tpu.memory_space<vmem>>, vector<1x1x8xf32>
    %29 = vector.shape_cast %28 : vector<1x1x8xf32> to vector<1x8xf32>
    %c2 = arith.constant 2 : index
    %30 = memref.load %arg1[%c2] : memref<4xi32, #tpu.memory_space<smem>>
    %c0_i32_16 = arith.constant 0 : i32
    %31 = arith.addi %30, %c0_i32_16 : i32
    %32 = arith.index_cast %31 : i32 to index
    %c0_17 = arith.constant 0 : index
    %c0_18 = arith.constant 0 : index
    %33 = vector.load %arg4[%32, %c0_17, %c0_18] : memref<44x1x8xf32, #tpu.memory_space<vmem>>, vector<1x1x8xf32>
    %34 = vector.shape_cast %33 : vector<1x1x8xf32> to vector<1x8xf32>
    %c3 = arith.constant 3 : index
    %35 = memref.load %arg1[%c3] : memref<4xi32, #tpu.memory_space<smem>>
    %c0_i32_19 = arith.constant 0 : i32
    %36 = arith.addi %35, %c0_i32_19 : i32
    %37 = arith.index_cast %36 : i32 to index
    %c0_20 = arith.constant 0 : index
    %c0_21 = arith.constant 0 : index
    %38 = vector.load %arg4[%37, %c0_20, %c0_21] : memref<44x1x8xf32, #tpu.memory_space<vmem>>, vector<1x1x8xf32>
    %39 = vector.shape_cast %38 : vector<1x1x8xf32> to vector<1x8xf32>
    %40 = tpu.concatenate %24, %29, %34, %39 in 0 : vector<1x8xf32>, vector<1x8xf32>, vector<1x8xf32>, vector<1x8xf32> -> vector<4x8xf32>
    %c0_22 = arith.constant 0 : index
    %c0_23 = arith.constant 0 : index
    %41 = vector.load %arg2[%c0_22, %c0_23] : memref<1176x128xf32, #tpu.memory_space<vmem>>, vector<4x8xf32>
    %42 = arith.addf %40, %41 : vector<4x8xf32>
    %c8 = arith.constant 8 : index
    %c0_24 = arith.constant 0 : index
    %43 = vector.load %arg2[%c8, %c0_24] : memref<1176x128xf32, #tpu.memory_space<vmem>>, vector<8x24xf32>
    %cst_25 = arith.constant dense<0.000000e+00> : vector<4x24xf32>
    %44 = tpu.matmul %42, %43, %cst_25 {dimension_numbers = #tpu.dot_dimension_numbers<[1], [0], [0], [1], [0, 0, 1, 1], [], []>} : vector<4x8xf32>, vector<8x24xf32>, vector<4x24xf32> -> vector<4x24xf32>
    %c16 = arith.constant 16 : index
    %c0_26 = arith.constant 0 : index
    %45 = vector.load %arg2[%c16, %c0_26] : memref<1176x128xf32, #tpu.memory_space<vmem>>, vector<1x24xf32>
    %46 = vector.broadcast %45 : vector<1x24xf32> to vector<4x24xf32>
    %47 = arith.addf %44, %46 : vector<4x24xf32>
    %48 = vector.extract_strided_slice %47 {offsets = [0, 0], sizes = [4, 8], strides = [1, 1]} : vector<4x24xf32> to vector<4x8xf32>
    %49 = vector.extract_strided_slice %47 {offsets = [0, 8], sizes = [4, 8], strides = [1, 1]} : vector<4x24xf32> to vector<4x8xf32>
    %50 = vector.extract_strided_slice %47 {offsets = [0, 16], sizes = [4, 8], strides = [1, 1]} : vector<4x24xf32> to vector<4x8xf32>
    %51 = vector.extract_strided_slice %48 {offsets = [0, 0], sizes = [4, 4], strides = [1, 1]} : vector<4x8xf32> to vector<4x4xf32>
    %52 = vector.extract_strided_slice %49 {offsets = [0, 0], sizes = [4, 4], strides = [1, 1]} : vector<4x8xf32> to vector<4x4xf32>
    %53 = vector.extract_strided_slice %50 {offsets = [0, 0], sizes = [4, 4], strides = [1, 1]} : vector<4x8xf32> to vector<4x4xf32>
    %cst_27 = arith.constant dense<0.000000e+00> : vector<4x4xf32>
    %54 = tpu.matmul %51, %52, %cst_27 {dimension_numbers = #tpu.dot_dimension_numbers<[1], [1], [0], [0], [0, 0, 1, 0], [], []>} : vector<4x4xf32>, vector<4x4xf32>, vector<4x4xf32> -> vector<4x4xf32>
    %55 = arith.addf %54, %0 : vector<4x4xf32>
    %cst_28 = arith.constant dense<0xFF800000> : vector<4xf32>
    %56 = vector.multi_reduction <maximumf>, %55, %cst_28 [1] : vector<4x4xf32> to vector<4xf32>
    %57 = vector.shape_cast %56 : vector<4xf32> to vector<4x1xf32>
    %58 = vector.broadcast %57 : vector<4x1xf32> to vector<4x4xf32>
    %59 = arith.subf %55, %58 : vector<4x4xf32>
    %60 = math.exp %59 : vector<4x4xf32>
    %cst_29 = arith.constant dense<0.000000e+00> : vector<4xf32>
    %61 = vector.multi_reduction <add>, %60, %cst_29 [1] : vector<4x4xf32> to vector<4xf32>
    %62 = vector.shape_cast %61 : vector<4xf32> to vector<4x1xf32>
    %63 = tpu.reciprocal %62 {approx = true} : vector<4x1xf32> -> vector<4x1xf32>
    %64 = vector.broadcast %63 : vector<4x1xf32> to vector<4x4xf32>
    %65 = arith.mulf %60, %64 : vector<4x4xf32>
    %cst_30 = arith.constant dense<0.000000e+00> : vector<4x4xf32>
    %66 = tpu.matmul %65, %53, %cst_30 {dimension_numbers = #tpu.dot_dimension_numbers<[1], [0], [0], [1], [0, 0, 1, 1], [], []>} : vector<4x4xf32>, vector<4x4xf32>, vector<4x4xf32> -> vector<4x4xf32>
    %67 = vector.extract_strided_slice %48 {offsets = [0, 4], sizes = [4, 4], strides = [1, 1]} : vector<4x8xf32> to vector<4x4xf32>
    %68 = vector.extract_strided_slice %49 {offsets = [0, 4], sizes = [4, 4], strides = [1, 1]} : vector<4x8xf32> to vector<4x4xf32>
    %69 = vector.extract_strided_slice %50 {offsets = [0, 4], sizes = [4, 4], strides = [1, 1]} : vector<4x8xf32> to vector<4x4xf32>
    %cst_31 = arith.constant dense<0.000000e+00> : vector<4x4xf32>
    %70 = tpu.matmul %67, %68, %cst_31 {dimension_numbers = #tpu.dot_dimension_numbers<[1], [1], [0], [0], [0, 0, 1, 0], [], []>} : vector<4x4xf32>, vector<4x4xf32>, vector<4x4xf32> -> vector<4x4xf32>
    %71 = arith.addf %70, %0 : vector<4x4xf32>
    %cst_32 = arith.constant dense<0xFF800000> : vector<4xf32>
    %72 = vector.multi_reduction <maximumf>, %71, %cst_32 [1] : vector<4x4xf32> to vector<4xf32>
    %73 = vector.shape_cast %72 : vector<4xf32> to vector<4x1xf32>
    %74 = vector.broadcast %73 : vector<4x1xf32> to vector<4x4xf32>
    %75 = arith.subf %71, %74 : vector<4x4xf32>
    %76 = math.exp %75 : vector<4x4xf32>
    %cst_33 = arith.constant dense<0.000000e+00> : vector<4xf32>
    %77 = vector.multi_reduction <add>, %76, %cst_33 [1] : vector<4x4xf32> to vector<4xf32>
    %78 = vector.shape_cast %77 : vector<4xf32> to vector<4x1xf32>
    %79 = tpu.reciprocal %78 {approx = true} : vector<4x1xf32> -> vector<4x1xf32>
    %80 = vector.broadcast %79 : vector<4x1xf32> to vector<4x4xf32>
    %81 = arith.mulf %76, %80 : vector<4x4xf32>
    %cst_34 = arith.constant dense<0.000000e+00> : vector<4x4xf32>
    %82 = tpu.matmul %81, %69, %cst_34 {dimension_numbers = #tpu.dot_dimension_numbers<[1], [0], [0], [1], [0, 0, 1, 1], [], []>} : vector<4x4xf32>, vector<4x4xf32>, vector<4x4xf32> -> vector<4x4xf32>
    %83 = tpu.concatenate %66, %82 in 1 : vector<4x4xf32>, vector<4x4xf32> -> vector<4x8xf32>
    %c24 = arith.constant 24 : index
    %c0_35 = arith.constant 0 : index
    %84 = vector.load %arg2[%c24, %c0_35] : memref<1176x128xf32, #tpu.memory_space<vmem>>, vector<8x8xf32>
    %cst_36 = arith.constant dense<0.000000e+00> : vector<4x8xf32>
    %85 = tpu.matmul %83, %84, %cst_36 {dimension_numbers = #tpu.dot_dimension_numbers<[1], [0], [0], [1], [0, 0, 1, 1], [], []>} : vector<4x8xf32>, vector<8x8xf32>, vector<4x8xf32> -> vector<4x8xf32>
    %c32 = arith.constant 32 : index
    %c0_37 = arith.constant 0 : index
    %86 = vector.load %arg2[%c32, %c0_37] : memref<1176x128xf32, #tpu.memory_space<vmem>>, vector<1x8xf32>
    %87 = vector.broadcast %86 : vector<1x8xf32> to vector<4x8xf32>
    %88 = arith.addf %85, %87 : vector<4x8xf32>
    %89 = arith.addf %42, %88 : vector<4x8xf32>
    %cst_38 = arith.constant dense<0.000000e+00> : vector<4xf32>
    %90 = vector.multi_reduction <add>, %89, %cst_38 [1] : vector<4x8xf32> to vector<4xf32>
    %91 = vector.shape_cast %90 : vector<4xf32> to vector<4x1xf32>
    %cst_39 = arith.constant 8.000000e+00 : f32
    %92 = vector.broadcast %cst_39 : f32 to vector<4x1xf32>
    %93 = arith.divf %91, %92 : vector<4x1xf32>
    %94 = vector.broadcast %93 : vector<4x1xf32> to vector<4x8xf32>
    %95 = arith.subf %89, %94 : vector<4x8xf32>
    %96 = arith.mulf %95, %95 : vector<4x8xf32>
    %cst_40 = arith.constant dense<0.000000e+00> : vector<4xf32>
    %97 = vector.multi_reduction <add>, %96, %cst_40 [1] : vector<4x8xf32> to vector<4xf32>
    %98 = vector.shape_cast %97 : vector<4xf32> to vector<4x1xf32>
    %cst_41 = arith.constant 8.000000e+00 : f32
    %99 = vector.broadcast %cst_41 : f32 to vector<4x1xf32>
    %100 = arith.divf %98, %99 : vector<4x1xf32>
    %cst_42 = arith.constant 9.99999974E-6 : f32
    %101 = vector.broadcast %cst_42 : f32 to vector<4x1xf32>
    %102 = arith.addf %100, %101 : vector<4x1xf32>
    %103 = math.rsqrt %102 : vector<4x1xf32>
    %104 = vector.broadcast %103 : vector<4x1xf32> to vector<4x8xf32>
    %105 = arith.mulf %95, %104 : vector<4x8xf32>
    %c40 = arith.constant 40 : index
    %c0_43 = arith.constant 0 : index
    %106 = vector.load %arg2[%c40, %c0_43] : memref<1176x128xf32, #tpu.memory_space<vmem>>, vector<1x8xf32>
    %107 = vector.broadcast %106 : vector<1x8xf32> to vector<4x8xf32>
    %108 = arith.mulf %105, %107 : vector<4x8xf32>
    %c48 = arith.constant 48 : index
    %c0_44 = arith.constant 0 : index
    %109 = vector.load %arg2[%c48, %c0_44] : memref<1176x128xf32, #tpu.memory_space<vmem>>, vector<1x8xf32>
    %110 = vector.broadcast %109 : vector<1x8xf32> to vector<4x8xf32>
    %111 = arith.addf %108, %110 : vector<4x8xf32>
    %c56 = arith.constant 56 : index
    %c0_45 = arith.constant 0 : index
    %112 = vector.load %arg2[%c56, %c0_45] : memref<1176x128xf32, #tpu.memory_space<vmem>>, vector<8x8xf32>
    %cst_46 = arith.constant dense<0.000000e+00> : vector<4x8xf32>
    %113 = tpu.matmul %111, %112, %cst_46 {dimension_numbers = #tpu.dot_dimension_numbers<[1], [0], [0], [1], [0, 0, 1, 1], [], []>} : vector<4x8xf32>, vector<8x8xf32>, vector<4x8xf32> -> vector<4x8xf32>
    %c64 = arith.constant 64 : index
    %c0_47 = arith.constant 0 : index
    %114 = vector.load %arg2[%c64, %c0_47] : memref<1176x128xf32, #tpu.memory_space<vmem>>, vector<1x8xf32>
    %115 = vector.broadcast %114 : vector<1x8xf32> to vector<4x8xf32>
    %116 = arith.addf %113, %115 : vector<4x8xf32>
    %cst_48 = arith.constant 0.000000e+00 : f32
    %117 = vector.broadcast %cst_48 : f32 to vector<4x8xf32>
    %118 = arith.cmpf ogt, %116, %117 : vector<4x8xf32>
    %cst_49 = arith.constant 0.00999999977 : f32
    %119 = vector.broadcast %cst_49 : f32 to vector<4x8xf32>
    %120 = arith.mulf %119, %116 : vector<4x8xf32>
    %121 = arith.select %118, %116, %120 : vector<4x8xi1>, vector<4x8xf32>
    %c72 = arith.constant 72 : index
    %c0_50 = arith.constant 0 : index
    %122 = vector.load %arg2[%c72, %c0_50] : memref<1176x128xf32, #tpu.memory_space<vmem>>, vector<8x8xf32>
    %cst_51 = arith.constant dense<0.000000e+00> : vector<4x8xf32>
    %123 = tpu.matmul %121, %122, %cst_51 {dimension_numbers = #tpu.dot_dimension_numbers<[1], [0], [0], [1], [0, 0, 1, 1], [], []>} : vector<4x8xf32>, vector<8x8xf32>, vector<4x8xf32> -> vector<4x8xf32>
    %c80 = arith.constant 80 : index
    %c0_52 = arith.constant 0 : index
    %124 = vector.load %arg2[%c80, %c0_52] : memref<1176x128xf32, #tpu.memory_space<vmem>>, vector<1x8xf32>
    %125 = vector.broadcast %124 : vector<1x8xf32> to vector<4x8xf32>
    %126 = arith.addf %123, %125 : vector<4x8xf32>
    %127 = arith.addf %111, %126 : vector<4x8xf32>
    %cst_53 = arith.constant dense<0.000000e+00> : vector<4xf32>
    %128 = vector.multi_reduction <add>, %127, %cst_53 [1] : vector<4x8xf32> to vector<4xf32>
    %129 = vector.shape_cast %128 : vector<4xf32> to vector<4x1xf32>
    %cst_54 = arith.constant 8.000000e+00 : f32
    %130 = vector.broadcast %cst_54 : f32 to vector<4x1xf32>
    %131 = arith.divf %129, %130 : vector<4x1xf32>
    %132 = vector.broadcast %131 : vector<4x1xf32> to vector<4x8xf32>
    %133 = arith.subf %127, %132 : vector<4x8xf32>
    %134 = arith.mulf %133, %133 : vector<4x8xf32>
    %cst_55 = arith.constant dense<0.000000e+00> : vector<4xf32>
    %135 = vector.multi_reduction <add>, %134, %cst_55 [1] : vector<4x8xf32> to vector<4xf32>
    %136 = vector.shape_cast %135 : vector<4xf32> to vector<4x1xf32>
    %cst_56 = arith.constant 8.000000e+00 : f32
    %137 = vector.broadcast %cst_56 : f32 to vector<4x1xf32>
    %138 = arith.divf %136, %137 : vector<4x1xf32>
    %cst_57 = arith.constant 9.99999974E-6 : f32
    %139 = vector.broadcast %cst_57 : f32 to vector<4x1xf32>
    %140 = arith.addf %138, %139 : vector<4x1xf32>
    %141 = math.rsqrt %140 : vector<4x1xf32>
    %142 = vector.broadcast %141 : vector<4x1xf32> to vector<4x8xf32>
    %143 = arith.mulf %133, %142 : vector<4x8xf32>
    %c88 = arith.constant 88 : index
    %c0_58 = arith.constant 0 : index
    %144 = vector.load %arg2[%c88, %c0_58] : memref<1176x128xf32, #tpu.memory_space<vmem>>, vector<1x8xf32>
    %145 = vector.broadcast %144 : vector<1x8xf32> to vector<4x8xf32>
    %146 = arith.mulf %143, %145 : vector<4x8xf32>
    %c96 = arith.constant 96 : index
    %c0_59 = arith.constant 0 : index
    %147 = vector.load %arg2[%c96, %c0_59] : memref<1176x128xf32, #tpu.memory_space<vmem>>, vector<1x8xf32>
    %148 = vector.broadcast %147 : vector<1x8xf32> to vector<4x8xf32>
    %149 = arith.addf %146, %148 : vector<4x8xf32>
    %c104 = arith.constant 104 : index
    %c0_60 = arith.constant 0 : index
    %150 = vector.load %arg2[%c104, %c0_60] : memref<1176x128xf32, #tpu.memory_space<vmem>>, vector<8x24xf32>
    %cst_61 = arith.constant dense<0.000000e+00> : vector<4x24xf32>
    %151 = tpu.matmul %149, %150, %cst_61 {dimension_numbers = #tpu.dot_dimension_numbers<[1], [0], [0], [1], [0, 0, 1, 1], [], []>} : vector<4x8xf32>, vector<8x24xf32>, vector<4x24xf32> -> vector<4x24xf32>
    %c112 = arith.constant 112 : index
    %c0_62 = arith.constant 0 : index
    %152 = vector.load %arg2[%c112, %c0_62] : memref<1176x128xf32, #tpu.memory_space<vmem>>, vector<1x24xf32>
    %153 = vector.broadcast %152 : vector<1x24xf32> to vector<4x24xf32>
    %154 = arith.addf %151, %153 : vector<4x24xf32>
    %155 = vector.extract_strided_slice %154 {offsets = [0, 0], sizes = [4, 8], strides = [1, 1]} : vector<4x24xf32> to vector<4x8xf32>
    %156 = vector.extract_strided_slice %154 {offsets = [0, 8], sizes = [4, 8], strides = [1, 1]} : vector<4x24xf32> to vector<4x8xf32>
    %157 = vector.extract_strided_slice %154 {offsets = [0, 16], sizes = [4, 8], strides = [1, 1]} : vector<4x24xf32> to vector<4x8xf32>
    %158 = vector.extract_strided_slice %155 {offsets = [0, 0], sizes = [4, 4], strides = [1, 1]} : vector<4x8xf32> to vector<4x4xf32>
    %159 = vector.extract_strided_slice %156 {offsets = [0, 0], sizes = [4, 4], strides = [1, 1]} : vector<4x8xf32> to vector<4x4xf32>
    %160 = vector.extract_strided_slice %157 {offsets = [0, 0], sizes = [4, 4], strides = [1, 1]} : vector<4x8xf32> to vector<4x4xf32>
    %cst_63 = arith.constant dense<0.000000e+00> : vector<4x4xf32>
    %161 = tpu.matmul %158, %159, %cst_63 {dimension_numbers = #tpu.dot_dimension_numbers<[1], [1], [0], [0], [0, 0, 1, 0], [], []>} : vector<4x4xf32>, vector<4x4xf32>, vector<4x4xf32> -> vector<4x4xf32>
    %162 = arith.addf %161, %0 : vector<4x4xf32>
    %cst_64 = arith.constant dense<0xFF800000> : vector<4xf32>
    %163 = vector.multi_reduction <maximumf>, %162, %cst_64 [1] : vector<4x4xf32> to vector<4xf32>
    %164 = vector.shape_cast %163 : vector<4xf32> to vector<4x1xf32>
    %165 = vector.broadcast %164 : vector<4x1xf32> to vector<4x4xf32>
    %166 = arith.subf %162, %165 : vector<4x4xf32>
    %167 = math.exp %166 : vector<4x4xf32>
    %cst_65 = arith.constant dense<0.000000e+00> : vector<4xf32>
    %168 = vector.multi_reduction <add>, %167, %cst_65 [1] : vector<4x4xf32> to vector<4xf32>
    %169 = vector.shape_cast %168 : vector<4xf32> to vector<4x1xf32>
    %170 = tpu.reciprocal %169 {approx = true} : vector<4x1xf32> -> vector<4x1xf32>
    %171 = vector.broadcast %170 : vector<4x1xf32> to vector<4x4xf32>
    %172 = arith.mulf %167, %171 : vector<4x4xf32>
    %cst_66 = arith.constant dense<0.000000e+00> : vector<4x4xf32>
    %173 = tpu.matmul %172, %160, %cst_66 {dimension_numbers = #tpu.dot_dimension_numbers<[1], [0], [0], [1], [0, 0, 1, 1], [], []>} : vector<4x4xf32>, vector<4x4xf32>, vector<4x4xf32> -> vector<4x4xf32>
    %174 = vector.extract_strided_slice %155 {offsets = [0, 4], sizes = [4, 4], strides = [1, 1]} : vector<4x8xf32> to vector<4x4xf32>
    %175 = vector.extract_strided_slice %156 {offsets = [0, 4], sizes = [4, 4], strides = [1, 1]} : vector<4x8xf32> to vector<4x4xf32>
    %176 = vector.extract_strided_slice %157 {offsets = [0, 4], sizes = [4, 4], strides = [1, 1]} : vector<4x8xf32> to vector<4x4xf32>
    %cst_67 = arith.constant dense<0.000000e+00> : vector<4x4xf32>
    %177 = tpu.matmul %174, %175, %cst_67 {dimension_numbers = #tpu.dot_dimension_numbers<[1], [1], [0], [0], [0, 0, 1, 0], [], []>} : vector<4x4xf32>, vector<4x4xf32>, vector<4x4xf32> -> vector<4x4xf32>
    %178 = arith.addf %177, %0 : vector<4x4xf32>
    %cst_68 = arith.constant dense<0xFF800000> : vector<4xf32>
    %179 = vector.multi_reduction <maximumf>, %178, %cst_68 [1] : vector<4x4xf32> to vector<4xf32>
    %180 = vector.shape_cast %179 : vector<4xf32> to vector<4x1xf32>
    %181 = vector.broadcast %180 : vector<4x1xf32> to vector<4x4xf32>
    %182 = arith.subf %178, %181 : vector<4x4xf32>
    %183 = math.exp %182 : vector<4x4xf32>
    %cst_69 = arith.constant dense<0.000000e+00> : vector<4xf32>
    %184 = vector.multi_reduction <add>, %183, %cst_69 [1] : vector<4x4xf32> to vector<4xf32>
    %185 = vector.shape_cast %184 : vector<4xf32> to vector<4x1xf32>
    %186 = tpu.reciprocal %185 {approx = true} : vector<4x1xf32> -> vector<4x1xf32>
    %187 = vector.broadcast %186 : vector<4x1xf32> to vector<4x4xf32>
    %188 = arith.mulf %183, %187 : vector<4x4xf32>
    %cst_70 = arith.constant dense<0.000000e+00> : vector<4x4xf32>
    %189 = tpu.matmul %188, %176, %cst_70 {dimension_numbers = #tpu.dot_dimension_numbers<[1], [0], [0], [1], [0, 0, 1, 1], [], []>} : vector<4x4xf32>, vector<4x4xf32>, vector<4x4xf32> -> vector<4x4xf32>
    %190 = tpu.concatenate %173, %189 in 1 : vector<4x4xf32>, vector<4x4xf32> -> vector<4x8xf32>
    %c120 = arith.constant 120 : index
    %c0_71 = arith.constant 0 : index
    %191 = vector.load %arg2[%c120, %c0_71] : memref<1176x128xf32, #tpu.memory_space<vmem>>, vector<8x8xf32>
    %cst_72 = arith.constant dense<0.000000e+00> : vector<4x8xf32>
    %192 = tpu.matmul %190, %191, %cst_72 {dimension_numbers = #tpu.dot_dimension_numbers<[1], [0], [0], [1], [0, 0, 1, 1], [], []>} : vector<4x8xf32>, vector<8x8xf32>, vector<4x8xf32> -> vector<4x8xf32>
    %c128 = arith.constant 128 : index
    %c0_73 = arith.constant 0 : index
    %193 = vector.load %arg2[%c128, %c0_73] : memref<1176x128xf32, #tpu.memory_space<vmem>>, vector<1x8xf32>
    %194 = vector.broadcast %193 : vector<1x8xf32> to vector<4x8xf32>
    %195 = arith.addf %192, %194 : vector<4x8xf32>
    %196 = arith.addf %149, %195 : vector<4x8xf32>
    %cst_74 = arith.constant dense<0.000000e+00> : vector<4xf32>
    %197 = vector.multi_reduction <add>, %196, %cst_74 [1] : vector<4x8xf32> to vector<4xf32>
    %198 = vector.shape_cast %197 : vector<4xf32> to vector<4x1xf32>
    %cst_75 = arith.constant 8.000000e+00 : f32
    %199 = vector.broadcast %cst_75 : f32 to vector<4x1xf32>
    %200 = arith.divf %198, %199 : vector<4x1xf32>
    %201 = vector.broadcast %200 : vector<4x1xf32> to vector<4x8xf32>
    %202 = arith.subf %196, %201 : vector<4x8xf32>
    %203 = arith.mulf %202, %202 : vector<4x8xf32>
    %cst_76 = arith.constant dense<0.000000e+00> : vector<4xf32>
    %204 = vector.multi_reduction <add>, %203, %cst_76 [1] : vector<4x8xf32> to vector<4xf32>
    %205 = vector.shape_cast %204 : vector<4xf32> to vector<4x1xf32>
    %cst_77 = arith.constant 8.000000e+00 : f32
    %206 = vector.broadcast %cst_77 : f32 to vector<4x1xf32>
    %207 = arith.divf %205, %206 : vector<4x1xf32>
    %cst_78 = arith.constant 9.99999974E-6 : f32
    %208 = vector.broadcast %cst_78 : f32 to vector<4x1xf32>
    %209 = arith.addf %207, %208 : vector<4x1xf32>
    %210 = math.rsqrt %209 : vector<4x1xf32>
    %211 = vector.broadcast %210 : vector<4x1xf32> to vector<4x8xf32>
    %212 = arith.mulf %202, %211 : vector<4x8xf32>
    %c136 = arith.constant 136 : index
    %c0_79 = arith.constant 0 : index
    %213 = vector.load %arg2[%c136, %c0_79] : memref<1176x128xf32, #tpu.memory_space<vmem>>, vector<1x8xf32>
    %214 = vector.broadcast %213 : vector<1x8xf32> to vector<4x8xf32>
    %215 = arith.mulf %212, %214 : vector<4x8xf32>
    %c144 = arith.constant 144 : index
    %c0_80 = arith.constant 0 : index
    %216 = vector.load %arg2[%c144, %c0_80] : memref<1176x128xf32, #tpu.memory_space<vmem>>, vector<1x8xf32>
    %217 = vector.broadcast %216 : vector<1x8xf32> to vector<4x8xf32>
    %218 = arith.addf %215, %217 : vector<4x8xf32>
    %c152 = arith.constant 152 : index
    %c0_81 = arith.constant 0 : index
    %219 = vector.load %arg2[%c152, %c0_81] : memref<1176x128xf32, #tpu.memory_space<vmem>>, vector<8x8xf32>
    %cst_82 = arith.constant dense<0.000000e+00> : vector<4x8xf32>
    %220 = tpu.matmul %218, %219, %cst_82 {dimension_numbers = #tpu.dot_dimension_numbers<[1], [0], [0], [1], [0, 0, 1, 1], [], []>} : vector<4x8xf32>, vector<8x8xf32>, vector<4x8xf32> -> vector<4x8xf32>
    %c160 = arith.constant 160 : index
    %c0_83 = arith.constant 0 : index
    %221 = vector.load %arg2[%c160, %c0_83] : memref<1176x128xf32, #tpu.memory_space<vmem>>, vector<1x8xf32>
    %222 = vector.broadcast %221 : vector<1x8xf32> to vector<4x8xf32>
    %223 = arith.addf %220, %222 : vector<4x8xf32>
    %cst_84 = arith.constant 0.000000e+00 : f32
    %224 = vector.broadcast %cst_84 : f32 to vector<4x8xf32>
    %225 = arith.cmpf ogt, %223, %224 : vector<4x8xf32>
    %cst_85 = arith.constant 0.00999999977 : f32
    %226 = vector.broadcast %cst_85 : f32 to vector<4x8xf32>
    %227 = arith.mulf %226, %223 : vector<4x8xf32>
    %228 = arith.select %225, %223, %227 : vector<4x8xi1>, vector<4x8xf32>
    %c168 = arith.constant 168 : index
    %c0_86 = arith.constant 0 : index
    %229 = vector.load %arg2[%c168, %c0_86] : memref<1176x128xf32, #tpu.memory_space<vmem>>, vector<8x8xf32>
    %cst_87 = arith.constant dense<0.000000e+00> : vector<4x8xf32>
    %230 = tpu.matmul %228, %229, %cst_87 {dimension_numbers = #tpu.dot_dimension_numbers<[1], [0], [0], [1], [0, 0, 1, 1], [], []>} : vector<4x8xf32>, vector<8x8xf32>, vector<4x8xf32> -> vector<4x8xf32>
    %c176 = arith.constant 176 : index
    %c0_88 = arith.constant 0 : index
    %231 = vector.load %arg2[%c176, %c0_88] : memref<1176x128xf32, #tpu.memory_space<vmem>>, vector<1x8xf32>
    %232 = vector.broadcast %231 : vector<1x8xf32> to vector<4x8xf32>
    %233 = arith.addf %230, %232 : vector<4x8xf32>
    %234 = arith.addf %218, %233 : vector<4x8xf32>
    %cst_89 = arith.constant dense<0.000000e+00> : vector<4xf32>
    %235 = vector.multi_reduction <add>, %234, %cst_89 [1] : vector<4x8xf32> to vector<4xf32>
    %236 = vector.shape_cast %235 : vector<4xf32> to vector<4x1xf32>
    %cst_90 = arith.constant 8.000000e+00 : f32
    %237 = vector.broadcast %cst_90 : f32 to vector<4x1xf32>
    %238 = arith.divf %236, %237 : vector<4x1xf32>
    %239 = vector.broadcast %238 : vector<4x1xf32> to vector<4x8xf32>
    %240 = arith.subf %234, %239 : vector<4x8xf32>
    %241 = arith.mulf %240, %240 : vector<4x8xf32>
    %cst_91 = arith.constant dense<0.000000e+00> : vector<4xf32>
    %242 = vector.multi_reduction <add>, %241, %cst_91 [1] : vector<4x8xf32> to vector<4xf32>
    %243 = vector.shape_cast %242 : vector<4xf32> to vector<4x1xf32>
    %cst_92 = arith.constant 8.000000e+00 : f32
    %244 = vector.broadcast %cst_92 : f32 to vector<4x1xf32>
    %245 = arith.divf %243, %244 : vector<4x1xf32>
    %cst_93 = arith.constant 9.99999974E-6 : f32
    %246 = vector.broadcast %cst_93 : f32 to vector<4x1xf32>
    %247 = arith.addf %245, %246 : vector<4x1xf32>
    %248 = math.rsqrt %247 : vector<4x1xf32>
    %249 = vector.broadcast %248 : vector<4x1xf32> to vector<4x8xf32>
    %250 = arith.mulf %240, %249 : vector<4x8xf32>
    %c184 = arith.constant 184 : index
    %c0_94 = arith.constant 0 : index
    %251 = vector.load %arg2[%c184, %c0_94] : memref<1176x128xf32, #tpu.memory_space<vmem>>, vector<1x8xf32>
    %252 = vector.broadcast %251 : vector<1x8xf32> to vector<4x8xf32>
    %253 = arith.mulf %250, %252 : vector<4x8xf32>
    %c192 = arith.constant 192 : index
    %c0_95 = arith.constant 0 : index
    %254 = vector.load %arg2[%c192, %c0_95] : memref<1176x128xf32, #tpu.memory_space<vmem>>, vector<1x8xf32>
    %255 = vector.broadcast %254 : vector<1x8xf32> to vector<4x8xf32>
    %256 = arith.addf %253, %255 : vector<4x8xf32>
    %c248 = arith.constant 248 : index
    %c0_96 = arith.constant 0 : index
    %257 = vector.load %arg2[%c248, %c0_96] : memref<1176x128xf32, #tpu.memory_space<vmem>>, vector<8x24xf32>
    %cst_97 = arith.constant dense<0.000000e+00> : vector<32x24xf32>
    %258 = tpu.matmul %19, %257, %cst_97 {dimension_numbers = #tpu.dot_dimension_numbers<[1], [0], [0], [1], [0, 0, 1, 1], [], []>} : vector<32x8xf32>, vector<8x24xf32>, vector<32x24xf32> -> vector<32x24xf32>
    %c256 = arith.constant 256 : index
    %c0_98 = arith.constant 0 : index
    %259 = vector.load %arg2[%c256, %c0_98] : memref<1176x128xf32, #tpu.memory_space<vmem>>, vector<1x24xf32>
    %260 = vector.broadcast %259 : vector<1x24xf32> to vector<32x24xf32>
    %261 = arith.addf %258, %260 : vector<32x24xf32>
    %262 = vector.extract_strided_slice %261 {offsets = [0, 0], sizes = [32, 8], strides = [1, 1]} : vector<32x24xf32> to vector<32x8xf32>
    %263 = vector.extract_strided_slice %261 {offsets = [0, 8], sizes = [32, 8], strides = [1, 1]} : vector<32x24xf32> to vector<32x8xf32>
    %264 = vector.extract_strided_slice %261 {offsets = [0, 16], sizes = [32, 8], strides = [1, 1]} : vector<32x24xf32> to vector<32x8xf32>
    %265 = vector.extract_strided_slice %262 {offsets = [0, 0], sizes = [32, 4], strides = [1, 1]} : vector<32x8xf32> to vector<32x4xf32>
    %266 = vector.extract_strided_slice %263 {offsets = [0, 0], sizes = [32, 4], strides = [1, 1]} : vector<32x8xf32> to vector<32x4xf32>
    %267 = vector.extract_strided_slice %264 {offsets = [0, 0], sizes = [32, 4], strides = [1, 1]} : vector<32x8xf32> to vector<32x4xf32>
    %cst_99 = arith.constant dense<0.000000e+00> : vector<32x32xf32>
    %268 = tpu.matmul %265, %266, %cst_99 {dimension_numbers = #tpu.dot_dimension_numbers<[1], [1], [0], [0], [0, 0, 1, 0], [], []>} : vector<32x4xf32>, vector<32x4xf32>, vector<32x32xf32> -> vector<32x32xf32>
    %269 = arith.addf %268, %1 : vector<32x32xf32>
    %cst_100 = arith.constant dense<0xFF800000> : vector<32xf32>
    %270 = vector.multi_reduction <maximumf>, %269, %cst_100 [1] : vector<32x32xf32> to vector<32xf32>
    %271 = vector.shape_cast %270 : vector<32xf32> to vector<32x1xf32>
    %272 = vector.broadcast %271 : vector<32x1xf32> to vector<32x32xf32>
    %273 = arith.subf %269, %272 : vector<32x32xf32>
    %274 = math.exp %273 : vector<32x32xf32>
    %cst_101 = arith.constant dense<0.000000e+00> : vector<32xf32>
    %275 = vector.multi_reduction <add>, %274, %cst_101 [1] : vector<32x32xf32> to vector<32xf32>
    %276 = vector.shape_cast %275 : vector<32xf32> to vector<32x1xf32>
    %277 = tpu.reciprocal %276 {approx = true} : vector<32x1xf32> -> vector<32x1xf32>
    %278 = vector.broadcast %277 : vector<32x1xf32> to vector<32x32xf32>
    %279 = arith.mulf %274, %278 : vector<32x32xf32>
    %cst_102 = arith.constant dense<0.000000e+00> : vector<32x4xf32>
    %280 = tpu.matmul %279, %267, %cst_102 {dimension_numbers = #tpu.dot_dimension_numbers<[1], [0], [0], [1], [0, 0, 1, 1], [], []>} : vector<32x32xf32>, vector<32x4xf32>, vector<32x4xf32> -> vector<32x4xf32>
    %281 = vector.extract_strided_slice %262 {offsets = [0, 4], sizes = [32, 4], strides = [1, 1]} : vector<32x8xf32> to vector<32x4xf32>
    %282 = vector.extract_strided_slice %263 {offsets = [0, 4], sizes = [32, 4], strides = [1, 1]} : vector<32x8xf32> to vector<32x4xf32>
    %283 = vector.extract_strided_slice %264 {offsets = [0, 4], sizes = [32, 4], strides = [1, 1]} : vector<32x8xf32> to vector<32x4xf32>
    %cst_103 = arith.constant dense<0.000000e+00> : vector<32x32xf32>
    %284 = tpu.matmul %281, %282, %cst_103 {dimension_numbers = #tpu.dot_dimension_numbers<[1], [1], [0], [0], [0, 0, 1, 0], [], []>} : vector<32x4xf32>, vector<32x4xf32>, vector<32x32xf32> -> vector<32x32xf32>
    %285 = arith.addf %284, %1 : vector<32x32xf32>
    %cst_104 = arith.constant dense<0xFF800000> : vector<32xf32>
    %286 = vector.multi_reduction <maximumf>, %285, %cst_104 [1] : vector<32x32xf32> to vector<32xf32>
    %287 = vector.shape_cast %286 : vector<32xf32> to vector<32x1xf32>
    %288 = vector.broadcast %287 : vector<32x1xf32> to vector<32x32xf32>
    %289 = arith.subf %285, %288 : vector<32x32xf32>
    %290 = math.exp %289 : vector<32x32xf32>
    %cst_105 = arith.constant dense<0.000000e+00> : vector<32xf32>
    %291 = vector.multi_reduction <add>, %290, %cst_105 [1] : vector<32x32xf32> to vector<32xf32>
    %292 = vector.shape_cast %291 : vector<32xf32> to vector<32x1xf32>
    %293 = tpu.reciprocal %292 {approx = true} : vector<32x1xf32> -> vector<32x1xf32>
    %294 = vector.broadcast %293 : vector<32x1xf32> to vector<32x32xf32>
    %295 = arith.mulf %290, %294 : vector<32x32xf32>
    %cst_106 = arith.constant dense<0.000000e+00> : vector<32x4xf32>
    %296 = tpu.matmul %295, %283, %cst_106 {dimension_numbers = #tpu.dot_dimension_numbers<[1], [0], [0], [1], [0, 0, 1, 1], [], []>} : vector<32x32xf32>, vector<32x4xf32>, vector<32x4xf32> -> vector<32x4xf32>
    %297 = tpu.concatenate %280, %296 in 1 : vector<32x4xf32>, vector<32x4xf32> -> vector<32x8xf32>
    %c264 = arith.constant 264 : index
    %c0_107 = arith.constant 0 : index
    %298 = vector.load %arg2[%c264, %c0_107] : memref<1176x128xf32, #tpu.memory_space<vmem>>, vector<8x8xf32>
    %cst_108 = arith.constant dense<0.000000e+00> : vector<32x8xf32>
    %299 = tpu.matmul %297, %298, %cst_108 {dimension_numbers = #tpu.dot_dimension_numbers<[1], [0], [0], [1], [0, 0, 1, 1], [], []>} : vector<32x8xf32>, vector<8x8xf32>, vector<32x8xf32> -> vector<32x8xf32>
    %c272 = arith.constant 272 : index
    %c0_109 = arith.constant 0 : index
    %300 = vector.load %arg2[%c272, %c0_109] : memref<1176x128xf32, #tpu.memory_space<vmem>>, vector<1x8xf32>
    %301 = vector.broadcast %300 : vector<1x8xf32> to vector<32x8xf32>
    %302 = arith.addf %299, %301 : vector<32x8xf32>
    %303 = arith.addf %19, %302 : vector<32x8xf32>
    %cst_110 = arith.constant dense<0.000000e+00> : vector<32xf32>
    %304 = vector.multi_reduction <add>, %303, %cst_110 [1] : vector<32x8xf32> to vector<32xf32>
    %305 = vector.shape_cast %304 : vector<32xf32> to vector<32x1xf32>
    %cst_111 = arith.constant 8.000000e+00 : f32
    %306 = vector.broadcast %cst_111 : f32 to vector<32x1xf32>
    %307 = arith.divf %305, %306 : vector<32x1xf32>
    %308 = vector.broadcast %307 : vector<32x1xf32> to vector<32x8xf32>
    %309 = arith.subf %303, %308 : vector<32x8xf32>
    %310 = arith.mulf %309, %309 : vector<32x8xf32>
    %cst_112 = arith.constant dense<0.000000e+00> : vector<32xf32>
    %311 = vector.multi_reduction <add>, %310, %cst_112 [1] : vector<32x8xf32> to vector<32xf32>
    %312 = vector.shape_cast %311 : vector<32xf32> to vector<32x1xf32>
    %cst_113 = arith.constant 8.000000e+00 : f32
    %313 = vector.broadcast %cst_113 : f32 to vector<32x1xf32>
    %314 = arith.divf %312, %313 : vector<32x1xf32>
    %cst_114 = arith.constant 9.99999974E-6 : f32
    %315 = vector.broadcast %cst_114 : f32 to vector<32x1xf32>
    %316 = arith.addf %314, %315 : vector<32x1xf32>
    %317 = math.rsqrt %316 : vector<32x1xf32>
    %318 = vector.broadcast %317 : vector<32x1xf32> to vector<32x8xf32>
    %319 = arith.mulf %309, %318 : vector<32x8xf32>
    %c280 = arith.constant 280 : index
    %c0_115 = arith.constant 0 : index
    %320 = vector.load %arg2[%c280, %c0_115] : memref<1176x128xf32, #tpu.memory_space<vmem>>, vector<1x8xf32>
    %321 = vector.broadcast %320 : vector<1x8xf32> to vector<32x8xf32>
    %322 = arith.mulf %319, %321 : vector<32x8xf32>
    %c288 = arith.constant 288 : index
    %c0_116 = arith.constant 0 : index
    %323 = vector.load %arg2[%c288, %c0_116] : memref<1176x128xf32, #tpu.memory_space<vmem>>, vector<1x8xf32>
    %324 = vector.broadcast %323 : vector<1x8xf32> to vector<32x8xf32>
    %325 = arith.addf %322, %324 : vector<32x8xf32>
    %c296 = arith.constant 296 : index
    %c0_117 = arith.constant 0 : index
    %326 = vector.load %arg2[%c296, %c0_117] : memref<1176x128xf32, #tpu.memory_space<vmem>>, vector<8x8xf32>
    %cst_118 = arith.constant dense<0.000000e+00> : vector<32x8xf32>
    %327 = tpu.matmul %325, %326, %cst_118 {dimension_numbers = #tpu.dot_dimension_numbers<[1], [0], [0], [1], [0, 0, 1, 1], [], []>} : vector<32x8xf32>, vector<8x8xf32>, vector<32x8xf32> -> vector<32x8xf32>
    %c304 = arith.constant 304 : index
    %c0_119 = arith.constant 0 : index
    %328 = vector.load %arg2[%c304, %c0_119] : memref<1176x128xf32, #tpu.memory_space<vmem>>, vector<1x8xf32>
    %329 = vector.broadcast %328 : vector<1x8xf32> to vector<32x8xf32>
    %330 = arith.addf %327, %329 : vector<32x8xf32>
    %c312 = arith.constant 312 : index
    %c0_120 = arith.constant 0 : index
    %331 = vector.load %arg2[%c312, %c0_120] : memref<1176x128xf32, #tpu.memory_space<vmem>>, vector<8x16xf32>
    %cst_121 = arith.constant dense<0.000000e+00> : vector<4x16xf32>
    %332 = tpu.matmul %256, %331, %cst_121 {dimension_numbers = #tpu.dot_dimension_numbers<[1], [0], [0], [1], [0, 0, 1, 1], [], []>} : vector<4x8xf32>, vector<8x16xf32>, vector<4x16xf32> -> vector<4x16xf32>
    %c320 = arith.constant 320 : index
    %c0_122 = arith.constant 0 : index
    %333 = vector.load %arg2[%c320, %c0_122] : memref<1176x128xf32, #tpu.memory_space<vmem>>, vector<1x16xf32>
    %334 = vector.broadcast %333 : vector<1x16xf32> to vector<4x16xf32>
    %335 = arith.addf %332, %334 : vector<4x16xf32>
    %336 = vector.extract_strided_slice %335 {offsets = [0, 0], sizes = [4, 8], strides = [1, 1]} : vector<4x16xf32> to vector<4x8xf32>
    %337 = vector.extract_strided_slice %335 {offsets = [0, 8], sizes = [4, 8], strides = [1, 1]} : vector<4x16xf32> to vector<4x8xf32>
    %338 = vector.extract_strided_slice %330 {offsets = [0, 0], sizes = [32, 4], strides = [1, 1]} : vector<32x8xf32> to vector<32x4xf32>
    %339 = vector.extract_strided_slice %336 {offsets = [0, 0], sizes = [4, 4], strides = [1, 1]} : vector<4x8xf32> to vector<4x4xf32>
    %340 = vector.extract_strided_slice %337 {offsets = [0, 0], sizes = [4, 4], strides = [1, 1]} : vector<4x8xf32> to vector<4x4xf32>
    %cst_123 = arith.constant dense<0.000000e+00> : vector<32x4xf32>
    %341 = tpu.matmul %338, %339, %cst_123 {dimension_numbers = #tpu.dot_dimension_numbers<[1], [1], [0], [0], [0, 0, 1, 0], [], []>} : vector<32x4xf32>, vector<4x4xf32>, vector<32x4xf32> -> vector<32x4xf32>
    %342 = arith.addf %341, %2 : vector<32x4xf32>
    %cst_124 = arith.constant dense<0xFF800000> : vector<32xf32>
    %343 = vector.multi_reduction <maximumf>, %342, %cst_124 [1] : vector<32x4xf32> to vector<32xf32>
    %344 = vector.shape_cast %343 : vector<32xf32> to vector<32x1xf32>
    %345 = vector.broadcast %344 : vector<32x1xf32> to vector<32x4xf32>
    %346 = arith.subf %342, %345 : vector<32x4xf32>
    %347 = math.exp %346 : vector<32x4xf32>
    %cst_125 = arith.constant dense<0.000000e+00> : vector<32xf32>
    %348 = vector.multi_reduction <add>, %347, %cst_125 [1] : vector<32x4xf32> to vector<32xf32>
    %349 = vector.shape_cast %348 : vector<32xf32> to vector<32x1xf32>
    %350 = tpu.reciprocal %349 {approx = true} : vector<32x1xf32> -> vector<32x1xf32>
    %351 = vector.broadcast %350 : vector<32x1xf32> to vector<32x4xf32>
    %352 = arith.mulf %347, %351 : vector<32x4xf32>
    %cst_126 = arith.constant dense<0.000000e+00> : vector<32x4xf32>
    %353 = tpu.matmul %352, %340, %cst_126 {dimension_numbers = #tpu.dot_dimension_numbers<[1], [0], [0], [1], [0, 0, 1, 1], [], []>} : vector<32x4xf32>, vector<4x4xf32>, vector<32x4xf32> -> vector<32x4xf32>
    %354 = vector.extract_strided_slice %330 {offsets = [0, 4], sizes = [32, 4], strides = [1, 1]} : vector<32x8xf32> to vector<32x4xf32>
    %355 = vector.extract_strided_slice %336 {offsets = [0, 4], sizes = [4, 4], strides = [1, 1]} : vector<4x8xf32> to vector<4x4xf32>
    %356 = vector.extract_strided_slice %337 {offsets = [0, 4], sizes = [4, 4], strides = [1, 1]} : vector<4x8xf32> to vector<4x4xf32>
    %cst_127 = arith.constant dense<0.000000e+00> : vector<32x4xf32>
    %357 = tpu.matmul %354, %355, %cst_127 {dimension_numbers = #tpu.dot_dimension_numbers<[1], [1], [0], [0], [0, 0, 1, 0], [], []>} : vector<32x4xf32>, vector<4x4xf32>, vector<32x4xf32> -> vector<32x4xf32>
    %358 = arith.addf %357, %2 : vector<32x4xf32>
    %cst_128 = arith.constant dense<0xFF800000> : vector<32xf32>
    %359 = vector.multi_reduction <maximumf>, %358, %cst_128 [1] : vector<32x4xf32> to vector<32xf32>
    %360 = vector.shape_cast %359 : vector<32xf32> to vector<32x1xf32>
    %361 = vector.broadcast %360 : vector<32x1xf32> to vector<32x4xf32>
    %362 = arith.subf %358, %361 : vector<32x4xf32>
    %363 = math.exp %362 : vector<32x4xf32>
    %cst_129 = arith.constant dense<0.000000e+00> : vector<32xf32>
    %364 = vector.multi_reduction <add>, %363, %cst_129 [1] : vector<32x4xf32> to vector<32xf32>
    %365 = vector.shape_cast %364 : vector<32xf32> to vector<32x1xf32>
    %366 = tpu.reciprocal %365 {approx = true} : vector<32x1xf32> -> vector<32x1xf32>
    %367 = vector.broadcast %366 : vector<32x1xf32> to vector<32x4xf32>
    %368 = arith.mulf %363, %367 : vector<32x4xf32>
    %cst_130 = arith.constant dense<0.000000e+00> : vector<32x4xf32>
    %369 = tpu.matmul %368, %356, %cst_130 {dimension_numbers = #tpu.dot_dimension_numbers<[1], [0], [0], [1], [0, 0, 1, 1], [], []>} : vector<32x4xf32>, vector<4x4xf32>, vector<32x4xf32> -> vector<32x4xf32>
    %370 = tpu.concatenate %353, %369 in 1 : vector<32x4xf32>, vector<32x4xf32> -> vector<32x8xf32>
    %c328 = arith.constant 328 : index
    %c0_131 = arith.constant 0 : index
    %371 = vector.load %arg2[%c328, %c0_131] : memref<1176x128xf32, #tpu.memory_space<vmem>>, vector<8x8xf32>
    %cst_132 = arith.constant dense<0.000000e+00> : vector<32x8xf32>
    %372 = tpu.matmul %370, %371, %cst_132 {dimension_numbers = #tpu.dot_dimension_numbers<[1], [0], [0], [1], [0, 0, 1, 1], [], []>} : vector<32x8xf32>, vector<8x8xf32>, vector<32x8xf32> -> vector<32x8xf32>
    %c336 = arith.constant 336 : index
    %c0_133 = arith.constant 0 : index
    %373 = vector.load %arg2[%c336, %c0_133] : memref<1176x128xf32, #tpu.memory_space<vmem>>, vector<1x8xf32>
    %374 = vector.broadcast %373 : vector<1x8xf32> to vector<32x8xf32>
    %375 = arith.addf %372, %374 : vector<32x8xf32>
    %376 = arith.addf %325, %375 : vector<32x8xf32>
    %cst_134 = arith.constant dense<0.000000e+00> : vector<32xf32>
    %377 = vector.multi_reduction <add>, %376, %cst_134 [1] : vector<32x8xf32> to vector<32xf32>
    %378 = vector.shape_cast %377 : vector<32xf32> to vector<32x1xf32>
    %cst_135 = arith.constant 8.000000e+00 : f32
    %379 = vector.broadcast %cst_135 : f32 to vector<32x1xf32>
    %380 = arith.divf %378, %379 : vector<32x1xf32>
    %381 = vector.broadcast %380 : vector<32x1xf32> to vector<32x8xf32>
    %382 = arith.subf %376, %381 : vector<32x8xf32>
    %383 = arith.mulf %382, %382 : vector<32x8xf32>
    %cst_136 = arith.constant dense<0.000000e+00> : vector<32xf32>
    %384 = vector.multi_reduction <add>, %383, %cst_136 [1] : vector<32x8xf32> to vector<32xf32>
    %385 = vector.shape_cast %384 : vector<32xf32> to vector<32x1xf32>
    %cst_137 = arith.constant 8.000000e+00 : f32
    %386 = vector.broadcast %cst_137 : f32 to vector<32x1xf32>
    %387 = arith.divf %385, %386 : vector<32x1xf32>
    %cst_138 = arith.constant 9.99999974E-6 : f32
    %388 = vector.broadcast %cst_138 : f32 to vector<32x1xf32>
    %389 = arith.addf %387, %388 : vector<32x1xf32>
    %390 = math.rsqrt %389 : vector<32x1xf32>
    %391 = vector.broadcast %390 : vector<32x1xf32> to vector<32x8xf32>
    %392 = arith.mulf %382, %391 : vector<32x8xf32>
    %c344 = arith.constant 344 : index
    %c0_139 = arith.constant 0 : index
    %393 = vector.load %arg2[%c344, %c0_139] : memref<1176x128xf32, #tpu.memory_space<vmem>>, vector<1x8xf32>
    %394 = vector.broadcast %393 : vector<1x8xf32> to vector<32x8xf32>
    %395 = arith.mulf %392, %394 : vector<32x8xf32>
    %c352 = arith.constant 352 : index
    %c0_140 = arith.constant 0 : index
    %396 = vector.load %arg2[%c352, %c0_140] : memref<1176x128xf32, #tpu.memory_space<vmem>>, vector<1x8xf32>
    %397 = vector.broadcast %396 : vector<1x8xf32> to vector<32x8xf32>
    %398 = arith.addf %395, %397 : vector<32x8xf32>
    %c360 = arith.constant 360 : index
    %c0_141 = arith.constant 0 : index
    %399 = vector.load %arg2[%c360, %c0_141] : memref<1176x128xf32, #tpu.memory_space<vmem>>, vector<8x8xf32>
    %cst_142 = arith.constant dense<0.000000e+00> : vector<32x8xf32>
    %400 = tpu.matmul %398, %399, %cst_142 {dimension_numbers = #tpu.dot_dimension_numbers<[1], [0], [0], [1], [0, 0, 1, 1], [], []>} : vector<32x8xf32>, vector<8x8xf32>, vector<32x8xf32> -> vector<32x8xf32>
    %c368 = arith.constant 368 : index
    %c0_143 = arith.constant 0 : index
    %401 = vector.load %arg2[%c368, %c0_143] : memref<1176x128xf32, #tpu.memory_space<vmem>>, vector<1x8xf32>
    %402 = vector.broadcast %401 : vector<1x8xf32> to vector<32x8xf32>
    %403 = arith.addf %400, %402 : vector<32x8xf32>
    %cst_144 = arith.constant 0.000000e+00 : f32
    %404 = vector.broadcast %cst_144 : f32 to vector<32x8xf32>
    %405 = arith.cmpf ogt, %403, %404 : vector<32x8xf32>
    %cst_145 = arith.constant 0.00999999977 : f32
    %406 = vector.broadcast %cst_145 : f32 to vector<32x8xf32>
    %407 = arith.mulf %406, %403 : vector<32x8xf32>
    %408 = arith.select %405, %403, %407 : vector<32x8xi1>, vector<32x8xf32>
    %c376 = arith.constant 376 : index
    %c0_146 = arith.constant 0 : index
    %409 = vector.load %arg2[%c376, %c0_146] : memref<1176x128xf32, #tpu.memory_space<vmem>>, vector<8x8xf32>
    %cst_147 = arith.constant dense<0.000000e+00> : vector<32x8xf32>
    %410 = tpu.matmul %408, %409, %cst_147 {dimension_numbers = #tpu.dot_dimension_numbers<[1], [0], [0], [1], [0, 0, 1, 1], [], []>} : vector<32x8xf32>, vector<8x8xf32>, vector<32x8xf32> -> vector<32x8xf32>
    %c384 = arith.constant 384 : index
    %c0_148 = arith.constant 0 : index
    %411 = vector.load %arg2[%c384, %c0_148] : memref<1176x128xf32, #tpu.memory_space<vmem>>, vector<1x8xf32>
    %412 = vector.broadcast %411 : vector<1x8xf32> to vector<32x8xf32>
    %413 = arith.addf %410, %412 : vector<32x8xf32>
    %414 = arith.addf %398, %413 : vector<32x8xf32>
    %cst_149 = arith.constant dense<0.000000e+00> : vector<32xf32>
    %415 = vector.multi_reduction <add>, %414, %cst_149 [1] : vector<32x8xf32> to vector<32xf32>
    %416 = vector.shape_cast %415 : vector<32xf32> to vector<32x1xf32>
    %cst_150 = arith.constant 8.000000e+00 : f32
    %417 = vector.broadcast %cst_150 : f32 to vector<32x1xf32>
    %418 = arith.divf %416, %417 : vector<32x1xf32>
    %419 = vector.broadcast %418 : vector<32x1xf32> to vector<32x8xf32>
    %420 = arith.subf %414, %419 : vector<32x8xf32>
    %421 = arith.mulf %420, %420 : vector<32x8xf32>
    %cst_151 = arith.constant dense<0.000000e+00> : vector<32xf32>
    %422 = vector.multi_reduction <add>, %421, %cst_151 [1] : vector<32x8xf32> to vector<32xf32>
    %423 = vector.shape_cast %422 : vector<32xf32> to vector<32x1xf32>
    %cst_152 = arith.constant 8.000000e+00 : f32
    %424 = vector.broadcast %cst_152 : f32 to vector<32x1xf32>
    %425 = arith.divf %423, %424 : vector<32x1xf32>
    %cst_153 = arith.constant 9.99999974E-6 : f32
    %426 = vector.broadcast %cst_153 : f32 to vector<32x1xf32>
    %427 = arith.addf %425, %426 : vector<32x1xf32>
    %428 = math.rsqrt %427 : vector<32x1xf32>
    %429 = vector.broadcast %428 : vector<32x1xf32> to vector<32x8xf32>
    %430 = arith.mulf %420, %429 : vector<32x8xf32>
    %c392 = arith.constant 392 : index
    %c0_154 = arith.constant 0 : index
    %431 = vector.load %arg2[%c392, %c0_154] : memref<1176x128xf32, #tpu.memory_space<vmem>>, vector<1x8xf32>
    %432 = vector.broadcast %431 : vector<1x8xf32> to vector<32x8xf32>
    %433 = arith.mulf %430, %432 : vector<32x8xf32>
    %c400 = arith.constant 400 : index
    %c0_155 = arith.constant 0 : index
    %434 = vector.load %arg2[%c400, %c0_155] : memref<1176x128xf32, #tpu.memory_space<vmem>>, vector<1x8xf32>
    %435 = vector.broadcast %434 : vector<1x8xf32> to vector<32x8xf32>
    %436 = arith.addf %433, %435 : vector<32x8xf32>
    %c0_156 = arith.constant 0 : index
    %c0_157 = arith.constant 0 : index
    %437 = vector.load %arg3[%c0_156, %c0_157] : memref<72x512xf32, #tpu.memory_space<vmem>>, vector<8x512xf32>
    %cst_158 = arith.constant dense<0.000000e+00> : vector<32x512xf32>
    %438 = tpu.matmul %436, %437, %cst_158 {dimension_numbers = #tpu.dot_dimension_numbers<[1], [0], [0], [1], [0, 0, 1, 1], [], []>} : vector<32x8xf32>, vector<8x512xf32>, vector<32x512xf32> -> vector<32x512xf32>
    %c8_159 = arith.constant 8 : index
    %c0_160 = arith.constant 0 : index
    %439 = vector.load %arg3[%c8_159, %c0_160] : memref<72x512xf32, #tpu.memory_space<vmem>>, vector<32x512xf32>
    %440 = arith.mulf %438, %439 : vector<32x512xf32>
    %c408 = arith.constant 408 : index
    %c0_161 = arith.constant 0 : index
    %441 = vector.load %arg2[%c408, %c0_161] : memref<1176x128xf32, #tpu.memory_space<vmem>>, vector<2x32xf32>
    %cst_162 = arith.constant dense<0.000000e+00> : vector<2x512xf32>
    %442 = tpu.matmul %441, %440, %cst_162 {dimension_numbers = #tpu.dot_dimension_numbers<[1], [0], [0], [1], [0, 0, 1, 1], [], []>} : vector<2x32xf32>, vector<32x512xf32>, vector<2x512xf32> -> vector<2x512xf32>
    %c40_163 = arith.constant 40 : index
    %c0_164 = arith.constant 0 : index
    %443 = vector.load %arg3[%c40_163, %c0_164] : memref<72x512xf32, #tpu.memory_space<vmem>>, vector<32x512xf32>
    %cst_165 = arith.constant dense<0.000000e+00> : vector<2x32xf32>
    %444 = tpu.matmul %442, %443, %cst_165 {dimension_numbers = #tpu.dot_dimension_numbers<[1], [1], [0], [0], [0, 0, 1, 0], [], []>} : vector<2x512xf32>, vector<32x512xf32>, vector<2x32xf32> -> vector<2x32xf32>
    %c416 = arith.constant 416 : index
    %c0_166 = arith.constant 0 : index
    %445 = vector.load %arg2[%c416, %c0_166] : memref<1176x128xf32, #tpu.memory_space<vmem>>, vector<1x32xf32>
    %446 = vector.broadcast %445 : vector<1x32xf32> to vector<2x32xf32>
    %447 = arith.addf %444, %446 : vector<2x32xf32>
    %cst_167 = arith.constant 0.000000e+00 : f32
    %448 = vector.broadcast %cst_167 : f32 to vector<2x32xf32>
    %449 = arith.cmpf ogt, %447, %448 : vector<2x32xf32>
    %cst_168 = arith.constant 0.00999999977 : f32
    %450 = vector.broadcast %cst_168 : f32 to vector<2x32xf32>
    %451 = arith.mulf %450, %447 : vector<2x32xf32>
    %452 = arith.select %449, %447, %451 : vector<2x32xi1>, vector<2x32xf32>
    %c424 = arith.constant 424 : index
    %c0_169 = arith.constant 0 : index
    %453 = vector.load %arg2[%c424, %c0_169] : memref<1176x128xf32, #tpu.memory_space<vmem>>, vector<32x32xf32>
    %cst_170 = arith.constant dense<0.000000e+00> : vector<2x32xf32>
    %454 = tpu.matmul %452, %453, %cst_170 {dimension_numbers = #tpu.dot_dimension_numbers<[1], [0], [0], [1], [0, 0, 1, 1], [], []>} : vector<2x32xf32>, vector<32x32xf32>, vector<2x32xf32> -> vector<2x32xf32>
    %c456 = arith.constant 456 : index
    %c0_171 = arith.constant 0 : index
    %455 = vector.load %arg2[%c456, %c0_171] : memref<1176x128xf32, #tpu.memory_space<vmem>>, vector<1x32xf32>
    %456 = vector.broadcast %455 : vector<1x32xf32> to vector<2x32xf32>
    %457 = arith.addf %454, %456 : vector<2x32xf32>
    %cst_172 = arith.constant 0.000000e+00 : f32
    %458 = vector.broadcast %cst_172 : f32 to vector<2x32xf32>
    %459 = arith.cmpf ogt, %457, %458 : vector<2x32xf32>
    %cst_173 = arith.constant 0.00999999977 : f32
    %460 = vector.broadcast %cst_173 : f32 to vector<2x32xf32>
    %461 = arith.mulf %460, %457 : vector<2x32xf32>
    %462 = arith.select %459, %457, %461 : vector<2x32xi1>, vector<2x32xf32>
    %c464 = arith.constant 464 : index
    %c0_174 = arith.constant 0 : index
    %463 = vector.load %arg2[%c464, %c0_174] : memref<1176x128xf32, #tpu.memory_space<vmem>>, vector<32x4xf32>
    %cst_175 = arith.constant dense<0.000000e+00> : vector<2x4xf32>
    %464 = tpu.matmul %462, %463, %cst_175 {dimension_numbers = #tpu.dot_dimension_numbers<[1], [0], [0], [1], [0, 0, 1, 1], [], []>} : vector<2x32xf32>, vector<32x4xf32>, vector<2x4xf32> -> vector<2x4xf32>
    %c496 = arith.constant 496 : index
    %c0_176 = arith.constant 0 : index
    %465 = vector.load %arg2[%c496, %c0_176] : memref<1176x128xf32, #tpu.memory_space<vmem>>, vector<1x4xf32>
    %466 = vector.broadcast %465 : vector<1x4xf32> to vector<2x4xf32>
    %467 = arith.addf %464, %466 : vector<2x4xf32>
    %cst_177 = arith.constant 0.000000e+00 : f32
    %468 = vector.broadcast %cst_177 : f32 to vector<2x4xf32>
    %469 = arith.cmpf ogt, %467, %468 : vector<2x4xf32>
    %cst_178 = arith.constant 0.00999999977 : f32
    %470 = vector.broadcast %cst_178 : f32 to vector<2x4xf32>
    %471 = arith.mulf %470, %467 : vector<2x4xf32>
    %472 = arith.select %469, %467, %471 : vector<2x4xi1>, vector<2x4xf32>
    %c504 = arith.constant 504 : index
    %c0_179 = arith.constant 0 : index
    %473 = vector.load %arg2[%c504, %c0_179] : memref<1176x128xf32, #tpu.memory_space<vmem>>, vector<8x2xf32>
    %cst_180 = arith.constant dense<0.000000e+00> : vector<8x4xf32>
    %474 = tpu.matmul %473, %472, %cst_180 {dimension_numbers = #tpu.dot_dimension_numbers<[1], [0], [0], [1], [0, 0, 1, 1], [], []>} : vector<8x2xf32>, vector<2x4xf32>, vector<8x4xf32> -> vector<8x4xf32>
    %c512 = arith.constant 512 : index
    %c0_181 = arith.constant 0 : index
    %475 = vector.load %arg2[%c512, %c0_181] : memref<1176x128xf32, #tpu.memory_space<vmem>>, vector<8x4xf32>
    %476 = arith.mulf %474, %475 : vector<8x4xf32>
    %cst_182 = arith.constant dense<0.000000e+00> : vector<8xf32>
    %477 = vector.multi_reduction <add>, %476, %cst_182 [1] : vector<8x4xf32> to vector<8xf32>
    %478 = vector.shape_cast %477 : vector<8xf32> to vector<8x1xf32>
    %c520 = arith.constant 520 : index
    %c0_183 = arith.constant 0 : index
    %479 = vector.load %arg2[%c520, %c0_183] : memref<1176x128xf32, #tpu.memory_space<vmem>>, vector<1x8xf32>
    %480 = vector.broadcast %478 : vector<8x1xf32> to vector<8x8xf32>
    %481 = vector.broadcast %479 : vector<1x8xf32> to vector<8x8xf32>
    %482 = arith.mulf %480, %481 : vector<8x8xf32>
    %c528 = arith.constant 528 : index
    %c0_184 = arith.constant 0 : index
    %483 = vector.load %arg2[%c528, %c0_184] : memref<1176x128xf32, #tpu.memory_space<vmem>>, vector<1x8xf32>
    %484 = vector.broadcast %483 : vector<1x8xf32> to vector<8x8xf32>
    %485 = arith.addf %482, %484 : vector<8x8xf32>
    %c536 = arith.constant 536 : index
    %c0_185 = arith.constant 0 : index
    %486 = vector.load %arg2[%c536, %c0_185] : memref<1176x128xf32, #tpu.memory_space<vmem>>, vector<8x8xf32>
    %487 = arith.addf %485, %486 : vector<8x8xf32>
    %c0_186 = arith.constant 0 : index
    %488 = memref.load %arg1[%c0_186] : memref<4xi32, #tpu.memory_space<smem>>
    %c22_i32 = arith.constant 22 : i32
    %489 = arith.addi %488, %c22_i32 : i32
    %490 = arith.index_cast %489 : i32 to index
    %c0_187 = arith.constant 0 : index
    %c0_188 = arith.constant 0 : index
    %491 = vector.load %arg4[%490, %c0_187, %c0_188] : memref<44x1x8xf32, #tpu.memory_space<vmem>>, vector<1x1x8xf32>
    %492 = vector.shape_cast %491 : vector<1x1x8xf32> to vector<1x8xf32>
    %c1_189 = arith.constant 1 : index
    %493 = memref.load %arg1[%c1_189] : memref<4xi32, #tpu.memory_space<smem>>
    %c22_i32_190 = arith.constant 22 : i32
    %494 = arith.addi %493, %c22_i32_190 : i32
    %495 = arith.index_cast %494 : i32 to index
    %c0_191 = arith.constant 0 : index
    %c0_192 = arith.constant 0 : index
    %496 = vector.load %arg4[%495, %c0_191, %c0_192] : memref<44x1x8xf32, #tpu.memory_space<vmem>>, vector<1x1x8xf32>
    %497 = vector.shape_cast %496 : vector<1x1x8xf32> to vector<1x8xf32>
    %c2_193 = arith.constant 2 : index
    %498 = memref.load %arg1[%c2_193] : memref<4xi32, #tpu.memory_space<smem>>
    %c22_i32_194 = arith.constant 22 : i32
    %499 = arith.addi %498, %c22_i32_194 : i32
    %500 = arith.index_cast %499 : i32 to index
    %c0_195 = arith.constant 0 : index
    %c0_196 = arith.constant 0 : index
    %501 = vector.load %arg4[%500, %c0_195, %c0_196] : memref<44x1x8xf32, #tpu.memory_space<vmem>>, vector<1x1x8xf32>
    %502 = vector.shape_cast %501 : vector<1x1x8xf32> to vector<1x8xf32>
    %c3_197 = arith.constant 3 : index
    %503 = memref.load %arg1[%c3_197] : memref<4xi32, #tpu.memory_space<smem>>
    %c22_i32_198 = arith.constant 22 : i32
    %504 = arith.addi %503, %c22_i32_198 : i32
    %505 = arith.index_cast %504 : i32 to index
    %c0_199 = arith.constant 0 : index
    %c0_200 = arith.constant 0 : index
    %506 = vector.load %arg4[%505, %c0_199, %c0_200] : memref<44x1x8xf32, #tpu.memory_space<vmem>>, vector<1x1x8xf32>
    %507 = vector.shape_cast %506 : vector<1x1x8xf32> to vector<1x8xf32>
    %508 = tpu.concatenate %492, %497, %502, %507 in 0 : vector<1x8xf32>, vector<1x8xf32>, vector<1x8xf32>, vector<1x8xf32> -> vector<4x8xf32>
    %c544 = arith.constant 544 : index
    %c0_201 = arith.constant 0 : index
    %509 = vector.load %arg2[%c544, %c0_201] : memref<1176x128xf32, #tpu.memory_space<vmem>>, vector<4x8xf32>
    %510 = arith.addf %508, %509 : vector<4x8xf32>
    %c552 = arith.constant 552 : index
    %c0_202 = arith.constant 0 : index
    %511 = vector.load %arg2[%c552, %c0_202] : memref<1176x128xf32, #tpu.memory_space<vmem>>, vector<8x24xf32>
    %cst_203 = arith.constant dense<0.000000e+00> : vector<4x24xf32>
    %512 = tpu.matmul %510, %511, %cst_203 {dimension_numbers = #tpu.dot_dimension_numbers<[1], [0], [0], [1], [0, 0, 1, 1], [], []>} : vector<4x8xf32>, vector<8x24xf32>, vector<4x24xf32> -> vector<4x24xf32>
    %c560 = arith.constant 560 : index
    %c0_204 = arith.constant 0 : index
    %513 = vector.load %arg2[%c560, %c0_204] : memref<1176x128xf32, #tpu.memory_space<vmem>>, vector<1x24xf32>
    %514 = vector.broadcast %513 : vector<1x24xf32> to vector<4x24xf32>
    %515 = arith.addf %512, %514 : vector<4x24xf32>
    %516 = vector.extract_strided_slice %515 {offsets = [0, 0], sizes = [4, 8], strides = [1, 1]} : vector<4x24xf32> to vector<4x8xf32>
    %517 = vector.extract_strided_slice %515 {offsets = [0, 8], sizes = [4, 8], strides = [1, 1]} : vector<4x24xf32> to vector<4x8xf32>
    %518 = vector.extract_strided_slice %515 {offsets = [0, 16], sizes = [4, 8], strides = [1, 1]} : vector<4x24xf32> to vector<4x8xf32>
    %519 = vector.extract_strided_slice %516 {offsets = [0, 0], sizes = [4, 4], strides = [1, 1]} : vector<4x8xf32> to vector<4x4xf32>
    %520 = vector.extract_strided_slice %517 {offsets = [0, 0], sizes = [4, 4], strides = [1, 1]} : vector<4x8xf32> to vector<4x4xf32>
    %521 = vector.extract_strided_slice %518 {offsets = [0, 0], sizes = [4, 4], strides = [1, 1]} : vector<4x8xf32> to vector<4x4xf32>
    %cst_205 = arith.constant dense<0.000000e+00> : vector<4x4xf32>
    %522 = tpu.matmul %519, %520, %cst_205 {dimension_numbers = #tpu.dot_dimension_numbers<[1], [1], [0], [0], [0, 0, 1, 0], [], []>} : vector<4x4xf32>, vector<4x4xf32>, vector<4x4xf32> -> vector<4x4xf32>
    %523 = arith.addf %522, %0 : vector<4x4xf32>
    %cst_206 = arith.constant dense<0xFF800000> : vector<4xf32>
    %524 = vector.multi_reduction <maximumf>, %523, %cst_206 [1] : vector<4x4xf32> to vector<4xf32>
    %525 = vector.shape_cast %524 : vector<4xf32> to vector<4x1xf32>
    %526 = vector.broadcast %525 : vector<4x1xf32> to vector<4x4xf32>
    %527 = arith.subf %523, %526 : vector<4x4xf32>
    %528 = math.exp %527 : vector<4x4xf32>
    %cst_207 = arith.constant dense<0.000000e+00> : vector<4xf32>
    %529 = vector.multi_reduction <add>, %528, %cst_207 [1] : vector<4x4xf32> to vector<4xf32>
    %530 = vector.shape_cast %529 : vector<4xf32> to vector<4x1xf32>
    %531 = tpu.reciprocal %530 {approx = true} : vector<4x1xf32> -> vector<4x1xf32>
    %532 = vector.broadcast %531 : vector<4x1xf32> to vector<4x4xf32>
    %533 = arith.mulf %528, %532 : vector<4x4xf32>
    %cst_208 = arith.constant dense<0.000000e+00> : vector<4x4xf32>
    %534 = tpu.matmul %533, %521, %cst_208 {dimension_numbers = #tpu.dot_dimension_numbers<[1], [0], [0], [1], [0, 0, 1, 1], [], []>} : vector<4x4xf32>, vector<4x4xf32>, vector<4x4xf32> -> vector<4x4xf32>
    %535 = vector.extract_strided_slice %516 {offsets = [0, 4], sizes = [4, 4], strides = [1, 1]} : vector<4x8xf32> to vector<4x4xf32>
    %536 = vector.extract_strided_slice %517 {offsets = [0, 4], sizes = [4, 4], strides = [1, 1]} : vector<4x8xf32> to vector<4x4xf32>
    %537 = vector.extract_strided_slice %518 {offsets = [0, 4], sizes = [4, 4], strides = [1, 1]} : vector<4x8xf32> to vector<4x4xf32>
    %cst_209 = arith.constant dense<0.000000e+00> : vector<4x4xf32>
    %538 = tpu.matmul %535, %536, %cst_209 {dimension_numbers = #tpu.dot_dimension_numbers<[1], [1], [0], [0], [0, 0, 1, 0], [], []>} : vector<4x4xf32>, vector<4x4xf32>, vector<4x4xf32> -> vector<4x4xf32>
    %539 = arith.addf %538, %0 : vector<4x4xf32>
    %cst_210 = arith.constant dense<0xFF800000> : vector<4xf32>
    %540 = vector.multi_reduction <maximumf>, %539, %cst_210 [1] : vector<4x4xf32> to vector<4xf32>
    %541 = vector.shape_cast %540 : vector<4xf32> to vector<4x1xf32>
    %542 = vector.broadcast %541 : vector<4x1xf32> to vector<4x4xf32>
    %543 = arith.subf %539, %542 : vector<4x4xf32>
    %544 = math.exp %543 : vector<4x4xf32>
    %cst_211 = arith.constant dense<0.000000e+00> : vector<4xf32>
    %545 = vector.multi_reduction <add>, %544, %cst_211 [1] : vector<4x4xf32> to vector<4xf32>
    %546 = vector.shape_cast %545 : vector<4xf32> to vector<4x1xf32>
    %547 = tpu.reciprocal %546 {approx = true} : vector<4x1xf32> -> vector<4x1xf32>
    %548 = vector.broadcast %547 : vector<4x1xf32> to vector<4x4xf32>
    %549 = arith.mulf %544, %548 : vector<4x4xf32>
    %cst_212 = arith.constant dense<0.000000e+00> : vector<4x4xf32>
    %550 = tpu.matmul %549, %537, %cst_212 {dimension_numbers = #tpu.dot_dimension_numbers<[1], [0], [0], [1], [0, 0, 1, 1], [], []>} : vector<4x4xf32>, vector<4x4xf32>, vector<4x4xf32> -> vector<4x4xf32>
    %551 = tpu.concatenate %534, %550 in 1 : vector<4x4xf32>, vector<4x4xf32> -> vector<4x8xf32>
    %c568 = arith.constant 568 : index
    %c0_213 = arith.constant 0 : index
    %552 = vector.load %arg2[%c568, %c0_213] : memref<1176x128xf32, #tpu.memory_space<vmem>>, vector<8x8xf32>
    %cst_214 = arith.constant dense<0.000000e+00> : vector<4x8xf32>
    %553 = tpu.matmul %551, %552, %cst_214 {dimension_numbers = #tpu.dot_dimension_numbers<[1], [0], [0], [1], [0, 0, 1, 1], [], []>} : vector<4x8xf32>, vector<8x8xf32>, vector<4x8xf32> -> vector<4x8xf32>
    %c576 = arith.constant 576 : index
    %c0_215 = arith.constant 0 : index
    %554 = vector.load %arg2[%c576, %c0_215] : memref<1176x128xf32, #tpu.memory_space<vmem>>, vector<1x8xf32>
    %555 = vector.broadcast %554 : vector<1x8xf32> to vector<4x8xf32>
    %556 = arith.addf %553, %555 : vector<4x8xf32>
    %557 = arith.addf %510, %556 : vector<4x8xf32>
    %cst_216 = arith.constant dense<0.000000e+00> : vector<4xf32>
    %558 = vector.multi_reduction <add>, %557, %cst_216 [1] : vector<4x8xf32> to vector<4xf32>
    %559 = vector.shape_cast %558 : vector<4xf32> to vector<4x1xf32>
    %cst_217 = arith.constant 8.000000e+00 : f32
    %560 = vector.broadcast %cst_217 : f32 to vector<4x1xf32>
    %561 = arith.divf %559, %560 : vector<4x1xf32>
    %562 = vector.broadcast %561 : vector<4x1xf32> to vector<4x8xf32>
    %563 = arith.subf %557, %562 : vector<4x8xf32>
    %564 = arith.mulf %563, %563 : vector<4x8xf32>
    %cst_218 = arith.constant dense<0.000000e+00> : vector<4xf32>
    %565 = vector.multi_reduction <add>, %564, %cst_218 [1] : vector<4x8xf32> to vector<4xf32>
    %566 = vector.shape_cast %565 : vector<4xf32> to vector<4x1xf32>
    %cst_219 = arith.constant 8.000000e+00 : f32
    %567 = vector.broadcast %cst_219 : f32 to vector<4x1xf32>
    %568 = arith.divf %566, %567 : vector<4x1xf32>
    %cst_220 = arith.constant 9.99999974E-6 : f32
    %569 = vector.broadcast %cst_220 : f32 to vector<4x1xf32>
    %570 = arith.addf %568, %569 : vector<4x1xf32>
    %571 = math.rsqrt %570 : vector<4x1xf32>
    %572 = vector.broadcast %571 : vector<4x1xf32> to vector<4x8xf32>
    %573 = arith.mulf %563, %572 : vector<4x8xf32>
    %c584 = arith.constant 584 : index
    %c0_221 = arith.constant 0 : index
    %574 = vector.load %arg2[%c584, %c0_221] : memref<1176x128xf32, #tpu.memory_space<vmem>>, vector<1x8xf32>
    %575 = vector.broadcast %574 : vector<1x8xf32> to vector<4x8xf32>
    %576 = arith.mulf %573, %575 : vector<4x8xf32>
    %c592 = arith.constant 592 : index
    %c0_222 = arith.constant 0 : index
    %577 = vector.load %arg2[%c592, %c0_222] : memref<1176x128xf32, #tpu.memory_space<vmem>>, vector<1x8xf32>
    %578 = vector.broadcast %577 : vector<1x8xf32> to vector<4x8xf32>
    %579 = arith.addf %576, %578 : vector<4x8xf32>
    %c600 = arith.constant 600 : index
    %c0_223 = arith.constant 0 : index
    %580 = vector.load %arg2[%c600, %c0_223] : memref<1176x128xf32, #tpu.memory_space<vmem>>, vector<8x8xf32>
    %cst_224 = arith.constant dense<0.000000e+00> : vector<4x8xf32>
    %581 = tpu.matmul %579, %580, %cst_224 {dimension_numbers = #tpu.dot_dimension_numbers<[1], [0], [0], [1], [0, 0, 1, 1], [], []>} : vector<4x8xf32>, vector<8x8xf32>, vector<4x8xf32> -> vector<4x8xf32>
    %c608 = arith.constant 608 : index
    %c0_225 = arith.constant 0 : index
    %582 = vector.load %arg2[%c608, %c0_225] : memref<1176x128xf32, #tpu.memory_space<vmem>>, vector<1x8xf32>
    %583 = vector.broadcast %582 : vector<1x8xf32> to vector<4x8xf32>
    %584 = arith.addf %581, %583 : vector<4x8xf32>
    %cst_226 = arith.constant 0.000000e+00 : f32
    %585 = vector.broadcast %cst_226 : f32 to vector<4x8xf32>
    %586 = arith.cmpf ogt, %584, %585 : vector<4x8xf32>
    %cst_227 = arith.constant 0.00999999977 : f32
    %587 = vector.broadcast %cst_227 : f32 to vector<4x8xf32>
    %588 = arith.mulf %587, %584 : vector<4x8xf32>
    %589 = arith.select %586, %584, %588 : vector<4x8xi1>, vector<4x8xf32>
    %c616 = arith.constant 616 : index
    %c0_228 = arith.constant 0 : index
    %590 = vector.load %arg2[%c616, %c0_228] : memref<1176x128xf32, #tpu.memory_space<vmem>>, vector<8x8xf32>
    %cst_229 = arith.constant dense<0.000000e+00> : vector<4x8xf32>
    %591 = tpu.matmul %589, %590, %cst_229 {dimension_numbers = #tpu.dot_dimension_numbers<[1], [0], [0], [1], [0, 0, 1, 1], [], []>} : vector<4x8xf32>, vector<8x8xf32>, vector<4x8xf32> -> vector<4x8xf32>
    %c624 = arith.constant 624 : index
    %c0_230 = arith.constant 0 : index
    %592 = vector.load %arg2[%c624, %c0_230] : memref<1176x128xf32, #tpu.memory_space<vmem>>, vector<1x8xf32>
    %593 = vector.broadcast %592 : vector<1x8xf32> to vector<4x8xf32>
    %594 = arith.addf %591, %593 : vector<4x8xf32>
    %595 = arith.addf %579, %594 : vector<4x8xf32>
    %cst_231 = arith.constant dense<0.000000e+00> : vector<4xf32>
    %596 = vector.multi_reduction <add>, %595, %cst_231 [1] : vector<4x8xf32> to vector<4xf32>
    %597 = vector.shape_cast %596 : vector<4xf32> to vector<4x1xf32>
    %cst_232 = arith.constant 8.000000e+00 : f32
    %598 = vector.broadcast %cst_232 : f32 to vector<4x1xf32>
    %599 = arith.divf %597, %598 : vector<4x1xf32>
    %600 = vector.broadcast %599 : vector<4x1xf32> to vector<4x8xf32>
    %601 = arith.subf %595, %600 : vector<4x8xf32>
    %602 = arith.mulf %601, %601 : vector<4x8xf32>
    %cst_233 = arith.constant dense<0.000000e+00> : vector<4xf32>
    %603 = vector.multi_reduction <add>, %602, %cst_233 [1] : vector<4x8xf32> to vector<4xf32>
    %604 = vector.shape_cast %603 : vector<4xf32> to vector<4x1xf32>
    %cst_234 = arith.constant 8.000000e+00 : f32
    %605 = vector.broadcast %cst_234 : f32 to vector<4x1xf32>
    %606 = arith.divf %604, %605 : vector<4x1xf32>
    %cst_235 = arith.constant 9.99999974E-6 : f32
    %607 = vector.broadcast %cst_235 : f32 to vector<4x1xf32>
    %608 = arith.addf %606, %607 : vector<4x1xf32>
    %609 = math.rsqrt %608 : vector<4x1xf32>
    %610 = vector.broadcast %609 : vector<4x1xf32> to vector<4x8xf32>
    %611 = arith.mulf %601, %610 : vector<4x8xf32>
    %c632 = arith.constant 632 : index
    %c0_236 = arith.constant 0 : index
    %612 = vector.load %arg2[%c632, %c0_236] : memref<1176x128xf32, #tpu.memory_space<vmem>>, vector<1x8xf32>
    %613 = vector.broadcast %612 : vector<1x8xf32> to vector<4x8xf32>
    %614 = arith.mulf %611, %613 : vector<4x8xf32>
    %c640 = arith.constant 640 : index
    %c0_237 = arith.constant 0 : index
    %615 = vector.load %arg2[%c640, %c0_237] : memref<1176x128xf32, #tpu.memory_space<vmem>>, vector<1x8xf32>
    %616 = vector.broadcast %615 : vector<1x8xf32> to vector<4x8xf32>
    %617 = arith.addf %614, %616 : vector<4x8xf32>
    %c648 = arith.constant 648 : index
    %c0_238 = arith.constant 0 : index
    %618 = vector.load %arg2[%c648, %c0_238] : memref<1176x128xf32, #tpu.memory_space<vmem>>, vector<8x24xf32>
    %cst_239 = arith.constant dense<0.000000e+00> : vector<4x24xf32>
    %619 = tpu.matmul %617, %618, %cst_239 {dimension_numbers = #tpu.dot_dimension_numbers<[1], [0], [0], [1], [0, 0, 1, 1], [], []>} : vector<4x8xf32>, vector<8x24xf32>, vector<4x24xf32> -> vector<4x24xf32>
    %c656 = arith.constant 656 : index
    %c0_240 = arith.constant 0 : index
    %620 = vector.load %arg2[%c656, %c0_240] : memref<1176x128xf32, #tpu.memory_space<vmem>>, vector<1x24xf32>
    %621 = vector.broadcast %620 : vector<1x24xf32> to vector<4x24xf32>
    %622 = arith.addf %619, %621 : vector<4x24xf32>
    %623 = vector.extract_strided_slice %622 {offsets = [0, 0], sizes = [4, 8], strides = [1, 1]} : vector<4x24xf32> to vector<4x8xf32>
    %624 = vector.extract_strided_slice %622 {offsets = [0, 8], sizes = [4, 8], strides = [1, 1]} : vector<4x24xf32> to vector<4x8xf32>
    %625 = vector.extract_strided_slice %622 {offsets = [0, 16], sizes = [4, 8], strides = [1, 1]} : vector<4x24xf32> to vector<4x8xf32>
    %626 = vector.extract_strided_slice %623 {offsets = [0, 0], sizes = [4, 4], strides = [1, 1]} : vector<4x8xf32> to vector<4x4xf32>
    %627 = vector.extract_strided_slice %624 {offsets = [0, 0], sizes = [4, 4], strides = [1, 1]} : vector<4x8xf32> to vector<4x4xf32>
    %628 = vector.extract_strided_slice %625 {offsets = [0, 0], sizes = [4, 4], strides = [1, 1]} : vector<4x8xf32> to vector<4x4xf32>
    %cst_241 = arith.constant dense<0.000000e+00> : vector<4x4xf32>
    %629 = tpu.matmul %626, %627, %cst_241 {dimension_numbers = #tpu.dot_dimension_numbers<[1], [1], [0], [0], [0, 0, 1, 0], [], []>} : vector<4x4xf32>, vector<4x4xf32>, vector<4x4xf32> -> vector<4x4xf32>
    %630 = arith.addf %629, %0 : vector<4x4xf32>
    %cst_242 = arith.constant dense<0xFF800000> : vector<4xf32>
    %631 = vector.multi_reduction <maximumf>, %630, %cst_242 [1] : vector<4x4xf32> to vector<4xf32>
    %632 = vector.shape_cast %631 : vector<4xf32> to vector<4x1xf32>
    %633 = vector.broadcast %632 : vector<4x1xf32> to vector<4x4xf32>
    %634 = arith.subf %630, %633 : vector<4x4xf32>
    %635 = math.exp %634 : vector<4x4xf32>
    %cst_243 = arith.constant dense<0.000000e+00> : vector<4xf32>
    %636 = vector.multi_reduction <add>, %635, %cst_243 [1] : vector<4x4xf32> to vector<4xf32>
    %637 = vector.shape_cast %636 : vector<4xf32> to vector<4x1xf32>
    %638 = tpu.reciprocal %637 {approx = true} : vector<4x1xf32> -> vector<4x1xf32>
    %639 = vector.broadcast %638 : vector<4x1xf32> to vector<4x4xf32>
    %640 = arith.mulf %635, %639 : vector<4x4xf32>
    %cst_244 = arith.constant dense<0.000000e+00> : vector<4x4xf32>
    %641 = tpu.matmul %640, %628, %cst_244 {dimension_numbers = #tpu.dot_dimension_numbers<[1], [0], [0], [1], [0, 0, 1, 1], [], []>} : vector<4x4xf32>, vector<4x4xf32>, vector<4x4xf32> -> vector<4x4xf32>
    %642 = vector.extract_strided_slice %623 {offsets = [0, 4], sizes = [4, 4], strides = [1, 1]} : vector<4x8xf32> to vector<4x4xf32>
    %643 = vector.extract_strided_slice %624 {offsets = [0, 4], sizes = [4, 4], strides = [1, 1]} : vector<4x8xf32> to vector<4x4xf32>
    %644 = vector.extract_strided_slice %625 {offsets = [0, 4], sizes = [4, 4], strides = [1, 1]} : vector<4x8xf32> to vector<4x4xf32>
    %cst_245 = arith.constant dense<0.000000e+00> : vector<4x4xf32>
    %645 = tpu.matmul %642, %643, %cst_245 {dimension_numbers = #tpu.dot_dimension_numbers<[1], [1], [0], [0], [0, 0, 1, 0], [], []>} : vector<4x4xf32>, vector<4x4xf32>, vector<4x4xf32> -> vector<4x4xf32>
    %646 = arith.addf %645, %0 : vector<4x4xf32>
    %cst_246 = arith.constant dense<0xFF800000> : vector<4xf32>
    %647 = vector.multi_reduction <maximumf>, %646, %cst_246 [1] : vector<4x4xf32> to vector<4xf32>
    %648 = vector.shape_cast %647 : vector<4xf32> to vector<4x1xf32>
    %649 = vector.broadcast %648 : vector<4x1xf32> to vector<4x4xf32>
    %650 = arith.subf %646, %649 : vector<4x4xf32>
    %651 = math.exp %650 : vector<4x4xf32>
    %cst_247 = arith.constant dense<0.000000e+00> : vector<4xf32>
    %652 = vector.multi_reduction <add>, %651, %cst_247 [1] : vector<4x4xf32> to vector<4xf32>
    %653 = vector.shape_cast %652 : vector<4xf32> to vector<4x1xf32>
    %654 = tpu.reciprocal %653 {approx = true} : vector<4x1xf32> -> vector<4x1xf32>
    %655 = vector.broadcast %654 : vector<4x1xf32> to vector<4x4xf32>
    %656 = arith.mulf %651, %655 : vector<4x4xf32>
    %cst_248 = arith.constant dense<0.000000e+00> : vector<4x4xf32>
    %657 = tpu.matmul %656, %644, %cst_248 {dimension_numbers = #tpu.dot_dimension_numbers<[1], [0], [0], [1], [0, 0, 1, 1], [], []>} : vector<4x4xf32>, vector<4x4xf32>, vector<4x4xf32> -> vector<4x4xf32>
    %658 = tpu.concatenate %641, %657 in 1 : vector<4x4xf32>, vector<4x4xf32> -> vector<4x8xf32>
    %c664 = arith.constant 664 : index
    %c0_249 = arith.constant 0 : index
    %659 = vector.load %arg2[%c664, %c0_249] : memref<1176x128xf32, #tpu.memory_space<vmem>>, vector<8x8xf32>
    %cst_250 = arith.constant dense<0.000000e+00> : vector<4x8xf32>
    %660 = tpu.matmul %658, %659, %cst_250 {dimension_numbers = #tpu.dot_dimension_numbers<[1], [0], [0], [1], [0, 0, 1, 1], [], []>} : vector<4x8xf32>, vector<8x8xf32>, vector<4x8xf32> -> vector<4x8xf32>
    %c672 = arith.constant 672 : index
    %c0_251 = arith.constant 0 : index
    %661 = vector.load %arg2[%c672, %c0_251] : memref<1176x128xf32, #tpu.memory_space<vmem>>, vector<1x8xf32>
    %662 = vector.broadcast %661 : vector<1x8xf32> to vector<4x8xf32>
    %663 = arith.addf %660, %662 : vector<4x8xf32>
    %664 = arith.addf %617, %663 : vector<4x8xf32>
    %cst_252 = arith.constant dense<0.000000e+00> : vector<4xf32>
    %665 = vector.multi_reduction <add>, %664, %cst_252 [1] : vector<4x8xf32> to vector<4xf32>
    %666 = vector.shape_cast %665 : vector<4xf32> to vector<4x1xf32>
    %cst_253 = arith.constant 8.000000e+00 : f32
    %667 = vector.broadcast %cst_253 : f32 to vector<4x1xf32>
    %668 = arith.divf %666, %667 : vector<4x1xf32>
    %669 = vector.broadcast %668 : vector<4x1xf32> to vector<4x8xf32>
    %670 = arith.subf %664, %669 : vector<4x8xf32>
    %671 = arith.mulf %670, %670 : vector<4x8xf32>
    %cst_254 = arith.constant dense<0.000000e+00> : vector<4xf32>
    %672 = vector.multi_reduction <add>, %671, %cst_254 [1] : vector<4x8xf32> to vector<4xf32>
    %673 = vector.shape_cast %672 : vector<4xf32> to vector<4x1xf32>
    %cst_255 = arith.constant 8.000000e+00 : f32
    %674 = vector.broadcast %cst_255 : f32 to vector<4x1xf32>
    %675 = arith.divf %673, %674 : vector<4x1xf32>
    %cst_256 = arith.constant 9.99999974E-6 : f32
    %676 = vector.broadcast %cst_256 : f32 to vector<4x1xf32>
    %677 = arith.addf %675, %676 : vector<4x1xf32>
    %678 = math.rsqrt %677 : vector<4x1xf32>
    %679 = vector.broadcast %678 : vector<4x1xf32> to vector<4x8xf32>
    %680 = arith.mulf %670, %679 : vector<4x8xf32>
    %c680 = arith.constant 680 : index
    %c0_257 = arith.constant 0 : index
    %681 = vector.load %arg2[%c680, %c0_257] : memref<1176x128xf32, #tpu.memory_space<vmem>>, vector<1x8xf32>
    %682 = vector.broadcast %681 : vector<1x8xf32> to vector<4x8xf32>
    %683 = arith.mulf %680, %682 : vector<4x8xf32>
    %c688 = arith.constant 688 : index
    %c0_258 = arith.constant 0 : index
    %684 = vector.load %arg2[%c688, %c0_258] : memref<1176x128xf32, #tpu.memory_space<vmem>>, vector<1x8xf32>
    %685 = vector.broadcast %684 : vector<1x8xf32> to vector<4x8xf32>
    %686 = arith.addf %683, %685 : vector<4x8xf32>
    %c696 = arith.constant 696 : index
    %c0_259 = arith.constant 0 : index
    %687 = vector.load %arg2[%c696, %c0_259] : memref<1176x128xf32, #tpu.memory_space<vmem>>, vector<8x8xf32>
    %cst_260 = arith.constant dense<0.000000e+00> : vector<4x8xf32>
    %688 = tpu.matmul %686, %687, %cst_260 {dimension_numbers = #tpu.dot_dimension_numbers<[1], [0], [0], [1], [0, 0, 1, 1], [], []>} : vector<4x8xf32>, vector<8x8xf32>, vector<4x8xf32> -> vector<4x8xf32>
    %c704 = arith.constant 704 : index
    %c0_261 = arith.constant 0 : index
    %689 = vector.load %arg2[%c704, %c0_261] : memref<1176x128xf32, #tpu.memory_space<vmem>>, vector<1x8xf32>
    %690 = vector.broadcast %689 : vector<1x8xf32> to vector<4x8xf32>
    %691 = arith.addf %688, %690 : vector<4x8xf32>
    %cst_262 = arith.constant 0.000000e+00 : f32
    %692 = vector.broadcast %cst_262 : f32 to vector<4x8xf32>
    %693 = arith.cmpf ogt, %691, %692 : vector<4x8xf32>
    %cst_263 = arith.constant 0.00999999977 : f32
    %694 = vector.broadcast %cst_263 : f32 to vector<4x8xf32>
    %695 = arith.mulf %694, %691 : vector<4x8xf32>
    %696 = arith.select %693, %691, %695 : vector<4x8xi1>, vector<4x8xf32>
    %c712 = arith.constant 712 : index
    %c0_264 = arith.constant 0 : index
    %697 = vector.load %arg2[%c712, %c0_264] : memref<1176x128xf32, #tpu.memory_space<vmem>>, vector<8x8xf32>
    %cst_265 = arith.constant dense<0.000000e+00> : vector<4x8xf32>
    %698 = tpu.matmul %696, %697, %cst_265 {dimension_numbers = #tpu.dot_dimension_numbers<[1], [0], [0], [1], [0, 0, 1, 1], [], []>} : vector<4x8xf32>, vector<8x8xf32>, vector<4x8xf32> -> vector<4x8xf32>
    %c720 = arith.constant 720 : index
    %c0_266 = arith.constant 0 : index
    %699 = vector.load %arg2[%c720, %c0_266] : memref<1176x128xf32, #tpu.memory_space<vmem>>, vector<1x8xf32>
    %700 = vector.broadcast %699 : vector<1x8xf32> to vector<4x8xf32>
    %701 = arith.addf %698, %700 : vector<4x8xf32>
    %702 = arith.addf %686, %701 : vector<4x8xf32>
    %cst_267 = arith.constant dense<0.000000e+00> : vector<4xf32>
    %703 = vector.multi_reduction <add>, %702, %cst_267 [1] : vector<4x8xf32> to vector<4xf32>
    %704 = vector.shape_cast %703 : vector<4xf32> to vector<4x1xf32>
    %cst_268 = arith.constant 8.000000e+00 : f32
    %705 = vector.broadcast %cst_268 : f32 to vector<4x1xf32>
    %706 = arith.divf %704, %705 : vector<4x1xf32>
    %707 = vector.broadcast %706 : vector<4x1xf32> to vector<4x8xf32>
    %708 = arith.subf %702, %707 : vector<4x8xf32>
    %709 = arith.mulf %708, %708 : vector<4x8xf32>
    %cst_269 = arith.constant dense<0.000000e+00> : vector<4xf32>
    %710 = vector.multi_reduction <add>, %709, %cst_269 [1] : vector<4x8xf32> to vector<4xf32>
    %711 = vector.shape_cast %710 : vector<4xf32> to vector<4x1xf32>
    %cst_270 = arith.constant 8.000000e+00 : f32
    %712 = vector.broadcast %cst_270 : f32 to vector<4x1xf32>
    %713 = arith.divf %711, %712 : vector<4x1xf32>
    %cst_271 = arith.constant 9.99999974E-6 : f32
    %714 = vector.broadcast %cst_271 : f32 to vector<4x1xf32>
    %715 = arith.addf %713, %714 : vector<4x1xf32>
    %716 = math.rsqrt %715 : vector<4x1xf32>
    %717 = vector.broadcast %716 : vector<4x1xf32> to vector<4x8xf32>
    %718 = arith.mulf %708, %717 : vector<4x8xf32>
    %c728 = arith.constant 728 : index
    %c0_272 = arith.constant 0 : index
    %719 = vector.load %arg2[%c728, %c0_272] : memref<1176x128xf32, #tpu.memory_space<vmem>>, vector<1x8xf32>
    %720 = vector.broadcast %719 : vector<1x8xf32> to vector<4x8xf32>
    %721 = arith.mulf %718, %720 : vector<4x8xf32>
    %c736 = arith.constant 736 : index
    %c0_273 = arith.constant 0 : index
    %722 = vector.load %arg2[%c736, %c0_273] : memref<1176x128xf32, #tpu.memory_space<vmem>>, vector<1x8xf32>
    %723 = vector.broadcast %722 : vector<1x8xf32> to vector<4x8xf32>
    %724 = arith.addf %721, %723 : vector<4x8xf32>
    %c744 = arith.constant 744 : index
    %c0_274 = arith.constant 0 : index
    %725 = vector.load %arg2[%c744, %c0_274] : memref<1176x128xf32, #tpu.memory_space<vmem>>, vector<8x24xf32>
    %cst_275 = arith.constant dense<0.000000e+00> : vector<8x24xf32>
    %726 = tpu.matmul %487, %725, %cst_275 {dimension_numbers = #tpu.dot_dimension_numbers<[1], [0], [0], [1], [0, 0, 1, 1], [], []>} : vector<8x8xf32>, vector<8x24xf32>, vector<8x24xf32> -> vector<8x24xf32>
    %c752 = arith.constant 752 : index
    %c0_276 = arith.constant 0 : index
    %727 = vector.load %arg2[%c752, %c0_276] : memref<1176x128xf32, #tpu.memory_space<vmem>>, vector<1x24xf32>
    %728 = vector.broadcast %727 : vector<1x24xf32> to vector<8x24xf32>
    %729 = arith.addf %726, %728 : vector<8x24xf32>
    %730 = vector.extract_strided_slice %729 {offsets = [0, 0], sizes = [8, 8], strides = [1, 1]} : vector<8x24xf32> to vector<8x8xf32>
    %731 = vector.extract_strided_slice %729 {offsets = [0, 8], sizes = [8, 8], strides = [1, 1]} : vector<8x24xf32> to vector<8x8xf32>
    %732 = vector.extract_strided_slice %729 {offsets = [0, 16], sizes = [8, 8], strides = [1, 1]} : vector<8x24xf32> to vector<8x8xf32>
    %733 = vector.extract_strided_slice %730 {offsets = [0, 0], sizes = [8, 4], strides = [1, 1]} : vector<8x8xf32> to vector<8x4xf32>
    %734 = vector.extract_strided_slice %731 {offsets = [0, 0], sizes = [8, 4], strides = [1, 1]} : vector<8x8xf32> to vector<8x4xf32>
    %735 = vector.extract_strided_slice %732 {offsets = [0, 0], sizes = [8, 4], strides = [1, 1]} : vector<8x8xf32> to vector<8x4xf32>
    %cst_277 = arith.constant dense<0.000000e+00> : vector<8x8xf32>
    %736 = tpu.matmul %733, %734, %cst_277 {dimension_numbers = #tpu.dot_dimension_numbers<[1], [1], [0], [0], [0, 0, 1, 0], [], []>} : vector<8x4xf32>, vector<8x4xf32>, vector<8x8xf32> -> vector<8x8xf32>
    %737 = arith.addf %736, %3 : vector<8x8xf32>
    %cst_278 = arith.constant dense<0xFF800000> : vector<8xf32>
    %738 = vector.multi_reduction <maximumf>, %737, %cst_278 [1] : vector<8x8xf32> to vector<8xf32>
    %739 = vector.shape_cast %738 : vector<8xf32> to vector<8x1xf32>
    %740 = vector.broadcast %739 : vector<8x1xf32> to vector<8x8xf32>
    %741 = arith.subf %737, %740 : vector<8x8xf32>
    %742 = math.exp %741 : vector<8x8xf32>
    %cst_279 = arith.constant dense<0.000000e+00> : vector<8xf32>
    %743 = vector.multi_reduction <add>, %742, %cst_279 [1] : vector<8x8xf32> to vector<8xf32>
    %744 = vector.shape_cast %743 : vector<8xf32> to vector<8x1xf32>
    %745 = tpu.reciprocal %744 {approx = true} : vector<8x1xf32> -> vector<8x1xf32>
    %746 = vector.broadcast %745 : vector<8x1xf32> to vector<8x8xf32>
    %747 = arith.mulf %742, %746 : vector<8x8xf32>
    %cst_280 = arith.constant dense<0.000000e+00> : vector<8x4xf32>
    %748 = tpu.matmul %747, %735, %cst_280 {dimension_numbers = #tpu.dot_dimension_numbers<[1], [0], [0], [1], [0, 0, 1, 1], [], []>} : vector<8x8xf32>, vector<8x4xf32>, vector<8x4xf32> -> vector<8x4xf32>
    %749 = vector.extract_strided_slice %730 {offsets = [0, 4], sizes = [8, 4], strides = [1, 1]} : vector<8x8xf32> to vector<8x4xf32>
    %750 = vector.extract_strided_slice %731 {offsets = [0, 4], sizes = [8, 4], strides = [1, 1]} : vector<8x8xf32> to vector<8x4xf32>
    %751 = vector.extract_strided_slice %732 {offsets = [0, 4], sizes = [8, 4], strides = [1, 1]} : vector<8x8xf32> to vector<8x4xf32>
    %cst_281 = arith.constant dense<0.000000e+00> : vector<8x8xf32>
    %752 = tpu.matmul %749, %750, %cst_281 {dimension_numbers = #tpu.dot_dimension_numbers<[1], [1], [0], [0], [0, 0, 1, 0], [], []>} : vector<8x4xf32>, vector<8x4xf32>, vector<8x8xf32> -> vector<8x8xf32>
    %753 = arith.addf %752, %3 : vector<8x8xf32>
    %cst_282 = arith.constant dense<0xFF800000> : vector<8xf32>
    %754 = vector.multi_reduction <maximumf>, %753, %cst_282 [1] : vector<8x8xf32> to vector<8xf32>
    %755 = vector.shape_cast %754 : vector<8xf32> to vector<8x1xf32>
    %756 = vector.broadcast %755 : vector<8x1xf32> to vector<8x8xf32>
    %757 = arith.subf %753, %756 : vector<8x8xf32>
    %758 = math.exp %757 : vector<8x8xf32>
    %cst_283 = arith.constant dense<0.000000e+00> : vector<8xf32>
    %759 = vector.multi_reduction <add>, %758, %cst_283 [1] : vector<8x8xf32> to vector<8xf32>
    %760 = vector.shape_cast %759 : vector<8xf32> to vector<8x1xf32>
    %761 = tpu.reciprocal %760 {approx = true} : vector<8x1xf32> -> vector<8x1xf32>
    %762 = vector.broadcast %761 : vector<8x1xf32> to vector<8x8xf32>
    %763 = arith.mulf %758, %762 : vector<8x8xf32>
    %cst_284 = arith.constant dense<0.000000e+00> : vector<8x4xf32>
    %764 = tpu.matmul %763, %751, %cst_284 {dimension_numbers = #tpu.dot_dimension_numbers<[1], [0], [0], [1], [0, 0, 1, 1], [], []>} : vector<8x8xf32>, vector<8x4xf32>, vector<8x4xf32> -> vector<8x4xf32>
    %765 = tpu.concatenate %748, %764 in 1 : vector<8x4xf32>, vector<8x4xf32> -> vector<8x8xf32>
    %c760 = arith.constant 760 : index
    %c0_285 = arith.constant 0 : index
    %766 = vector.load %arg2[%c760, %c0_285] : memref<1176x128xf32, #tpu.memory_space<vmem>>, vector<8x8xf32>
    %cst_286 = arith.constant dense<0.000000e+00> : vector<8x8xf32>
    %767 = tpu.matmul %765, %766, %cst_286 {dimension_numbers = #tpu.dot_dimension_numbers<[1], [0], [0], [1], [0, 0, 1, 1], [], []>} : vector<8x8xf32>, vector<8x8xf32>, vector<8x8xf32> -> vector<8x8xf32>
    %c768 = arith.constant 768 : index
    %c0_287 = arith.constant 0 : index
    %768 = vector.load %arg2[%c768, %c0_287] : memref<1176x128xf32, #tpu.memory_space<vmem>>, vector<1x8xf32>
    %769 = vector.broadcast %768 : vector<1x8xf32> to vector<8x8xf32>
    %770 = arith.addf %767, %769 : vector<8x8xf32>
    %771 = arith.addf %487, %770 : vector<8x8xf32>
    %cst_288 = arith.constant dense<0.000000e+00> : vector<8xf32>
    %772 = vector.multi_reduction <add>, %771, %cst_288 [1] : vector<8x8xf32> to vector<8xf32>
    %773 = vector.shape_cast %772 : vector<8xf32> to vector<8x1xf32>
    %cst_289 = arith.constant 8.000000e+00 : f32
    %774 = vector.broadcast %cst_289 : f32 to vector<8x1xf32>
    %775 = arith.divf %773, %774 : vector<8x1xf32>
    %776 = vector.broadcast %775 : vector<8x1xf32> to vector<8x8xf32>
    %777 = arith.subf %771, %776 : vector<8x8xf32>
    %778 = arith.mulf %777, %777 : vector<8x8xf32>
    %cst_290 = arith.constant dense<0.000000e+00> : vector<8xf32>
    %779 = vector.multi_reduction <add>, %778, %cst_290 [1] : vector<8x8xf32> to vector<8xf32>
    %780 = vector.shape_cast %779 : vector<8xf32> to vector<8x1xf32>
    %cst_291 = arith.constant 8.000000e+00 : f32
    %781 = vector.broadcast %cst_291 : f32 to vector<8x1xf32>
    %782 = arith.divf %780, %781 : vector<8x1xf32>
    %cst_292 = arith.constant 9.99999974E-6 : f32
    %783 = vector.broadcast %cst_292 : f32 to vector<8x1xf32>
    %784 = arith.addf %782, %783 : vector<8x1xf32>
    %785 = math.rsqrt %784 : vector<8x1xf32>
    %786 = vector.broadcast %785 : vector<8x1xf32> to vector<8x8xf32>
    %787 = arith.mulf %777, %786 : vector<8x8xf32>
    %c776 = arith.constant 776 : index
    %c0_293 = arith.constant 0 : index
    %788 = vector.load %arg2[%c776, %c0_293] : memref<1176x128xf32, #tpu.memory_space<vmem>>, vector<1x8xf32>
    %789 = vector.broadcast %788 : vector<1x8xf32> to vector<8x8xf32>
    %790 = arith.mulf %787, %789 : vector<8x8xf32>
    %c784 = arith.constant 784 : index
    %c0_294 = arith.constant 0 : index
    %791 = vector.load %arg2[%c784, %c0_294] : memref<1176x128xf32, #tpu.memory_space<vmem>>, vector<1x8xf32>
    %792 = vector.broadcast %791 : vector<1x8xf32> to vector<8x8xf32>
    %793 = arith.addf %790, %792 : vector<8x8xf32>
    %c792 = arith.constant 792 : index
    %c0_295 = arith.constant 0 : index
    %794 = vector.load %arg2[%c792, %c0_295] : memref<1176x128xf32, #tpu.memory_space<vmem>>, vector<8x8xf32>
    %cst_296 = arith.constant dense<0.000000e+00> : vector<8x8xf32>
    %795 = tpu.matmul %793, %794, %cst_296 {dimension_numbers = #tpu.dot_dimension_numbers<[1], [0], [0], [1], [0, 0, 1, 1], [], []>} : vector<8x8xf32>, vector<8x8xf32>, vector<8x8xf32> -> vector<8x8xf32>
    %c800 = arith.constant 800 : index
    %c0_297 = arith.constant 0 : index
    %796 = vector.load %arg2[%c800, %c0_297] : memref<1176x128xf32, #tpu.memory_space<vmem>>, vector<1x8xf32>
    %797 = vector.broadcast %796 : vector<1x8xf32> to vector<8x8xf32>
    %798 = arith.addf %795, %797 : vector<8x8xf32>
    %c808 = arith.constant 808 : index
    %c0_298 = arith.constant 0 : index
    %799 = vector.load %arg2[%c808, %c0_298] : memref<1176x128xf32, #tpu.memory_space<vmem>>, vector<8x16xf32>
    %cst_299 = arith.constant dense<0.000000e+00> : vector<4x16xf32>
    %800 = tpu.matmul %724, %799, %cst_299 {dimension_numbers = #tpu.dot_dimension_numbers<[1], [0], [0], [1], [0, 0, 1, 1], [], []>} : vector<4x8xf32>, vector<8x16xf32>, vector<4x16xf32> -> vector<4x16xf32>
    %c816 = arith.constant 816 : index
    %c0_300 = arith.constant 0 : index
    %801 = vector.load %arg2[%c816, %c0_300] : memref<1176x128xf32, #tpu.memory_space<vmem>>, vector<1x16xf32>
    %802 = vector.broadcast %801 : vector<1x16xf32> to vector<4x16xf32>
    %803 = arith.addf %800, %802 : vector<4x16xf32>
    %804 = vector.extract_strided_slice %803 {offsets = [0, 0], sizes = [4, 8], strides = [1, 1]} : vector<4x16xf32> to vector<4x8xf32>
    %805 = vector.extract_strided_slice %803 {offsets = [0, 8], sizes = [4, 8], strides = [1, 1]} : vector<4x16xf32> to vector<4x8xf32>
    %806 = vector.extract_strided_slice %798 {offsets = [0, 0], sizes = [8, 4], strides = [1, 1]} : vector<8x8xf32> to vector<8x4xf32>
    %807 = vector.extract_strided_slice %804 {offsets = [0, 0], sizes = [4, 4], strides = [1, 1]} : vector<4x8xf32> to vector<4x4xf32>
    %808 = vector.extract_strided_slice %805 {offsets = [0, 0], sizes = [4, 4], strides = [1, 1]} : vector<4x8xf32> to vector<4x4xf32>
    %cst_301 = arith.constant dense<0.000000e+00> : vector<8x4xf32>
    %809 = tpu.matmul %806, %807, %cst_301 {dimension_numbers = #tpu.dot_dimension_numbers<[1], [1], [0], [0], [0, 0, 1, 0], [], []>} : vector<8x4xf32>, vector<4x4xf32>, vector<8x4xf32> -> vector<8x4xf32>
    %810 = arith.addf %809, %4 : vector<8x4xf32>
    %cst_302 = arith.constant dense<0xFF800000> : vector<8xf32>
    %811 = vector.multi_reduction <maximumf>, %810, %cst_302 [1] : vector<8x4xf32> to vector<8xf32>
    %812 = vector.shape_cast %811 : vector<8xf32> to vector<8x1xf32>
    %813 = vector.broadcast %812 : vector<8x1xf32> to vector<8x4xf32>
    %814 = arith.subf %810, %813 : vector<8x4xf32>
    %815 = math.exp %814 : vector<8x4xf32>
    %cst_303 = arith.constant dense<0.000000e+00> : vector<8xf32>
    %816 = vector.multi_reduction <add>, %815, %cst_303 [1] : vector<8x4xf32> to vector<8xf32>
    %817 = vector.shape_cast %816 : vector<8xf32> to vector<8x1xf32>
    %818 = tpu.reciprocal %817 {approx = true} : vector<8x1xf32> -> vector<8x1xf32>
    %819 = vector.broadcast %818 : vector<8x1xf32> to vector<8x4xf32>
    %820 = arith.mulf %815, %819 : vector<8x4xf32>
    %cst_304 = arith.constant dense<0.000000e+00> : vector<8x4xf32>
    %821 = tpu.matmul %820, %808, %cst_304 {dimension_numbers = #tpu.dot_dimension_numbers<[1], [0], [0], [1], [0, 0, 1, 1], [], []>} : vector<8x4xf32>, vector<4x4xf32>, vector<8x4xf32> -> vector<8x4xf32>
    %822 = vector.extract_strided_slice %798 {offsets = [0, 4], sizes = [8, 4], strides = [1, 1]} : vector<8x8xf32> to vector<8x4xf32>
    %823 = vector.extract_strided_slice %804 {offsets = [0, 4], sizes = [4, 4], strides = [1, 1]} : vector<4x8xf32> to vector<4x4xf32>
    %824 = vector.extract_strided_slice %805 {offsets = [0, 4], sizes = [4, 4], strides = [1, 1]} : vector<4x8xf32> to vector<4x4xf32>
    %cst_305 = arith.constant dense<0.000000e+00> : vector<8x4xf32>
    %825 = tpu.matmul %822, %823, %cst_305 {dimension_numbers = #tpu.dot_dimension_numbers<[1], [1], [0], [0], [0, 0, 1, 0], [], []>} : vector<8x4xf32>, vector<4x4xf32>, vector<8x4xf32> -> vector<8x4xf32>
    %826 = arith.addf %825, %4 : vector<8x4xf32>
    %cst_306 = arith.constant dense<0xFF800000> : vector<8xf32>
    %827 = vector.multi_reduction <maximumf>, %826, %cst_306 [1] : vector<8x4xf32> to vector<8xf32>
    %828 = vector.shape_cast %827 : vector<8xf32> to vector<8x1xf32>
    %829 = vector.broadcast %828 : vector<8x1xf32> to vector<8x4xf32>
    %830 = arith.subf %826, %829 : vector<8x4xf32>
    %831 = math.exp %830 : vector<8x4xf32>
    %cst_307 = arith.constant dense<0.000000e+00> : vector<8xf32>
    %832 = vector.multi_reduction <add>, %831, %cst_307 [1] : vector<8x4xf32> to vector<8xf32>
    %833 = vector.shape_cast %832 : vector<8xf32> to vector<8x1xf32>
    %834 = tpu.reciprocal %833 {approx = true} : vector<8x1xf32> -> vector<8x1xf32>
    %835 = vector.broadcast %834 : vector<8x1xf32> to vector<8x4xf32>
    %836 = arith.mulf %831, %835 : vector<8x4xf32>
    %cst_308 = arith.constant dense<0.000000e+00> : vector<8x4xf32>
    %837 = tpu.matmul %836, %824, %cst_308 {dimension_numbers = #tpu.dot_dimension_numbers<[1], [0], [0], [1], [0, 0, 1, 1], [], []>} : vector<8x4xf32>, vector<4x4xf32>, vector<8x4xf32> -> vector<8x4xf32>
    %838 = tpu.concatenate %821, %837 in 1 : vector<8x4xf32>, vector<8x4xf32> -> vector<8x8xf32>
    %c824 = arith.constant 824 : index
    %c0_309 = arith.constant 0 : index
    %839 = vector.load %arg2[%c824, %c0_309] : memref<1176x128xf32, #tpu.memory_space<vmem>>, vector<8x8xf32>
    %cst_310 = arith.constant dense<0.000000e+00> : vector<8x8xf32>
    %840 = tpu.matmul %838, %839, %cst_310 {dimension_numbers = #tpu.dot_dimension_numbers<[1], [0], [0], [1], [0, 0, 1, 1], [], []>} : vector<8x8xf32>, vector<8x8xf32>, vector<8x8xf32> -> vector<8x8xf32>
    %c832 = arith.constant 832 : index
    %c0_311 = arith.constant 0 : index
    %841 = vector.load %arg2[%c832, %c0_311] : memref<1176x128xf32, #tpu.memory_space<vmem>>, vector<1x8xf32>
    %842 = vector.broadcast %841 : vector<1x8xf32> to vector<8x8xf32>
    %843 = arith.addf %840, %842 : vector<8x8xf32>
    %844 = arith.addf %793, %843 : vector<8x8xf32>
    %cst_312 = arith.constant dense<0.000000e+00> : vector<8xf32>
    %845 = vector.multi_reduction <add>, %844, %cst_312 [1] : vector<8x8xf32> to vector<8xf32>
    %846 = vector.shape_cast %845 : vector<8xf32> to vector<8x1xf32>
    %cst_313 = arith.constant 8.000000e+00 : f32
    %847 = vector.broadcast %cst_313 : f32 to vector<8x1xf32>
    %848 = arith.divf %846, %847 : vector<8x1xf32>
    %849 = vector.broadcast %848 : vector<8x1xf32> to vector<8x8xf32>
    %850 = arith.subf %844, %849 : vector<8x8xf32>
    %851 = arith.mulf %850, %850 : vector<8x8xf32>
    %cst_314 = arith.constant dense<0.000000e+00> : vector<8xf32>
    %852 = vector.multi_reduction <add>, %851, %cst_314 [1] : vector<8x8xf32> to vector<8xf32>
    %853 = vector.shape_cast %852 : vector<8xf32> to vector<8x1xf32>
    %cst_315 = arith.constant 8.000000e+00 : f32
    %854 = vector.broadcast %cst_315 : f32 to vector<8x1xf32>
    %855 = arith.divf %853, %854 : vector<8x1xf32>
    %cst_316 = arith.constant 9.99999974E-6 : f32
    %856 = vector.broadcast %cst_316 : f32 to vector<8x1xf32>
    %857 = arith.addf %855, %856 : vector<8x1xf32>
    %858 = math.rsqrt %857 : vector<8x1xf32>
    %859 = vector.broadcast %858 : vector<8x1xf32> to vector<8x8xf32>
    %860 = arith.mulf %850, %859 : vector<8x8xf32>
    %c840 = arith.constant 840 : index
    %c0_317 = arith.constant 0 : index
    %861 = vector.load %arg2[%c840, %c0_317] : memref<1176x128xf32, #tpu.memory_space<vmem>>, vector<1x8xf32>
    %862 = vector.broadcast %861 : vector<1x8xf32> to vector<8x8xf32>
    %863 = arith.mulf %860, %862 : vector<8x8xf32>
    %c848 = arith.constant 848 : index
    %c0_318 = arith.constant 0 : index
    %864 = vector.load %arg2[%c848, %c0_318] : memref<1176x128xf32, #tpu.memory_space<vmem>>, vector<1x8xf32>
    %865 = vector.broadcast %864 : vector<1x8xf32> to vector<8x8xf32>
    %866 = arith.addf %863, %865 : vector<8x8xf32>
    %c856 = arith.constant 856 : index
    %c0_319 = arith.constant 0 : index
    %867 = vector.load %arg2[%c856, %c0_319] : memref<1176x128xf32, #tpu.memory_space<vmem>>, vector<8x8xf32>
    %cst_320 = arith.constant dense<0.000000e+00> : vector<8x8xf32>
    %868 = tpu.matmul %866, %867, %cst_320 {dimension_numbers = #tpu.dot_dimension_numbers<[1], [0], [0], [1], [0, 0, 1, 1], [], []>} : vector<8x8xf32>, vector<8x8xf32>, vector<8x8xf32> -> vector<8x8xf32>
    %c864 = arith.constant 864 : index
    %c0_321 = arith.constant 0 : index
    %869 = vector.load %arg2[%c864, %c0_321] : memref<1176x128xf32, #tpu.memory_space<vmem>>, vector<1x8xf32>
    %870 = vector.broadcast %869 : vector<1x8xf32> to vector<8x8xf32>
    %871 = arith.addf %868, %870 : vector<8x8xf32>
    %cst_322 = arith.constant 0.000000e+00 : f32
    %872 = vector.broadcast %cst_322 : f32 to vector<8x8xf32>
    %873 = arith.cmpf ogt, %871, %872 : vector<8x8xf32>
    %cst_323 = arith.constant 0.00999999977 : f32
    %874 = vector.broadcast %cst_323 : f32 to vector<8x8xf32>
    %875 = arith.mulf %874, %871 : vector<8x8xf32>
    %876 = arith.select %873, %871, %875 : vector<8x8xi1>, vector<8x8xf32>
    %c872 = arith.constant 872 : index
    %c0_324 = arith.constant 0 : index
    %877 = vector.load %arg2[%c872, %c0_324] : memref<1176x128xf32, #tpu.memory_space<vmem>>, vector<8x8xf32>
    %cst_325 = arith.constant dense<0.000000e+00> : vector<8x8xf32>
    %878 = tpu.matmul %876, %877, %cst_325 {dimension_numbers = #tpu.dot_dimension_numbers<[1], [0], [0], [1], [0, 0, 1, 1], [], []>} : vector<8x8xf32>, vector<8x8xf32>, vector<8x8xf32> -> vector<8x8xf32>
    %c880 = arith.constant 880 : index
    %c0_326 = arith.constant 0 : index
    %879 = vector.load %arg2[%c880, %c0_326] : memref<1176x128xf32, #tpu.memory_space<vmem>>, vector<1x8xf32>
    %880 = vector.broadcast %879 : vector<1x8xf32> to vector<8x8xf32>
    %881 = arith.addf %878, %880 : vector<8x8xf32>
    %882 = arith.addf %866, %881 : vector<8x8xf32>
    %cst_327 = arith.constant dense<0.000000e+00> : vector<8xf32>
    %883 = vector.multi_reduction <add>, %882, %cst_327 [1] : vector<8x8xf32> to vector<8xf32>
    %884 = vector.shape_cast %883 : vector<8xf32> to vector<8x1xf32>
    %cst_328 = arith.constant 8.000000e+00 : f32
    %885 = vector.broadcast %cst_328 : f32 to vector<8x1xf32>
    %886 = arith.divf %884, %885 : vector<8x1xf32>
    %887 = vector.broadcast %886 : vector<8x1xf32> to vector<8x8xf32>
    %888 = arith.subf %882, %887 : vector<8x8xf32>
    %889 = arith.mulf %888, %888 : vector<8x8xf32>
    %cst_329 = arith.constant dense<0.000000e+00> : vector<8xf32>
    %890 = vector.multi_reduction <add>, %889, %cst_329 [1] : vector<8x8xf32> to vector<8xf32>
    %891 = vector.shape_cast %890 : vector<8xf32> to vector<8x1xf32>
    %cst_330 = arith.constant 8.000000e+00 : f32
    %892 = vector.broadcast %cst_330 : f32 to vector<8x1xf32>
    %893 = arith.divf %891, %892 : vector<8x1xf32>
    %cst_331 = arith.constant 9.99999974E-6 : f32
    %894 = vector.broadcast %cst_331 : f32 to vector<8x1xf32>
    %895 = arith.addf %893, %894 : vector<8x1xf32>
    %896 = math.rsqrt %895 : vector<8x1xf32>
    %897 = vector.broadcast %896 : vector<8x1xf32> to vector<8x8xf32>
    %898 = arith.mulf %888, %897 : vector<8x8xf32>
    %c888 = arith.constant 888 : index
    %c0_332 = arith.constant 0 : index
    %899 = vector.load %arg2[%c888, %c0_332] : memref<1176x128xf32, #tpu.memory_space<vmem>>, vector<1x8xf32>
    %900 = vector.broadcast %899 : vector<1x8xf32> to vector<8x8xf32>
    %901 = arith.mulf %898, %900 : vector<8x8xf32>
    %c896 = arith.constant 896 : index
    %c0_333 = arith.constant 0 : index
    %902 = vector.load %arg2[%c896, %c0_333] : memref<1176x128xf32, #tpu.memory_space<vmem>>, vector<1x8xf32>
    %903 = vector.broadcast %902 : vector<1x8xf32> to vector<8x8xf32>
    %904 = arith.addf %901, %903 : vector<8x8xf32>
    %c904 = arith.constant 904 : index
    %c0_334 = arith.constant 0 : index
    %905 = vector.load %arg2[%c904, %c0_334] : memref<1176x128xf32, #tpu.memory_space<vmem>>, vector<8x24xf32>
    %cst_335 = arith.constant dense<0.000000e+00> : vector<8x24xf32>
    %906 = tpu.matmul %904, %905, %cst_335 {dimension_numbers = #tpu.dot_dimension_numbers<[1], [0], [0], [1], [0, 0, 1, 1], [], []>} : vector<8x8xf32>, vector<8x24xf32>, vector<8x24xf32> -> vector<8x24xf32>
    %c912 = arith.constant 912 : index
    %c0_336 = arith.constant 0 : index
    %907 = vector.load %arg2[%c912, %c0_336] : memref<1176x128xf32, #tpu.memory_space<vmem>>, vector<1x24xf32>
    %908 = vector.broadcast %907 : vector<1x24xf32> to vector<8x24xf32>
    %909 = arith.addf %906, %908 : vector<8x24xf32>
    %910 = vector.extract_strided_slice %909 {offsets = [0, 0], sizes = [8, 8], strides = [1, 1]} : vector<8x24xf32> to vector<8x8xf32>
    %911 = vector.extract_strided_slice %909 {offsets = [0, 8], sizes = [8, 8], strides = [1, 1]} : vector<8x24xf32> to vector<8x8xf32>
    %912 = vector.extract_strided_slice %909 {offsets = [0, 16], sizes = [8, 8], strides = [1, 1]} : vector<8x24xf32> to vector<8x8xf32>
    %913 = vector.extract_strided_slice %910 {offsets = [0, 0], sizes = [8, 4], strides = [1, 1]} : vector<8x8xf32> to vector<8x4xf32>
    %914 = vector.extract_strided_slice %911 {offsets = [0, 0], sizes = [8, 4], strides = [1, 1]} : vector<8x8xf32> to vector<8x4xf32>
    %915 = vector.extract_strided_slice %912 {offsets = [0, 0], sizes = [8, 4], strides = [1, 1]} : vector<8x8xf32> to vector<8x4xf32>
    %cst_337 = arith.constant dense<0.000000e+00> : vector<8x8xf32>
    %916 = tpu.matmul %913, %914, %cst_337 {dimension_numbers = #tpu.dot_dimension_numbers<[1], [1], [0], [0], [0, 0, 1, 0], [], []>} : vector<8x4xf32>, vector<8x4xf32>, vector<8x8xf32> -> vector<8x8xf32>
    %917 = arith.addf %916, %3 : vector<8x8xf32>
    %cst_338 = arith.constant dense<0xFF800000> : vector<8xf32>
    %918 = vector.multi_reduction <maximumf>, %917, %cst_338 [1] : vector<8x8xf32> to vector<8xf32>
    %919 = vector.shape_cast %918 : vector<8xf32> to vector<8x1xf32>
    %920 = vector.broadcast %919 : vector<8x1xf32> to vector<8x8xf32>
    %921 = arith.subf %917, %920 : vector<8x8xf32>
    %922 = math.exp %921 : vector<8x8xf32>
    %cst_339 = arith.constant dense<0.000000e+00> : vector<8xf32>
    %923 = vector.multi_reduction <add>, %922, %cst_339 [1] : vector<8x8xf32> to vector<8xf32>
    %924 = vector.shape_cast %923 : vector<8xf32> to vector<8x1xf32>
    %925 = tpu.reciprocal %924 {approx = true} : vector<8x1xf32> -> vector<8x1xf32>
    %926 = vector.broadcast %925 : vector<8x1xf32> to vector<8x8xf32>
    %927 = arith.mulf %922, %926 : vector<8x8xf32>
    %cst_340 = arith.constant dense<0.000000e+00> : vector<8x4xf32>
    %928 = tpu.matmul %927, %915, %cst_340 {dimension_numbers = #tpu.dot_dimension_numbers<[1], [0], [0], [1], [0, 0, 1, 1], [], []>} : vector<8x8xf32>, vector<8x4xf32>, vector<8x4xf32> -> vector<8x4xf32>
    %929 = vector.extract_strided_slice %910 {offsets = [0, 4], sizes = [8, 4], strides = [1, 1]} : vector<8x8xf32> to vector<8x4xf32>
    %930 = vector.extract_strided_slice %911 {offsets = [0, 4], sizes = [8, 4], strides = [1, 1]} : vector<8x8xf32> to vector<8x4xf32>
    %931 = vector.extract_strided_slice %912 {offsets = [0, 4], sizes = [8, 4], strides = [1, 1]} : vector<8x8xf32> to vector<8x4xf32>
    %cst_341 = arith.constant dense<0.000000e+00> : vector<8x8xf32>
    %932 = tpu.matmul %929, %930, %cst_341 {dimension_numbers = #tpu.dot_dimension_numbers<[1], [1], [0], [0], [0, 0, 1, 0], [], []>} : vector<8x4xf32>, vector<8x4xf32>, vector<8x8xf32> -> vector<8x8xf32>
    %933 = arith.addf %932, %3 : vector<8x8xf32>
    %cst_342 = arith.constant dense<0xFF800000> : vector<8xf32>
    %934 = vector.multi_reduction <maximumf>, %933, %cst_342 [1] : vector<8x8xf32> to vector<8xf32>
    %935 = vector.shape_cast %934 : vector<8xf32> to vector<8x1xf32>
    %936 = vector.broadcast %935 : vector<8x1xf32> to vector<8x8xf32>
    %937 = arith.subf %933, %936 : vector<8x8xf32>
    %938 = math.exp %937 : vector<8x8xf32>
    %cst_343 = arith.constant dense<0.000000e+00> : vector<8xf32>
    %939 = vector.multi_reduction <add>, %938, %cst_343 [1] : vector<8x8xf32> to vector<8xf32>
    %940 = vector.shape_cast %939 : vector<8xf32> to vector<8x1xf32>
    %941 = tpu.reciprocal %940 {approx = true} : vector<8x1xf32> -> vector<8x1xf32>
    %942 = vector.broadcast %941 : vector<8x1xf32> to vector<8x8xf32>
    %943 = arith.mulf %938, %942 : vector<8x8xf32>
    %cst_344 = arith.constant dense<0.000000e+00> : vector<8x4xf32>
    %944 = tpu.matmul %943, %931, %cst_344 {dimension_numbers = #tpu.dot_dimension_numbers<[1], [0], [0], [1], [0, 0, 1, 1], [], []>} : vector<8x8xf32>, vector<8x4xf32>, vector<8x4xf32> -> vector<8x4xf32>
    %945 = tpu.concatenate %928, %944 in 1 : vector<8x4xf32>, vector<8x4xf32> -> vector<8x8xf32>
    %c920 = arith.constant 920 : index
    %c0_345 = arith.constant 0 : index
    %946 = vector.load %arg2[%c920, %c0_345] : memref<1176x128xf32, #tpu.memory_space<vmem>>, vector<8x8xf32>
    %cst_346 = arith.constant dense<0.000000e+00> : vector<8x8xf32>
    %947 = tpu.matmul %945, %946, %cst_346 {dimension_numbers = #tpu.dot_dimension_numbers<[1], [0], [0], [1], [0, 0, 1, 1], [], []>} : vector<8x8xf32>, vector<8x8xf32>, vector<8x8xf32> -> vector<8x8xf32>
    %c928 = arith.constant 928 : index
    %c0_347 = arith.constant 0 : index
    %948 = vector.load %arg2[%c928, %c0_347] : memref<1176x128xf32, #tpu.memory_space<vmem>>, vector<1x8xf32>
    %949 = vector.broadcast %948 : vector<1x8xf32> to vector<8x8xf32>
    %950 = arith.addf %947, %949 : vector<8x8xf32>
    %951 = arith.addf %904, %950 : vector<8x8xf32>
    %cst_348 = arith.constant dense<0.000000e+00> : vector<8xf32>
    %952 = vector.multi_reduction <add>, %951, %cst_348 [1] : vector<8x8xf32> to vector<8xf32>
    %953 = vector.shape_cast %952 : vector<8xf32> to vector<8x1xf32>
    %cst_349 = arith.constant 8.000000e+00 : f32
    %954 = vector.broadcast %cst_349 : f32 to vector<8x1xf32>
    %955 = arith.divf %953, %954 : vector<8x1xf32>
    %956 = vector.broadcast %955 : vector<8x1xf32> to vector<8x8xf32>
    %957 = arith.subf %951, %956 : vector<8x8xf32>
    %958 = arith.mulf %957, %957 : vector<8x8xf32>
    %cst_350 = arith.constant dense<0.000000e+00> : vector<8xf32>
    %959 = vector.multi_reduction <add>, %958, %cst_350 [1] : vector<8x8xf32> to vector<8xf32>
    %960 = vector.shape_cast %959 : vector<8xf32> to vector<8x1xf32>
    %cst_351 = arith.constant 8.000000e+00 : f32
    %961 = vector.broadcast %cst_351 : f32 to vector<8x1xf32>
    %962 = arith.divf %960, %961 : vector<8x1xf32>
    %cst_352 = arith.constant 9.99999974E-6 : f32
    %963 = vector.broadcast %cst_352 : f32 to vector<8x1xf32>
    %964 = arith.addf %962, %963 : vector<8x1xf32>
    %965 = math.rsqrt %964 : vector<8x1xf32>
    %966 = vector.broadcast %965 : vector<8x1xf32> to vector<8x8xf32>
    %967 = arith.mulf %957, %966 : vector<8x8xf32>
    %c936 = arith.constant 936 : index
    %c0_353 = arith.constant 0 : index
    %968 = vector.load %arg2[%c936, %c0_353] : memref<1176x128xf32, #tpu.memory_space<vmem>>, vector<1x8xf32>
    %969 = vector.broadcast %968 : vector<1x8xf32> to vector<8x8xf32>
    %970 = arith.mulf %967, %969 : vector<8x8xf32>
    %c944 = arith.constant 944 : index
    %c0_354 = arith.constant 0 : index
    %971 = vector.load %arg2[%c944, %c0_354] : memref<1176x128xf32, #tpu.memory_space<vmem>>, vector<1x8xf32>
    %972 = vector.broadcast %971 : vector<1x8xf32> to vector<8x8xf32>
    %973 = arith.addf %970, %972 : vector<8x8xf32>
    %c952 = arith.constant 952 : index
    %c0_355 = arith.constant 0 : index
    %974 = vector.load %arg2[%c952, %c0_355] : memref<1176x128xf32, #tpu.memory_space<vmem>>, vector<8x8xf32>
    %cst_356 = arith.constant dense<0.000000e+00> : vector<8x8xf32>
    %975 = tpu.matmul %973, %974, %cst_356 {dimension_numbers = #tpu.dot_dimension_numbers<[1], [0], [0], [1], [0, 0, 1, 1], [], []>} : vector<8x8xf32>, vector<8x8xf32>, vector<8x8xf32> -> vector<8x8xf32>
    %c960 = arith.constant 960 : index
    %c0_357 = arith.constant 0 : index
    %976 = vector.load %arg2[%c960, %c0_357] : memref<1176x128xf32, #tpu.memory_space<vmem>>, vector<1x8xf32>
    %977 = vector.broadcast %976 : vector<1x8xf32> to vector<8x8xf32>
    %978 = arith.addf %975, %977 : vector<8x8xf32>
    %c968 = arith.constant 968 : index
    %c0_358 = arith.constant 0 : index
    %979 = vector.load %arg2[%c968, %c0_358] : memref<1176x128xf32, #tpu.memory_space<vmem>>, vector<8x16xf32>
    %cst_359 = arith.constant dense<0.000000e+00> : vector<4x16xf32>
    %980 = tpu.matmul %724, %979, %cst_359 {dimension_numbers = #tpu.dot_dimension_numbers<[1], [0], [0], [1], [0, 0, 1, 1], [], []>} : vector<4x8xf32>, vector<8x16xf32>, vector<4x16xf32> -> vector<4x16xf32>
    %c976 = arith.constant 976 : index
    %c0_360 = arith.constant 0 : index
    %981 = vector.load %arg2[%c976, %c0_360] : memref<1176x128xf32, #tpu.memory_space<vmem>>, vector<1x16xf32>
    %982 = vector.broadcast %981 : vector<1x16xf32> to vector<4x16xf32>
    %983 = arith.addf %980, %982 : vector<4x16xf32>
    %984 = vector.extract_strided_slice %983 {offsets = [0, 0], sizes = [4, 8], strides = [1, 1]} : vector<4x16xf32> to vector<4x8xf32>
    %985 = vector.extract_strided_slice %983 {offsets = [0, 8], sizes = [4, 8], strides = [1, 1]} : vector<4x16xf32> to vector<4x8xf32>
    %986 = vector.extract_strided_slice %978 {offsets = [0, 0], sizes = [8, 4], strides = [1, 1]} : vector<8x8xf32> to vector<8x4xf32>
    %987 = vector.extract_strided_slice %984 {offsets = [0, 0], sizes = [4, 4], strides = [1, 1]} : vector<4x8xf32> to vector<4x4xf32>
    %988 = vector.extract_strided_slice %985 {offsets = [0, 0], sizes = [4, 4], strides = [1, 1]} : vector<4x8xf32> to vector<4x4xf32>
    %cst_361 = arith.constant dense<0.000000e+00> : vector<8x4xf32>
    %989 = tpu.matmul %986, %987, %cst_361 {dimension_numbers = #tpu.dot_dimension_numbers<[1], [1], [0], [0], [0, 0, 1, 0], [], []>} : vector<8x4xf32>, vector<4x4xf32>, vector<8x4xf32> -> vector<8x4xf32>
    %990 = arith.addf %989, %4 : vector<8x4xf32>
    %cst_362 = arith.constant dense<0xFF800000> : vector<8xf32>
    %991 = vector.multi_reduction <maximumf>, %990, %cst_362 [1] : vector<8x4xf32> to vector<8xf32>
    %992 = vector.shape_cast %991 : vector<8xf32> to vector<8x1xf32>
    %993 = vector.broadcast %992 : vector<8x1xf32> to vector<8x4xf32>
    %994 = arith.subf %990, %993 : vector<8x4xf32>
    %995 = math.exp %994 : vector<8x4xf32>
    %cst_363 = arith.constant dense<0.000000e+00> : vector<8xf32>
    %996 = vector.multi_reduction <add>, %995, %cst_363 [1] : vector<8x4xf32> to vector<8xf32>
    %997 = vector.shape_cast %996 : vector<8xf32> to vector<8x1xf32>
    %998 = tpu.reciprocal %997 {approx = true} : vector<8x1xf32> -> vector<8x1xf32>
    %999 = vector.broadcast %998 : vector<8x1xf32> to vector<8x4xf32>
    %1000 = arith.mulf %995, %999 : vector<8x4xf32>
    %cst_364 = arith.constant dense<0.000000e+00> : vector<8x4xf32>
    %1001 = tpu.matmul %1000, %988, %cst_364 {dimension_numbers = #tpu.dot_dimension_numbers<[1], [0], [0], [1], [0, 0, 1, 1], [], []>} : vector<8x4xf32>, vector<4x4xf32>, vector<8x4xf32> -> vector<8x4xf32>
    %1002 = vector.extract_strided_slice %978 {offsets = [0, 4], sizes = [8, 4], strides = [1, 1]} : vector<8x8xf32> to vector<8x4xf32>
    %1003 = vector.extract_strided_slice %984 {offsets = [0, 4], sizes = [4, 4], strides = [1, 1]} : vector<4x8xf32> to vector<4x4xf32>
    %1004 = vector.extract_strided_slice %985 {offsets = [0, 4], sizes = [4, 4], strides = [1, 1]} : vector<4x8xf32> to vector<4x4xf32>
    %cst_365 = arith.constant dense<0.000000e+00> : vector<8x4xf32>
    %1005 = tpu.matmul %1002, %1003, %cst_365 {dimension_numbers = #tpu.dot_dimension_numbers<[1], [1], [0], [0], [0, 0, 1, 0], [], []>} : vector<8x4xf32>, vector<4x4xf32>, vector<8x4xf32> -> vector<8x4xf32>
    %1006 = arith.addf %1005, %4 : vector<8x4xf32>
    %cst_366 = arith.constant dense<0xFF800000> : vector<8xf32>
    %1007 = vector.multi_reduction <maximumf>, %1006, %cst_366 [1] : vector<8x4xf32> to vector<8xf32>
    %1008 = vector.shape_cast %1007 : vector<8xf32> to vector<8x1xf32>
    %1009 = vector.broadcast %1008 : vector<8x1xf32> to vector<8x4xf32>
    %1010 = arith.subf %1006, %1009 : vector<8x4xf32>
    %1011 = math.exp %1010 : vector<8x4xf32>
    %cst_367 = arith.constant dense<0.000000e+00> : vector<8xf32>
    %1012 = vector.multi_reduction <add>, %1011, %cst_367 [1] : vector<8x4xf32> to vector<8xf32>
    %1013 = vector.shape_cast %1012 : vector<8xf32> to vector<8x1xf32>
    %1014 = tpu.reciprocal %1013 {approx = true} : vector<8x1xf32> -> vector<8x1xf32>
    %1015 = vector.broadcast %1014 : vector<8x1xf32> to vector<8x4xf32>
    %1016 = arith.mulf %1011, %1015 : vector<8x4xf32>
    %cst_368 = arith.constant dense<0.000000e+00> : vector<8x4xf32>
    %1017 = tpu.matmul %1016, %1004, %cst_368 {dimension_numbers = #tpu.dot_dimension_numbers<[1], [0], [0], [1], [0, 0, 1, 1], [], []>} : vector<8x4xf32>, vector<4x4xf32>, vector<8x4xf32> -> vector<8x4xf32>
    %1018 = tpu.concatenate %1001, %1017 in 1 : vector<8x4xf32>, vector<8x4xf32> -> vector<8x8xf32>
    %c984 = arith.constant 984 : index
    %c0_369 = arith.constant 0 : index
    %1019 = vector.load %arg2[%c984, %c0_369] : memref<1176x128xf32, #tpu.memory_space<vmem>>, vector<8x8xf32>
    %cst_370 = arith.constant dense<0.000000e+00> : vector<8x8xf32>
    %1020 = tpu.matmul %1018, %1019, %cst_370 {dimension_numbers = #tpu.dot_dimension_numbers<[1], [0], [0], [1], [0, 0, 1, 1], [], []>} : vector<8x8xf32>, vector<8x8xf32>, vector<8x8xf32> -> vector<8x8xf32>
    %c992 = arith.constant 992 : index
    %c0_371 = arith.constant 0 : index
    %1021 = vector.load %arg2[%c992, %c0_371] : memref<1176x128xf32, #tpu.memory_space<vmem>>, vector<1x8xf32>
    %1022 = vector.broadcast %1021 : vector<1x8xf32> to vector<8x8xf32>
    %1023 = arith.addf %1020, %1022 : vector<8x8xf32>
    %1024 = arith.addf %973, %1023 : vector<8x8xf32>
    %cst_372 = arith.constant dense<0.000000e+00> : vector<8xf32>
    %1025 = vector.multi_reduction <add>, %1024, %cst_372 [1] : vector<8x8xf32> to vector<8xf32>
    %1026 = vector.shape_cast %1025 : vector<8xf32> to vector<8x1xf32>
    %cst_373 = arith.constant 8.000000e+00 : f32
    %1027 = vector.broadcast %cst_373 : f32 to vector<8x1xf32>
    %1028 = arith.divf %1026, %1027 : vector<8x1xf32>
    %1029 = vector.broadcast %1028 : vector<8x1xf32> to vector<8x8xf32>
    %1030 = arith.subf %1024, %1029 : vector<8x8xf32>
    %1031 = arith.mulf %1030, %1030 : vector<8x8xf32>
    %cst_374 = arith.constant dense<0.000000e+00> : vector<8xf32>
    %1032 = vector.multi_reduction <add>, %1031, %cst_374 [1] : vector<8x8xf32> to vector<8xf32>
    %1033 = vector.shape_cast %1032 : vector<8xf32> to vector<8x1xf32>
    %cst_375 = arith.constant 8.000000e+00 : f32
    %1034 = vector.broadcast %cst_375 : f32 to vector<8x1xf32>
    %1035 = arith.divf %1033, %1034 : vector<8x1xf32>
    %cst_376 = arith.constant 9.99999974E-6 : f32
    %1036 = vector.broadcast %cst_376 : f32 to vector<8x1xf32>
    %1037 = arith.addf %1035, %1036 : vector<8x1xf32>
    %1038 = math.rsqrt %1037 : vector<8x1xf32>
    %1039 = vector.broadcast %1038 : vector<8x1xf32> to vector<8x8xf32>
    %1040 = arith.mulf %1030, %1039 : vector<8x8xf32>
    %c1000 = arith.constant 1000 : index
    %c0_377 = arith.constant 0 : index
    %1041 = vector.load %arg2[%c1000, %c0_377] : memref<1176x128xf32, #tpu.memory_space<vmem>>, vector<1x8xf32>
    %1042 = vector.broadcast %1041 : vector<1x8xf32> to vector<8x8xf32>
    %1043 = arith.mulf %1040, %1042 : vector<8x8xf32>
    %c1008 = arith.constant 1008 : index
    %c0_378 = arith.constant 0 : index
    %1044 = vector.load %arg2[%c1008, %c0_378] : memref<1176x128xf32, #tpu.memory_space<vmem>>, vector<1x8xf32>
    %1045 = vector.broadcast %1044 : vector<1x8xf32> to vector<8x8xf32>
    %1046 = arith.addf %1043, %1045 : vector<8x8xf32>
    %c1016 = arith.constant 1016 : index
    %c0_379 = arith.constant 0 : index
    %1047 = vector.load %arg2[%c1016, %c0_379] : memref<1176x128xf32, #tpu.memory_space<vmem>>, vector<8x8xf32>
    %cst_380 = arith.constant dense<0.000000e+00> : vector<8x8xf32>
    %1048 = tpu.matmul %1046, %1047, %cst_380 {dimension_numbers = #tpu.dot_dimension_numbers<[1], [0], [0], [1], [0, 0, 1, 1], [], []>} : vector<8x8xf32>, vector<8x8xf32>, vector<8x8xf32> -> vector<8x8xf32>
    %c1024 = arith.constant 1024 : index
    %c0_381 = arith.constant 0 : index
    %1049 = vector.load %arg2[%c1024, %c0_381] : memref<1176x128xf32, #tpu.memory_space<vmem>>, vector<1x8xf32>
    %1050 = vector.broadcast %1049 : vector<1x8xf32> to vector<8x8xf32>
    %1051 = arith.addf %1048, %1050 : vector<8x8xf32>
    %cst_382 = arith.constant 0.000000e+00 : f32
    %1052 = vector.broadcast %cst_382 : f32 to vector<8x8xf32>
    %1053 = arith.cmpf ogt, %1051, %1052 : vector<8x8xf32>
    %cst_383 = arith.constant 0.00999999977 : f32
    %1054 = vector.broadcast %cst_383 : f32 to vector<8x8xf32>
    %1055 = arith.mulf %1054, %1051 : vector<8x8xf32>
    %1056 = arith.select %1053, %1051, %1055 : vector<8x8xi1>, vector<8x8xf32>
    %c1032 = arith.constant 1032 : index
    %c0_384 = arith.constant 0 : index
    %1057 = vector.load %arg2[%c1032, %c0_384] : memref<1176x128xf32, #tpu.memory_space<vmem>>, vector<8x8xf32>
    %cst_385 = arith.constant dense<0.000000e+00> : vector<8x8xf32>
    %1058 = tpu.matmul %1056, %1057, %cst_385 {dimension_numbers = #tpu.dot_dimension_numbers<[1], [0], [0], [1], [0, 0, 1, 1], [], []>} : vector<8x8xf32>, vector<8x8xf32>, vector<8x8xf32> -> vector<8x8xf32>
    %c1040 = arith.constant 1040 : index
    %c0_386 = arith.constant 0 : index
    %1059 = vector.load %arg2[%c1040, %c0_386] : memref<1176x128xf32, #tpu.memory_space<vmem>>, vector<1x8xf32>
    %1060 = vector.broadcast %1059 : vector<1x8xf32> to vector<8x8xf32>
    %1061 = arith.addf %1058, %1060 : vector<8x8xf32>
    %1062 = arith.addf %1046, %1061 : vector<8x8xf32>
    %cst_387 = arith.constant dense<0.000000e+00> : vector<8xf32>
    %1063 = vector.multi_reduction <add>, %1062, %cst_387 [1] : vector<8x8xf32> to vector<8xf32>
    %1064 = vector.shape_cast %1063 : vector<8xf32> to vector<8x1xf32>
    %cst_388 = arith.constant 8.000000e+00 : f32
    %1065 = vector.broadcast %cst_388 : f32 to vector<8x1xf32>
    %1066 = arith.divf %1064, %1065 : vector<8x1xf32>
    %1067 = vector.broadcast %1066 : vector<8x1xf32> to vector<8x8xf32>
    %1068 = arith.subf %1062, %1067 : vector<8x8xf32>
    %1069 = arith.mulf %1068, %1068 : vector<8x8xf32>
    %cst_389 = arith.constant dense<0.000000e+00> : vector<8xf32>
    %1070 = vector.multi_reduction <add>, %1069, %cst_389 [1] : vector<8x8xf32> to vector<8xf32>
    %1071 = vector.shape_cast %1070 : vector<8xf32> to vector<8x1xf32>
    %cst_390 = arith.constant 8.000000e+00 : f32
    %1072 = vector.broadcast %cst_390 : f32 to vector<8x1xf32>
    %1073 = arith.divf %1071, %1072 : vector<8x1xf32>
    %cst_391 = arith.constant 9.99999974E-6 : f32
    %1074 = vector.broadcast %cst_391 : f32 to vector<8x1xf32>
    %1075 = arith.addf %1073, %1074 : vector<8x1xf32>
    %1076 = math.rsqrt %1075 : vector<8x1xf32>
    %1077 = vector.broadcast %1076 : vector<8x1xf32> to vector<8x8xf32>
    %1078 = arith.mulf %1068, %1077 : vector<8x8xf32>
    %c1048 = arith.constant 1048 : index
    %c0_392 = arith.constant 0 : index
    %1079 = vector.load %arg2[%c1048, %c0_392] : memref<1176x128xf32, #tpu.memory_space<vmem>>, vector<1x8xf32>
    %1080 = vector.broadcast %1079 : vector<1x8xf32> to vector<8x8xf32>
    %1081 = arith.mulf %1078, %1080 : vector<8x8xf32>
    %c1056 = arith.constant 1056 : index
    %c0_393 = arith.constant 0 : index
    %1082 = vector.load %arg2[%c1056, %c0_393] : memref<1176x128xf32, #tpu.memory_space<vmem>>, vector<1x8xf32>
    %1083 = vector.broadcast %1082 : vector<1x8xf32> to vector<8x8xf32>
    %1084 = arith.addf %1081, %1083 : vector<8x8xf32>
    %c1064 = arith.constant 1064 : index
    %c0_394 = arith.constant 0 : index
    %1085 = vector.load %arg2[%c1064, %c0_394] : memref<1176x128xf32, #tpu.memory_space<vmem>>, vector<8x8xf32>
    %1086 = arith.mulf %1084, %1085 : vector<8x8xf32>
    %cst_395 = arith.constant dense<0.000000e+00> : vector<8xf32>
    %1087 = vector.multi_reduction <add>, %1086, %cst_395 [1] : vector<8x8xf32> to vector<8xf32>
    %1088 = vector.shape_cast %1087 : vector<8xf32> to vector<8x1xf32>
    %c1072 = arith.constant 1072 : index
    %c0_396 = arith.constant 0 : index
    %1089 = vector.load %arg2[%c1072, %c0_396] : memref<1176x128xf32, #tpu.memory_space<vmem>>, vector<2x8xf32>
    %cst_397 = arith.constant dense<0.000000e+00> : vector<2x1xf32>
    %1090 = tpu.matmul %1089, %1088, %cst_397 {dimension_numbers = #tpu.dot_dimension_numbers<[1], [0], [0], [1], [0, 0, 1, 1], [], []>} : vector<2x8xf32>, vector<8x1xf32>, vector<2x1xf32> -> vector<2x1xf32>
    %c1080 = arith.constant 1080 : index
    %c0_398 = arith.constant 0 : index
    %1091 = vector.load %arg2[%c1080, %c0_398] : memref<1176x128xf32, #tpu.memory_space<vmem>>, vector<1x1xf32>
    %1092 = vector.broadcast %1091 : vector<1x1xf32> to vector<2x1xf32>
    %1093 = arith.addf %1090, %1092 : vector<2x1xf32>
    %c0_399 = arith.constant 0 : index
    %c0_400 = arith.constant 0 : index
    %1094 = vector.load %arg5[%c0_399, %c0_400] : memref<2x1xf32, #tpu.memory_space<vmem>>, vector<2x1xf32>
    tpu.vector_store %arg5[%c0_399, %c0_400], %1093 {strides = array<i32>} : memref<2x1xf32, #tpu.memory_space<vmem>>, vector<2x1xf32>,
    return
  }
}

</mosaic_0001>

<bundles_post_ra>
// kernel: critic_forward.1
= control target key start
LH: loop header
LB: loop body
LE: loop exit
PB: predicated region body
PF: predicated region fallthrough
CT: control target
= control target key end

     0   :  { %10 = vsyncpa [#allocation4], 0  ;;  %s10832_s0 = inlined_call_operand.vmem [shape: f32[32,1], index: 0, kind: input, shape index: {}]   ;;  %s10833_s1 = inlined_call_operand.vmem [shape: s32[4], index: 1, kind: input, shape index: {}]   ;;  %s10834_s2 = inlined_call_operand.hbm [shape: f32[1176,128], index: 2, kind: input, shape index: {}]   ;;  %s10835_s3 = inlined_call_operand.hbm [shape: f32[72,512], index: 3, kind: input, shape index: {}]   ;;  %s10836_s4 = inlined_call_operand.vmem [shape: f32[44,1,8], index: 4, kind: input, shape index: {}]   ;;  %s10837_s5 = inlined_call_operand.vmem [shape: f32[2,1], index: 5, kind: output, shape index: {}]  }
   0x1   :  { %11 = vsyncpa [#allocation3], 0  ;;  %s21_s20 = sshll.u32 %s10833_s1, 4  ;;  %s22_s20 = int_to_ptr.vmem [resolvable:$true] %s21_s20 }
   0x2   :  { %12 = vsyncpa [#allocation7], 0  ;;  %s9853_s21 = scalar_lea.vmem %s22_s20, 16  ;;  %p9858_p1 = scmp.lt.s32.totalorder %s22_s20, %s22_s20 }
   0x3   :  { %p9854_p0 = scmp.ne.s32.totalorder %s22_s20, %s9853_s21  ;;  %p9859_p2 = scmp.lt.s32.totalorder %s9853_s21, %s9853_s21 }
   0x5   :  { %p9860_p3 = por %p9859_p2, %p9858_p1 }
   0x7   :  { %p9861_p4 = pnand %p9860_p3, %p9854_p0 }
   0x9   :  { %9864 = shalt.err (!%p9861_p4)
}
   0xa   :  { %s9915_s22 = smov [#allocation2]   ;;  %s9916_s23 = smov [#allocation5]  }
   0xb   :  { %24 = dma.vmem_to_smem %s22_s20, 16, %s9915_s22, [#allocation4]  }
   0xc   :  { %s30_s24 = sshll.u32 %s9916_s23, 4  ;;  %s9865_s27 = scalar_lea.hbm %s10834_s2, 18816  ;;  %s31_s24 = int_to_ptr.vmem [resolvable:$true] %s30_s24 }
   0xd   :  { %p9866_p5 = scmp.ne.s32.totalorder %s10834_s2, %s9865_s27  ;;  %p9869_p6 = scmp.lt.u32.totalorder %s9865_s27, %s10834_s2 }
   0xf   :  { %p9871_p7 = pnand %p9869_p6, %p9866_p5 }
  0x11   :  { %9874 = shalt.err (!%p9871_p7)
}
  0x12   :  { %s9875_s6 = scalar_lea.vmem %s31_s24, 18816  ;;  %p9880_p9 = scmp.lt.s32.totalorder %s31_s24, %s31_s24 }
  0x13   :  { %p9876_p8 = scmp.ne.s32.totalorder %s31_s24, %s9875_s6  ;;  %p9881_p10 = scmp.lt.s32.totalorder %s9875_s6, %s9875_s6 }
  0x15   :  { %p9882_p11 = por %p9881_p10, %p9880_p9 }
  0x17   :  { %p9883_p12 = pnand %p9882_p11, %p9876_p8 }
  0x19   :  { %9886 = shalt.err (!%p9883_p12)
}
  0x1a   :  { %s9917_s7 = smov 128   ;;  %s9918_s8 = smov 8  }
  0x1b   :  { %36 = dma.hbm_to_vmem [thread:$0]  %s10834_s2, 18816, %s31_s24, [#allocation3], %s9917_s7, %s9917_s7, %s9918_s8  }
  0x1c   :  { %s9919_s11 = smov [#allocation6]   ;;  %s9887_s15 = scalar_lea.hbm %s10835_s3, 4608 }
  0x1d   :  { %s42_s12 = sshll.u32 %s9919_s11, 4  ;;  %p9888_p13 = scmp.ne.s32.totalorder %s10835_s3, %s9887_s15  ;;  %s43_s12 = int_to_ptr.vmem [resolvable:$true] %s42_s12 }
  0x1e   :  { %p9891_p0 = scmp.lt.u32.totalorder %s9887_s15, %s10835_s3 }
  0x20   :  { %p9893_p1 = pnand %p9891_p0, %p9888_p13 }
  0x22   :  { %9896 = shalt.err (!%p9893_p1)
}
  0x23   :  { %s9897_s20 = scalar_lea.vmem %s43_s12, 4608  ;;  %p9902_p3 = scmp.lt.s32.totalorder %s43_s12, %s43_s12 }
  0x24   :  { %p9898_p2 = scmp.ne.s32.totalorder %s43_s12, %s9897_s20  ;;  %p9903_p4 = scmp.lt.s32.totalorder %s9897_s20, %s9897_s20 }
  0x26   :  { %p9904_p5 = por %p9903_p4, %p9902_p3 }
  0x28   :  { %p9905_p6 = pnand %p9904_p5, %p9898_p2 }
  0x2a   :  { %9908 = shalt.err (!%p9905_p6)
}
  0x2b   :  { %s9920_s2 = smov 512   ;;  %s9921_s21 = smov 32  }
  0x2c   :  { %48 = dma.hbm_to_vmem [thread:$0]  %s10835_s3, 4608, %s43_s12, [#allocation7], %s9920_s2, %s9920_s2, %s9921_s21  }
  0x2d   :  { %9909 = dma.done.wait [#allocation4], 16  }
  0x2e   :  { %9910 = vsyncadd [#allocation4], 4294967280 }
  0x2f   :  { %9911 = dma.done.wait [#allocation3], 18816  }
  0x30   :  { %9912 = vsyncadd [#allocation3], 4294948480 }
  0x31   :  { %9913 = dma.done.wait [#allocation7], 4608  }
  0x32   :  { %9914 = vsyncadd [#allocation7], 4294962688 }
  0x33   :  { %60 = sfence }
  0x34   :  { %v172_v0 = vld [vmem:[#allocation5 + $0x8] sm:$0xff]  ;;  %s134_s24 = sld [smem:[#allocation2]]  ;;  %v9922_v1 = vmov 0.0   ;;  %vm9923_vm0 = vmmov 0   ;;  %s8557_s25 = sld [smem:[#allocation2 + $0x1]]  ;;  %vm164_vm1 = vcmask 1040384  }
  0x35   :  { %9043 = vmatprep.subr.mxu0 %v9922_v1  ;;  %9045 = vmatprep.mubr.msk.f32.mxu0 %vm9923_vm0, %v9922_v1  ;;  %s8558_s26 = sld [smem:[#allocation2 + $0x2]]  ;;  %s8559_s3 = sld [smem:[#allocation2 + $0x3]]  ;;  %vm166_vm2 = vcmask 1041408   ;;  %vm168_vm3 = vcmask 1042432   ;;  %v170_v7 = vld [vmem:[#allocation5] sm:$0xf] }
  0x36   :  { %9044 = vmatpush3.msra.mxu0 %v172_v0  ;;  %9048 = vmatprep.subr.mxu1 %v9922_v1  ;;  %vm178_vm4 = vcmask 64512   ;;  %v8563_v11 = vld [vmem:[#allocation5 + $0x10] ss:$0 sm:$0xff]  ;;  %s9925_s13 = smov 120   ;;  %s9926_s14 = smov 116   ;;  %vm255_vm5 = vcmask 31744  }
  0x37   :  { %9050 = vmatprep.mubr.msk.f32.mxu1 %vm9923_vm0, %v9922_v1  ;;  %9053 = vmatprep.subr.mxu0 %v9922_v1  ;;  %v10042_v18 = vld [vmem:[#allocation5 + $0x440] sm:$0xf]  ;;  %vm330_vm6 = vcmask 27648   ;;  %s9927_s15 = smov 108   ;;  %s9928_s16 = smov 112   ;;  %vm347_vm7 = vcmask 1043456   ;;  %vm10185_vm15 = vmpackc.low %vm255_vm5, %vm255_vm5 }
  0x38   :  { %v591_v45 = vld [vmem:[#allocation5 + $0x18] sm:$0xff]  ;;  %s9929_s17 = smov 4   ;;  %v8573_v52 = vld [vmem:[#allocation5 + $0x20] ss:$0 sm:$0xff]  ;;  %vm671_vm8 = vcmask 60416  }
  0x39   :  { %v698_v63 = vld [vmem:[#allocation5 + $0x38] sm:$0xff] }
  0x3a   :  { %s9999_s1 = scalar_lea.vmem %s10836_s4, %s134_s24  ;;  %s10005_s6 = scalar_lea.vmem %s10836_s4, %s8557_s25 }
  0x3b   :  { %v136_v2 = vld [vmem:[%s9999_s1] sm:$0x1]  ;;  %s10010_s9 = scalar_lea.vmem %s10836_s4, %s8558_s26  ;;  %s10017_s12 = scalar_lea.vmem %s10836_s4, %s8559_s3 }
  0x3c   :  { %v8560_v3 = vld [vmem:[%s10005_s6] ss:$0 sm:$0xff]  ;;  %s9924_s4 = smov 124  }
  0x3d   :  { %v8561_v4 = vld [vmem:[%s10010_s9] ss:$0 sm:$0xff]  ;;  %v165_v6 = vsel %vm164_vm1, %v136_v2, %v8560_v3 }
  0x3e   :  { %v8562_v5 = vld [vmem:[%s10017_s12] ss:$0 sm:$0xff]  ;;  %v167_v8 = vsel %vm166_vm2, %v165_v6, %v8561_v4 }
  0x3f   :  { %v169_v9 = vsel %vm168_vm3, %v167_v8, %v8562_v5  ;;  %v8575_v5 = vld [vmem:[#allocation5 + $0x28] ss:$0 sm:$0xff] }
  0x40   :  { %v10023_v10 = vadd.f32 %v170_v7, %v169_v9  ;;  %v8576_v7 = vld [vmem:[#allocation5 + $0x30] ss:$0 sm:$0xff] }
  0x42   :  { %9046 = vmatmul.mubr.msk.f32.vlgmr.msra.gmra.mrb[0].mxu0 %vm178_vm4, %v10023_v10 }
  0x43   :  { %9055 = vmatprep.mubr.msk.f32.mxu0 %vm9923_vm0, %v9922_v1 }
 0x115   :  { %v248_v12 = vpop.f32.mrb[0].mxu0 }
 0x116   :  { %v249_v13 = vadd.f32 %v8563_v11, %v248_v12  ;;  %v9047_v14 = vpop.f32.mrb[1].mxu0  ;;  %v8577_v11 = vld [vmem:[#allocation5 + $0x40] ss:$0 sm:$0xff] }
 0x118   :  { %420 = vrot.lane.b32.xlu1 %v249_v13, %s9924_s4  ;;  %253 = vrot.lane.b32.xlu0 %v249_v13, %s9925_s13 }
 0x11c   :  { %422 = vrot.lane.b32.xlu0 %v249_v13, %s9926_s14 }
 0x18a   :  { %v254_v15 = vpop.permute.xlu0 %253  ;;  %v421_v17 = vpop.permute.xlu1 %420 }
 0x18b   :  { %9049 = vmatpush3.xpose.msk.msra.mxu1 %vm255_vm5, %v254_v15 }
 0x18c   :  { %9058 = vmatprep.subr.mxu1 %v9922_v1 }
 0x18e   :  { %9051 = vmatmul.mubr.msk.f32.vlgmr.msra.gmra.mrb[0].mxu1 %vm255_vm5, %v249_v13  ;;  %v423_v16 = vpop.permute.xlu0 %422 }
 0x18f   :  { %9059 = vmatpush3.xpose.msk.msra.mxu1 %vm255_vm5, %v423_v16  ;;  %9060 = vmatprep.mubr.msk.f32.mxu1 %vm9923_vm0, %v9922_v1 }
 0x190   :  { %9068 = vmatprep.subr.mxu1 %v9922_v1 }
 0x192   :  { %9061 = vmatmul.mubr.msk.f32.vlgmr.msra.gmra.mrb[2].mxu1 %vm255_vm5, %v421_v17  ;;  %v8579_v17 = vld [vmem:[#allocation5 + $0x50] ss:$0 sm:$0xff] }
 0x193   :  { %9070 = vmatprep.mubr.msk.f32.mxu1 %vm9923_vm0, %v9922_v1  ;;  %9069 = vmatpush3.msra.mxu1 %v591_v45 }
 0x194   :  { %9078 = vmatprep.subr.mxu1 %v9922_v1 }
 0x261   :  { %v326_v19 = vpop.f32.mrb[0].mxu1 }
 0x262   :  { %v327_v20 = vadd.f32 %v326_v19, %v10042_v18  ;;  %v9052_v21 = vpop.f32.mrb[1].mxu1 }
 0x264   :  { %v331_v22 = vsel %vm330_vm6, %v327_v20, -inf }
 0x265   :  { %v494_v23 = vpop.f32.mrb[2].mxu1  ;;  %332 = vmax.xlane.f32.xlu1 %v331_v22 }
 0x266   :  { %v495_v24 = vadd.f32 %v494_v23, %v10042_v18  ;;  %v9062_v25 = vpop.f32.mrb[3].mxu1 }
 0x268   :  { %v498_v26 = vsel %vm330_vm6, %v495_v24, -inf }
 0x269   :  { %499 = vmax.xlane.f32.xlu0 %v498_v26 }
 0x2f2   :  { %v333_v27 = vpop.xlane.xlu1 %332 }
 0x2f3   :  { %v334_v28 = vsub.f32 %v327_v20, %v333_v27 }
 0x2f5   :  { %v335_v29 = vmul.f32 1.442695, %v334_v28 }
 0x2f6   :  { %v500_v30 = vpop.xlane.xlu0 %499 }
 0x2f7   :  { %9672 = vpow2.f32 %v335_v29  ;;  %v501_v31 = vsub.f32 %v495_v24, %v500_v30  ;;  %v885_v29 = vld [vmem:[#allocation5 + $0x68] sm:$0xff] }
 0x2f9   :  { %v502_v32 = vmul.f32 1.442695, %v501_v31 }
 0x2fb   :  { %9674 = vpow2.f32 %v502_v32 }
 0x301   :  { %v9673_v33 = vpop.eup %9672 }
 0x302   :  { %v337_v34 = vsel %vm330_vm6, %v9673_v33, 0.0 }
 0x303   :  { %338 = vadd.xlane.f32.xlu0 %v337_v34  ;;  %v8581_v34 = vld [vmem:[#allocation5 + $0x58] ss:$0 sm:$0xff] }
 0x305   :  { %v9675_v35 = vpop.eup %9674 }
 0x306   :  { %v504_v36 = vsel %vm330_vm6, %v9675_v35, 0.0 }
 0x307   :  { %505 = vadd.xlane.f32.xlu1 %v504_v36  ;;  %v8582_v36 = vld [vmem:[#allocation5 + $0x60] ss:$0 sm:$0xff] }
 0x318   :  { %509 = vrot.lane.b32.xlu1 %v249_v13, %s9927_s15 }
 0x319   :  { %342 = vrot.lane.b32.xlu0 %v249_v13, %s9928_s16 }
 0x390   :  { %v339_v37 = vpop.xlane.xlu0 %338 }
 0x391   :  { %9676 = vrcp.f32 %v339_v37 }
 0x394   :  { %v343_v38 = vpop.permute.xlu0 %342  ;;  %v506_v39 = vpop.xlane.xlu1 %505 }
 0x395   :  { %9678 = vrcp.f32 %v506_v39  ;;  %9054 = vmatpush3.msk.msra.mxu0 %vm347_vm7, %v343_v38  ;;  %v8583_v39 = vld [vmem:[#allocation5 + $0x70] ss:$0 sm:$0xff] }
 0x396   :  { %9063 = vmatprep.subr.mxu0 %v9922_v1 }
 0x398   :  { %v510_v42 = vpop.permute.xlu1 %509 }
 0x39b   :  { %v9677_v40 = vpop.eup %9676 }
 0x39c   :  { %v341_v41 = vmul.f32 %v9677_v40, %v9673_v33 }
 0x39e   :  { %9056 = vmatmul.mubr.msk.f32.vlgmr.msra.gmra.mrb[2].mxu0 %vm255_vm5, %v341_v41 }
 0x39f   :  { %v9679_v43 = vpop.eup %9678  ;;  %9064 = vmatpush3.msk.msra.mxu0 %vm347_vm7, %v510_v42  ;;  %9065 = vmatprep.mubr.msk.f32.mxu0 %vm9923_vm0, %v9922_v1 }
 0x3a0   :  { %v508_v44 = vmul.f32 %v9679_v43, %v9675_v35  ;;  %9073 = vmatprep.subr.mxu0 %v9922_v1 }
 0x3a2   :  { %9066 = vmatmul.mubr.msk.f32.vlgmr.msra.gmra.mrb[4].mxu0 %vm255_vm5, %v508_v44 }
 0x3a3   :  { %9075 = vmatprep.mubr.msk.f32.mxu0 %vm9923_vm0, %v9922_v1  ;;  %9074 = vmatpush3.msra.mxu0 %v698_v63 }
 0x3a4   :  { %9083 = vmatprep.subr.mxu0 %v9922_v1 }
 0x471   :  { %v416_v46 = vpop.f32.mrb[2].mxu0 }
 0x472   :  { %v9057_v47 = vpop.f32.mrb[3].mxu0 }
 0x475   :  { %v582_v48 = vpop.f32.mrb[4].mxu0 }
 0x476   :  { %587 = vrot.lane.b32.xlu1 %v582_v48, %s9929_s17  ;;  %v9067_v49 = vpop.f32.mrb[5].mxu0 }
 0x4e8   :  { %v588_v50 = vpop.permute.xlu1 %587 }
 0x4e9   :  { %v590_v51 = vsel %vm255_vm5, %v416_v46, %v588_v50 }
 0x4ea   :  { %9071 = vmatmul.mubr.msk.f32.vlgmr.msra.gmra.mrb[4].mxu1 %vm178_vm4, %v590_v51 }
 0x4eb   :  { %9080 = vmatprep.mubr.msk.f32.mxu1 %vm9923_vm0, %v9922_v1 }
 0x5bd   :  { %v666_v53 = vpop.f32.mrb[4].mxu1 }
 0x5be   :  { %v667_v54 = vadd.f32 %v8573_v52, %v666_v53  ;;  %v9072_v55 = vpop.f32.mrb[5].mxu1 }
 0x5c0   :  { %v670_v56 = vadd.f32 %v667_v54, %v10023_v10  ;;  %v780_v10 = vld [vmem:[#allocation5 + $0x48] sm:$0xff] }
 0x5c1   :  { %9079 = vmatpush3.msra.mxu1 %v780_v10 }
 0x5c2   :  { %v672_v57 = vsel %vm671_vm8, %v670_v56, 0.0  ;;  %9088 = vmatprep.subr.mxu1 %v9922_v1 }
 0x5c3   :  { %673 = vadd.xlane.f32.xlu0 %v672_v57 }
 0x650   :  { %v674_v58 = vpop.xlane.xlu0 %673 }
 0x651   :  { %v676_v59 = vmul.f32 0.125, %v674_v58 }
 0x653   :  { %v677_v60 = vsub.f32 %v670_v56, %v676_v59 }
 0x655   :  { %v678_v61 = vmul.f32 %v677_v60, %v677_v60 }
 0x657   :  { %v679_v62 = vsel %vm671_vm8, %v678_v61, 0.0 }
 0x658   :  { %680 = vadd.xlane.f32.xlu1 %v679_v62 }
 0x6e5   :  { %v681_v0 = vpop.xlane.xlu1 %680 }
 0x6e6   :  { %v682_v2 = vmul.f32 0.125, %v681_v0 }
 0x6e8   :  { %v683_v3 = vadd.f32 1e-05, %v682_v2 }
 0x6ea   :  { %9680 = vrsqrt.f32 %v683_v3 }
 0x6f4   :  { %v9681_v4 = vpop.eup %9680 }
 0x6f5   :  { %v685_v6 = vmul.f32 %v9681_v4, %v677_v60 }
 0x6f7   :  { %v691_v8 = vmul.f32 %v8575_v5, %v685_v6 }
 0x6f9   :  { %v697_v9 = vadd.f32 %v8576_v7, %v691_v8  ;;  %v1300_v8 = vld [vmem:[#allocation5 + $0x78] sm:$0xff] }
 0x6fb   :  { %9076 = vmatmul.mubr.msk.f32.vlgmr.msra.gmra.mrb[6].mxu0 %vm178_vm4, %v697_v9 }
 0x6fc   :  { %9085 = vmatprep.mubr.msk.f32.mxu0 %vm9923_vm0, %v9922_v1  ;;  %9084 = vmatpush3.msra.mxu0 %v885_v29 }
 0x6fd   :  { %9093 = vmatprep.subr.mxu0 %v9922_v1 }
 0x7ce   :  { %v773_v12 = vpop.f32.mrb[6].mxu0 }
 0x7cf   :  { %v774_v13 = vadd.f32 %v8577_v11, %v773_v12  ;;  %v9077_v14 = vpop.f32.mrb[7].mxu0 }
 0x7d1   :  { %vm777_vm9 = vcmp.gt.f32.partialorder %v774_v13, 0.0  ;;  %v778_v15 = vmul.f32 0.01, %v774_v13 }
 0x7d3   :  { %v779_v16 = vsel %vm777_vm9, %v774_v13, %v778_v15  ;;  %v73_v15 = vld [vmem:[%s10832_s0 + $0x8] sm:$0xff]  ;;  %vm1808_vm9 = vcmask 261120  }
 0x7d4   :  { %9081 = vmatmul.mubr.msk.f32.vlgmr.msra.gmra.mrb[6].mxu1 %vm178_vm4, %v779_v16  ;;  %v9930_v16 = vmov 0  }
 0x7d5   :  { %9090 = vmatprep.mubr.msk.f32.mxu1 %vm9923_vm0, %v9922_v1  ;;  %9631 = vset.pattern.permute.xlu1 %v9930_v16 }
 0x7d6   :  { %9630 = vset.pattern.permute.xlu0 %v9930_v16 }
 0x8a7   :  { %v855_v19 = vpop.f32.mrb[6].mxu1 }
 0x8a8   :  { %v856_v20 = vadd.f32 %v8579_v17, %v855_v19  ;;  %v9082_v21 = vpop.f32.mrb[7].mxu1  ;;  %v74_v17 = vld [vmem:[%s10832_s0 + $0x10] sm:$0xff]  ;;  %v8593_v19 = vld [vmem:[#allocation5 + $0x80] ss:$0 sm:$0xff] }
 0x8aa   :  { %v859_v22 = vadd.f32 %v856_v20, %v697_v9 }
 0x8ac   :  { %v860_v23 = vsel %vm671_vm8, %v859_v22, 0.0 }
 0x8ad   :  { %861 = vadd.xlane.f32.xlu0 %v860_v23 }
 0x93a   :  { %v862_v24 = vpop.xlane.xlu0 %861 }
 0x93b   :  { %v863_v25 = vmul.f32 0.125, %v862_v24 }
 0x93d   :  { %v864_v26 = vsub.f32 %v859_v22, %v863_v25  ;;  %v72_v25 = vld [vmem:[%s10832_s0] sm:$0xff] }
 0x93f   :  { %v865_v27 = vmul.f32 %v864_v26, %v864_v26 }
 0x941   :  { %v866_v28 = vsel %vm671_vm8, %v865_v27, 0.0 }
 0x942   :  { %867 = vadd.xlane.f32.xlu0 %v866_v28 }
 0x9cf   :  { %v868_v30 = vpop.xlane.xlu0 %867 }
 0x9d0   :  { %v869_v31 = vmul.f32 0.125, %v868_v30 }
 0x9d2   :  { %v870_v32 = vadd.f32 1e-05, %v869_v31  ;;  %v75_v31 = vld [vmem:[%s10832_s0 + $0x18] sm:$0xff] }
 0x9d4   :  { %9682 = vrsqrt.f32 %v870_v32  ;;  %v1405_v32 = vld [vmem:[#allocation5 + $0x98] sm:$0xff] }
 0x9de   :  { %v9683_v33 = vpop.eup %9682 }
 0x9df   :  { %v872_v35 = vmul.f32 %v9683_v33, %v864_v26  ;;  %v1592_v33 = vld [vmem:[#allocation5 + $0xf8] sm:$0xff] }
 0x9e1   :  { %v878_v37 = vmul.f32 %v8581_v34, %v872_v35 }
 0x9e3   :  { %v10082_v38 = vadd.f32 %v8582_v36, %v878_v37 }
 0x9e5   :  { %9086 = vmatmul.mubr.msk.f32.vlgmr.msra.gmra.mrb[8].mxu0 %vm178_vm4, %v10082_v38 }
 0x9e6   :  { %9095 = vmatprep.mubr.msk.f32.mxu0 %vm9923_vm0, %v9922_v1 }
 0xab8   :  { %v960_v40 = vpop.f32.mrb[8].mxu0 }
 0xab9   :  { %v961_v41 = vadd.f32 %v8583_v39, %v960_v40  ;;  %v9087_v42 = vpop.f32.mrb[9].mxu0  ;;  %v8555_v39 = vld [vmem:[#allocation5 + $0xc8] ss:$0 sm:$0xff] }
 0xaba   :  { %v8556_v42 = vld [vmem:[#allocation5 + $0xd0] ss:$0 sm:$0xff] }
 0xabb   :  { %1131 = vrot.lane.b32.xlu0 %v961_v41, %s9926_s14  ;;  %965 = vrot.lane.b32.xlu1 %v961_v41, %s9925_s13 }
 0xabf   :  { %1129 = vrot.lane.b32.xlu1 %v961_v41, %s9924_s4 }
 0xb2d   :  { %v966_v43 = vpop.permute.xlu1 %965  ;;  %v1132_v44 = vpop.permute.xlu0 %1131 }
 0xb2e   :  { %9089 = vmatpush3.xpose.msk.msra.mxu1 %vm255_vm5, %v966_v43 }
 0xb2f   :  { %9098 = vmatprep.subr.mxu1 %v9922_v1 }
 0xb31   :  { %9091 = vmatmul.mubr.msk.f32.vlgmr.msra.gmra.mrb[8].mxu1 %vm255_vm5, %v961_v41  ;;  %v1130_v45 = vpop.permute.xlu1 %1129 }
 0xb32   :  { %9099 = vmatpush3.xpose.msk.msra.mxu1 %vm255_vm5, %v1132_v44  ;;  %9100 = vmatprep.mubr.msk.f32.mxu1 %vm9923_vm0, %v9922_v1 }
 0xb33   :  { %9108 = vmatprep.subr.mxu1 %v9922_v1 }
 0xb35   :  { %9101 = vmatmul.mubr.msk.f32.vlgmr.msra.gmra.mrb[10].mxu1 %vm255_vm5, %v1130_v45 }
 0xb36   :  { %9110 = vmatprep.mubr.msk.f32.mxu1 %vm9923_vm0, %v9922_v1  ;;  %9109 = vmatpush3.msra.mxu1 %v1300_v8 }
 0xb37   :  { %9118 = vmatprep.subr.mxu1 %v9922_v1 }
 0xc04   :  { %v1037_v46 = vpop.f32.mrb[8].mxu1 }
 0xc05   :  { %v1038_v47 = vadd.f32 %v1037_v46, %v10042_v18  ;;  %v9092_v48 = vpop.f32.mrb[9].mxu1 }
 0xc07   :  { %v1041_v49 = vsel %vm330_vm6, %v1038_v47, -inf }
 0xc08   :  { %1042 = vmax.xlane.f32.xlu1 %v1041_v49  ;;  %v1203_v50 = vpop.f32.mrb[10].mxu1 }
 0xc09   :  { %v1204_v51 = vadd.f32 %v1203_v50, %v10042_v18  ;;  %v9102_v52 = vpop.f32.mrb[11].mxu1 }
 0xc0a   :  { %v8595_v52 = vld [vmem:[#allocation5 + $0x88] ss:$0 sm:$0xff] }
 0xc0b   :  { %v1207_v53 = vsel %vm330_vm6, %v1204_v51, -inf }
 0xc0c   :  { %1208 = vmax.xlane.f32.xlu0 %v1207_v53 }
 0xc95   :  { %v1043_v54 = vpop.xlane.xlu1 %1042 }
 0xc96   :  { %v1044_v55 = vsub.f32 %v1038_v47, %v1043_v54 }
 0xc98   :  { %v1045_v56 = vmul.f32 1.442695, %v1044_v55  ;;  %v126_v55 = vld [vmem:[#allocation5 + $0xd8] sm:$0xff] }
 0xc99   :  { %v1209_v57 = vpop.xlane.xlu0 %1208 }
 0xc9a   :  { %9684 = vpow2.f32 %v1045_v56  ;;  %v1210_v58 = vsub.f32 %v1204_v51, %v1209_v57 }
 0xc9c   :  { %v1211_v59 = vmul.f32 1.442695, %v1210_v58  ;;  %v8596_v58 = vld [vmem:[#allocation5 + $0x90] ss:$0 sm:$0xff] }
 0xc9e   :  { %9686 = vpow2.f32 %v1211_v59 }
 0xca4   :  { %v9685_v60 = vpop.eup %9684 }
 0xca5   :  { %v1047_v61 = vsel %vm330_vm6, %v9685_v60, 0.0 }
 0xca6   :  { %1048 = vadd.xlane.f32.xlu0 %v1047_v61 }
 0xca8   :  { %v9687_v62 = vpop.eup %9686 }
 0xca9   :  { %v1213_v63 = vsel %vm330_vm6, %v9687_v62, 0.0 }
 0xcaa   :  { %1214 = vadd.xlane.f32.xlu1 %v1213_v63  ;;  %v127_v63 = vld [vmem:[#allocation5 + $0xe0] sm:$0xff] }
 0xcbb   :  { %1218 = vrot.lane.b32.xlu1 %v961_v41, %s9927_s15 }
 0xcbc   :  { %1052 = vrot.lane.b32.xlu0 %v961_v41, %s9928_s16 }
 0xd33   :  { %v1049_v18 = vpop.xlane.xlu0 %1048 }
 0xd34   :  { %9688 = vrcp.f32 %v1049_v18 }
 0xd37   :  { %v1053_v0 = vpop.permute.xlu0 %1052  ;;  %v1215_v2 = vpop.xlane.xlu1 %1214 }
 0xd38   :  { %9690 = vrcp.f32 %v1215_v2  ;;  %9094 = vmatpush3.msk.msra.mxu0 %vm347_vm7, %v1053_v0 }
 0xd39   :  { %9103 = vmatprep.subr.mxu0 %v9922_v1 }
 0xd3b   :  { %v1219_v5 = vpop.permute.xlu1 %1218 }
 0xd3e   :  { %v9689_v3 = vpop.eup %9688 }
 0xd3f   :  { %v1051_v4 = vmul.f32 %v9689_v3, %v9685_v60  ;;  %v128_v3 = vld [vmem:[#allocation5 + $0xe8] sm:$0xff] }
 0xd41   :  { %9096 = vmatmul.mubr.msk.f32.vlgmr.msra.gmra.mrb[10].mxu0 %vm255_vm5, %v1051_v4 }
 0xd42   :  { %v9691_v6 = vpop.eup %9690  ;;  %9104 = vmatpush3.msk.msra.mxu0 %vm347_vm7, %v1219_v5  ;;  %9105 = vmatprep.mubr.msk.f32.mxu0 %vm9923_vm0, %v9922_v1 }
 0xd43   :  { %v1217_v7 = vmul.f32 %v9691_v6, %v9687_v62  ;;  %9113 = vmatprep.subr.mxu0 %v9922_v1 }
 0xd45   :  { %9106 = vmatmul.mubr.msk.f32.vlgmr.msra.gmra.mrb[12].mxu0 %vm255_vm5, %v1217_v7  ;;  %v129_v7 = vld [vmem:[#allocation5 + $0xf0] sm:$0xff] }
 0xd46   :  { %9115 = vmatprep.mubr.msk.f32.mxu0 %vm9923_vm0, %v9922_v1  ;;  %9114 = vmatpush3.msra.mxu0 %v1405_v32 }
 0xd47   :  { %9123 = vmatprep.subr.mxu0 %v1592_v33 }
 0xe14   :  { %v1125_v9 = vpop.f32.mrb[10].mxu0 }
 0xe15   :  { %v9097_v10 = vpop.f32.mrb[11].mxu0 }
 0xe16   :  { %v8597_v10 = vld [vmem:[#allocation5 + $0xa0] ss:$0 sm:$0xff] }
 0xe18   :  { %v1291_v11 = vpop.f32.mrb[12].mxu0 }
 0xe19   :  { %1296 = vrot.lane.b32.xlu1 %v1291_v11, %s9929_s17  ;;  %v9107_v12 = vpop.f32.mrb[13].mxu0 }
 0xe1d   :  { %84 = vperm.xlu1 %9631, %v73_v15  }
 0xe21   :  { %89 = vperm.xlu1 %9631, %v74_v17  }
 0xe8b   :  { %v1297_v13 = vpop.permute.xlu1 %1296 }
 0xe8c   :  { %v1299_v14 = vsel %vm255_vm5, %v1125_v9, %v1297_v13  ;;  %v1487_v9 = vld [vmem:[#allocation5 + $0xa8] sm:$0xff] }
 0xe8d   :  { %9111 = vmatmul.mubr.msk.f32.vlgmr.msra.gmra.mrb[12].mxu1 %vm178_vm4, %v1299_v14  ;;  %v8603_v14 = vld [vmem:[#allocation5 + $0x100] ss:$0 sm:$0xff] }
 0xe8e   :  { %9120 = vmatprep.mubr.msk.f32.mxu1 %vm9923_vm0, %v9922_v1  ;;  %9119 = vmatpush3.msra.mxu1 %v1487_v9 }
 0xe9c   :  { %v85_v34 = vpop.permute.xlu1 %84 }
 0xe9d   :  { %v102_v44 = vmul.f32 %v8555_v39, %v85_v34 }
 0xe9f   :  { %v111_v48 = vadd.f32 %v8556_v42, %v102_v44 }
 0xea0   :  { %v90_v35 = vpop.permute.xlu1 %89 }
 0xea1   :  { %v103_v45 = vmul.f32 %v8555_v39, %v90_v35  ;;  %v119_v56 = vmul.f32 0.01, %v111_v48  ;;  %vm115_vm11 = vcmp.gt.f32.partialorder %v111_v48, 0.0 }
 0xea3   :  { %v112_v50 = vadd.f32 %v8556_v42, %v103_v45  ;;  %v123_v18 = vsel %vm115_vm11, %v111_v48, %v119_v56  ;;  %v10211_v45 = vld [vmem:[#allocation5 + $0x460] sm:$0xff] }
 0xea4   :  { %v10148_v4 = vadd.f32 %v127_v63, %v123_v18 }
 0xea5   :  { %v120_v59 = vmul.f32 0.01, %v112_v50  ;;  %vm116_vm12 = vcmp.gt.f32.partialorder %v112_v50, 0.0 }
 0xea7   :  { %v124_v2 = vsel %vm116_vm12, %v112_v50, %v120_v59 }
 0xea8   :  { %v10150_v6 = vadd.f32 %v128_v3, %v124_v2 }
 0xf60   :  { %v1375_v20 = vpop.f32.mrb[12].mxu1 }
 0xf61   :  { %v1376_v21 = vadd.f32 %v8593_v19, %v1375_v20  ;;  %v9112_v22 = vpop.f32.mrb[13].mxu1 }
 0xf63   :  { %v1379_v23 = vadd.f32 %v1376_v21, %v10082_v38 }
 0xf65   :  { %v1380_v24 = vsel %vm671_vm8, %v1379_v23, 0.0 }
 0xf66   :  { %1381 = vadd.xlane.f32.xlu0 %v1380_v24 }
 0xf7c   :  { %79 = vperm.xlu0 %9630, %v72_v25  }
 0xff3   :  { %v1382_v26 = vpop.xlane.xlu0 %1381 }
 0xff4   :  { %v1383_v27 = vmul.f32 0.125, %v1382_v26 }
 0xff6   :  { %v1384_v28 = vsub.f32 %v1379_v23, %v1383_v27 }
 0xff8   :  { %v1385_v29 = vmul.f32 %v1384_v28, %v1384_v28 }
 0xffa   :  { %v1386_v30 = vsel %vm671_vm8, %v1385_v29, 0.0 }
 0xffb   :  { %1387 = vadd.xlane.f32.xlu1 %v1386_v30  ;;  %v80_v38 = vpop.permute.xlu0 %79 }
 0xffc   :  { %v101_v41 = vmul.f32 %v8555_v39, %v80_v38 }
 0xffe   :  { %v110_v43 = vadd.f32 %v8556_v42, %v101_v41 }
0x1000   :  { %v118_v47 = vmul.f32 0.01, %v110_v43  ;;  %vm114_vm10 = vcmp.gt.f32.partialorder %v110_v43, 0.0 }
0x1002   :  { %v122_v54 = vsel %vm114_vm10, %v110_v43, %v118_v47 }
0x1003   :  { %v10140_v61 = vadd.f32 %v126_v55, %v122_v54 }
0x100c   :  { %94 = vperm.xlu1 %9631, %v75_v31  }
0x1088   :  { %v1388_v36 = vpop.xlane.xlu1 %1387 }
0x1089   :  { %v1389_v37 = vmul.f32 0.125, %v1388_v36 }
0x108b   :  { %v1390_v40 = vadd.f32 1e-05, %v1389_v37 }
0x108c   :  { %v95_v46 = vpop.permute.xlu1 %94 }
0x108d   :  { %9692 = vrsqrt.f32 %v1390_v40  ;;  %v104_v49 = vmul.f32 %v8555_v39, %v95_v46  ;;  %v10205_v39 = vld [vmem:[#allocation5 + $0x450] sm:$0xff]  ;;  %v10207_v40 = vld [vmem:[#allocation5 + $0x448] sm:$0xff] }
0x108f   :  { %v113_v57 = vadd.f32 %v8556_v42, %v104_v49 }
0x1091   :  { %v121_v0 = vmul.f32 0.01, %v113_v57  ;;  %vm117_vm13 = vcmp.gt.f32.partialorder %v113_v57, 0.0 }
0x1093   :  { %v125_v5 = vsel %vm117_vm13, %v113_v57, %v121_v0 }
0x1094   :  { %v10156_v8 = vadd.f32 %v129_v7, %v125_v5 }
0x1097   :  { %v9693_v51 = vpop.eup %9692 }
0x1098   :  { %v1392_v53 = vmul.f32 %v9693_v51, %v1384_v28 }
0x109a   :  { %v1398_v60 = vmul.f32 %v8595_v52, %v1392_v53  ;;  %v10219_v52 = vld [vmem:[#allocation5 + $0x458] sm:$0xff] }
0x109c   :  { %v10142_v62 = vadd.f32 %v8596_v58, %v1398_v60 }
0x109e   :  { %9116 = vmatmul.mubr.msk.f32.vlgmr.msra.gmra.mrb[14].mxu0 %vm178_vm4, %v10142_v62 }
0x109f   :  { %9125 = vmatprep.mubr.msk.f32.mxu0 %vm178_vm4, %v10140_v61  ;;  %9124 = vmatpush3.msra.mxu0 %v1592_v33 }
0x10a2   :  { %9126 = vmatmul.mubr.msk.f32.vlgmr.msra.gmra.mrb[16].mxu0 %vm178_vm4, %v10148_v4 }
0x10a3   :  { %9128 = vmatprep.mubr.msk.f32.mxu0 %vm178_vm4, %v10150_v6 }
0x10a6   :  { %9129 = vmatmul.mubr.msk.f32.gmra.mrb[18].mxu0 %vm178_vm4, %v10156_v8 }
0x1171   :  { %v1480_v11 = vpop.f32.mrb[14].mxu0 }
0x1172   :  { %v1481_v12 = vadd.f32 %v8597_v10, %v1480_v11  ;;  %v9117_v13 = vpop.f32.mrb[15].mxu0 }
0x1174   :  { %vm1484_vm14 = vcmp.gt.f32.partialorder %v1481_v12, 0.0  ;;  %v1485_v15 = vmul.f32 0.01, %v1481_v12 }
0x1175   :  { %v9127_v16 = vpop.f32.mrb[16].mxu0 }
0x1176   :  { %v1486_v17 = vsel %vm1484_vm14, %v1481_v12, %v1485_v15  ;;  %v10160_v19 = vadd.f32 %v9127_v16, %v8603_v14  ;;  %v1676_v20 = vpop.f32.mrb[17].mxu0 }
0x1177   :  { %v10162_v21 = vadd.f32 %v8603_v14, %v1676_v20  ;;  %9121 = vmatmul.mubr.msk.f32.vlgmr.msra.gmra.mrb[14].mxu1 %vm178_vm4, %v1486_v17 }
0x1179   :  { %v9130_v22 = vpop.f32.mrb[18].mxu0  ;;  %9139 = vmatprep.mubr.msk.f32.mxu1 %vm255_vm5, %v10162_v21  ;;  %v10169_v23 = vpack.i.bf16 %v10160_v19, %v10162_v21 }
0x117a   :  { %v10171_v24 = vadd.f32 %v9130_v22, %v8603_v14  ;;  %v1686_v25 = vpop.f32.mrb[19].mxu0 }
0x117b   :  { %v10173_v26 = vadd.f32 %v8603_v14, %v1686_v25  ;;  %9633 = vrot.lane.b32.xlu1 %v10169_v23, %s9925_s13 }
0x117d   :  { %v10179_v27 = vpack.i.bf16 %v10171_v24, %v10173_v26 }
0x117f   :  { %9638 = vrot.lane.b32.xlu1 %v10179_v27, %s9925_s13 }
0x11ed   :  { %v9634_v28 = vpop.permute.xlu1 %9633 }
0x11ee   :  { %v9636_v29 = vunpack.i.h.bf16 %v9634_v28  ;;  %v9635_v30 = vunpack.i.l.bf16 %v9634_v28 }
0x11f0   :  { %v9526_v32 = vpack.c.bf16 %v9636_v29, %v9635_v30 }
0x11f1   :  { %v9639_v33 = vpop.permute.xlu1 %9638 }
0x11f2   :  { %v9641_v34 = vunpack.i.h.bf16 %v9639_v33  ;;  %v9640_v35 = vunpack.i.l.bf16 %v9639_v33  ;;  %9528 = vmatprep.subr.msk.bf16.mxu1 %vm10185_vm15, %v9526_v32 }
0x11f3   :  { %9531 = vmatpush3.bf16.xpose.msk.msra.mxu1 %vm10185_vm15, %v9526_v32 }
0x11f4   :  { %v9532_v36 = vpack.c.bf16 %v9641_v34, %v9640_v35 }
0x11f6   :  { %9534 = vmatprep.subr.msk.bf16.mxu1 %vm10185_vm15, %v9532_v36 }
0x11fb   :  { %9537 = vmatpush3.bf16.xpose.msk.msra.mxu1 %vm10185_vm15, %v9532_v36 }
0x1202   :  { %9140 = vmatmul.mubr.msk.f32.vlgmr.msra.gmra.mrb[16].mxu1 %vm255_vm5, %v10160_v19 }
0x1203   :  { %9142 = vmatprep.mubr.msk.f32.mxu1 %vm255_vm5, %v10173_v26 }
0x1206   :  { %9143 = vmatmul.mubr.msk.f32.gmra.mrb[18].mxu1 %vm255_vm5, %v10171_v24 }
0x124a   :  { %v10203_v37 = vpop.f32.mrb[14].mxu1 }
0x124b   :  { %v9122_v38 = vpop.f32.mrb[15].mxu1 }
0x12d5   :  { %v9141_v41 = vpop.f32.mrb[16].mxu1 }
0x12d6   :  { %v1795_v42 = vadd.f32 %v9141_v41, %v10205_v39  ;;  %v1789_v43 = vpop.f32.mrb[17].mxu1 }
0x12d7   :  { %v1790_v44 = vadd.f32 %v1789_v43, %v10207_v40 }
0x12d8   :  { %v1812_v46 = vsel %vm1808_vm9, %v1795_v42, -inf }
0x12d9   :  { %1813 = vmax.xlane.f32.xlu0 %v1812_v46  ;;  %v9144_v47 = vpop.f32.mrb[18].mxu1  ;;  %v1809_v48 = vsel %vm1808_vm9, %v1790_v44, -inf }
0x12da   :  { %v1805_v49 = vadd.f32 %v9144_v47, %v10211_v45  ;;  %v1799_v50 = vpop.f32.mrb[19].mxu1  ;;  %1810 = vmax.xlane.f32.xlu1 %v1809_v48 }
0x12db   :  { %v1800_v53 = vadd.f32 %v1799_v50, %v10219_v52 }
0x12dc   :  { %v1818_v51 = vsel %vm1808_vm9, %v1805_v49, -inf }
0x12dd   :  { %1819 = vmax.xlane.f32.xlu0 %v1818_v51  ;;  %v1815_v54 = vsel %vm1808_vm9, %v1800_v53, -inf }
0x12eb   :  { %9643 = vrot.lane.b32.xlu1 %v10169_v23, %s9928_s16 }
0x130f   :  { %1816 = vmax.xlane.f32.xlu1 %v1815_v54 }
0x1320   :  { %9653 = vrot.lane.b32.xlu1 %v10169_v23, %s9926_s14 }
0x1366   :  { %v1814_v55 = vpop.xlane.xlu0 %1813 }
0x1367   :  { %v1822_v56 = vsub.f32 %v1795_v42, %v1814_v55  ;;  %v1811_v57 = vpop.xlane.xlu1 %1810 }
0x1368   :  { %v1821_v58 = vsub.f32 %v1790_v44, %v1811_v57 }
0x1369   :  { %v1827_v59 = vmul.f32 1.442695, %v1822_v56 }
0x136a   :  { %v1825_v60 = vmul.f32 1.442695, %v1821_v58  ;;  %v1820_v10 = vpop.xlane.xlu0 %1819 }
0x136b   :  { %9694 = vpow2.f32 %v1827_v59  ;;  %v9644_v63 = vpop.permute.xlu1 %9643  ;;  %v1824_v11 = vsub.f32 %v1805_v49, %v1820_v10 }
0x136c   :  { %9696 = vpow2.f32 %v1825_v60  ;;  %v9646_v18 = vunpack.i.h.bf16 %v9644_v63  ;;  %v9645_v0 = vunpack.i.l.bf16 %v9644_v63 }
0x136d   :  { %v1831_v12 = vmul.f32 1.442695, %v1824_v11 }
0x136e   :  { %v9538_v2 = vpack.c.bf16 %v9646_v18, %v9645_v0 }
0x136f   :  { %9698 = vpow2.f32 %v1831_v12 }
0x1370   :  { %9539 = vmatprep.subr.bf16.mxu0 %v9538_v2 }
0x1371   :  { %9541 = vmatpush3.bf16.msra.mxu0 %v9538_v2 }
0x1375   :  { %v9695_v3 = vpop.eup %9694 }
0x1376   :  { %v9697_v5 = vpop.eup %9696  ;;  %v1836_v7 = vsel %vm1808_vm9, %v9695_v3, 0.0 }
0x1377   :  { %1837 = vadd.xlane.f32.xlu0 %v1836_v7  ;;  %v1833_v9 = vsel %vm1808_vm9, %v9697_v5, 0.0 }
0x1378   :  { %1834 = vadd.xlane.f32.xlu1 %v1833_v9 }
0x1379   :  { %v9699_v16 = vpop.eup %9698 }
0x137a   :  { %v1842_v20 = vsel %vm1808_vm9, %v9699_v16, 0.0 }
0x1389   :  { %9658 = vrot.lane.b32.xlu1 %v10179_v27, %s9926_s14 }
0x138d   :  { %9648 = vrot.lane.b32.xlu0 %v10179_v27, %s9928_s16 }
0x139c   :  { %v1817_v13 = vpop.xlane.xlu1 %1816 }
0x139d   :  { %v1823_v14 = vsub.f32 %v1800_v53, %v1817_v13 }
0x139f   :  { %v1829_v15 = vmul.f32 1.442695, %v1823_v14 }
0x13a0   :  { %v9654_v25 = vpop.permute.xlu1 %9653 }
0x13a1   :  { %9700 = vpow2.f32 %v1829_v15  ;;  %v9656_v32 = vunpack.i.h.bf16 %v9654_v25  ;;  %v9655_v33 = vunpack.i.l.bf16 %v9654_v25 }
0x13a3   :  { %v9546_v36 = vpack.c.bf16 %v9656_v32, %v9655_v33 }
0x13ab   :  { %v9701_v17 = vpop.eup %9700 }
0x13ac   :  { %1843 = vadd.xlane.f32.xlu0 %v1842_v20  ;;  %v1839_v22 = vsel %vm1808_vm9, %v9701_v17, 0.0 }
0x13ad   :  { %1840 = vadd.xlane.f32.xlu1 %v1839_v22 }
0x13be   :  { %1964 = vrot.lane.b32.xlu1 %v10160_v19, %s9924_s4 }
0x13c2   :  { %1962 = vrot.lane.b32.xlu0 %v10162_v21, %s9924_s4  ;;  %1968 = vrot.lane.b32.xlu1 %v10171_v24, %s9924_s4 }
0x13c6   :  { %1966 = vrot.lane.b32.xlu0 %v10173_v26, %s9924_s4 }
0x1404   :  { %v1838_v28 = vpop.xlane.xlu0 %1837 }
0x1405   :  { %9702 = vrcp.f32 %v1838_v28  ;;  %v1835_v29 = vpop.xlane.xlu1 %1834 }
0x1406   :  { %9704 = vrcp.f32 %v1835_v29 }
0x1408   :  { %v9649_v30 = vpop.permute.xlu0 %9648 }
0x1409   :  { %v9651_v34 = vunpack.i.h.bf16 %v9649_v30  ;;  %v9650_v35 = vunpack.i.l.bf16 %v9649_v30  ;;  %v9659_v38 = vpop.permute.xlu1 %9658 }
0x140a   :  { %v9661_v42 = vunpack.i.h.bf16 %v9659_v38  ;;  %v9660_v43 = vunpack.i.l.bf16 %v9659_v38 }
0x140b   :  { %v9542_v19 = vpack.c.bf16 %v9651_v34, %v9650_v35 }
0x140c   :  { %v9552_v44 = vpack.c.bf16 %v9661_v42, %v9660_v43 }
0x140d   :  { %9543 = vmatprep.subr.bf16.mxu0 %v9542_v19 }
0x140e   :  { %9545 = vmatpush3.bf16.msra.mxu0 %v9542_v19 }
0x140f   :  { %v9703_v21 = vpop.eup %9702  ;;  %9548 = vmatprep.subr.msk.bf16.mxu0 %vm10185_vm15, %v9546_v36 }
0x1410   :  { %v9705_v24 = vpop.eup %9704  ;;  %v1850_v41 = vmul.f32 %v9703_v21, %v9695_v3 }
0x1411   :  { %v1849_v26 = vmul.f32 %v9705_v24, %v9697_v5 }
0x1413   :  { %9153 = vmatprep.mubr.msk.f32.mxu0 %vm1808_vm9, %v1849_v26 }
0x1414   :  { %9154 = vmatmul.mubr.msk.f32.vlgmr.msra.gmra.mrb[20].mxu0 %vm1808_vm9, %v1850_v41 }
0x1417   :  { %9551 = vmatpush3.bf16.xpose.msk.msra.mxu0 %vm10185_vm15, %v9546_v36 }
0x1418   :  { %9554 = vmatprep.subr.msk.bf16.mxu0 %vm10185_vm15, %v9552_v44 }
0x141f   :  { %9557 = vmatpush3.bf16.xpose.msk.msra.mxu0 %vm10185_vm15, %v9552_v44 }
0x1439   :  { %v1844_v46 = vpop.xlane.xlu0 %1843 }
0x143a   :  { %9706 = vrcp.f32 %v1844_v46  ;;  %v1841_v47 = vpop.xlane.xlu1 %1840 }
0x143b   :  { %9708 = vrcp.f32 %v1841_v47 }
0x143d   :  { %v1963_v51 = vpop.permute.xlu0 %1962 }
0x143e   :  { %v1965_v54 = vpop.permute.xlu1 %1964 }
0x1441   :  { %v1967_v55 = vpop.permute.xlu0 %1966 }
0x1442   :  { %v1969_v31 = vpop.permute.xlu1 %1968 }
0x1444   :  { %v9707_v48 = vpop.eup %9706 }
0x1445   :  { %v9709_v49 = vpop.eup %9708  ;;  %v1852_v53 = vmul.f32 %v9707_v48, %v9699_v16 }
0x1446   :  { %v1851_v50 = vmul.f32 %v9709_v49, %v9701_v17 }
0x1448   :  { %9156 = vmatprep.mubr.msk.f32.mxu0 %vm1808_vm9, %v1851_v50 }
0x1449   :  { %9157 = vmatmul.mubr.msk.f32.gmra.mrb[22].mxu0 %vm1808_vm9, %v1852_v53 }
0x144a   :  { %9167 = vmatprep.mubr.msk.f32.mxu0 %vm255_vm5, %v1963_v51 }
0x144d   :  { %9168 = vmatmul.mubr.msk.f32.vlgmr.msra.gmra.mrb[24].mxu0 %vm255_vm5, %v1965_v54 }
0x144e   :  { %9170 = vmatprep.mubr.msk.f32.mxu0 %vm255_vm5, %v1967_v55 }
0x1451   :  { %9171 = vmatmul.mubr.msk.f32.gmra.mrb[26].mxu0 %vm255_vm5, %v1969_v31  ;;  %v2252_v31 = vld [vmem:[#allocation5 + $0x108] sm:$0xff] }
0x14e7   :  { %v10257_v56 = vpop.f32.mrb[20].mxu0 }
0x14e8   :  { %v10259_v57 = vpop.f32.mrb[21].mxu0 }
0x151c   :  { %v10261_v58 = vpop.f32.mrb[22].mxu0 }
0x151d   :  { %v10263_v59 = vpop.f32.mrb[23].mxu0 }
0x1520   :  { %v9169_v60 = vpop.f32.mrb[24].mxu0 }
0x1521   :  { %v2066_v63 = vadd.f32 %v9169_v60, %v10205_v39  ;;  %v2060_v18 = vpop.f32.mrb[25].mxu0 }
0x1522   :  { %v2061_v0 = vadd.f32 %v2060_v18, %v10207_v40 }
0x1523   :  { %v2082_v2 = vsel %vm1808_vm9, %v2066_v63, -inf }
0x1524   :  { %2083 = vmax.xlane.f32.xlu1 %v2082_v2  ;;  %v9172_v3 = vpop.f32.mrb[26].mxu0  ;;  %v2079_v5 = vsel %vm1808_vm9, %v2061_v0, -inf  ;;  %v8599_v2 = vld [vmem:[#allocation5 + $0xb0] ss:$0 sm:$0xff] }
0x1525   :  { %v2070_v7 = vpop.f32.mrb[27].mxu0  ;;  %2080 = vmax.xlane.f32.xlu0 %v2079_v5  ;;  %v2076_v10 = vadd.f32 %v9172_v3, %v10211_v45  ;;  %v1563_v3 = vadd.f32 %v8599_v2, %v10203_v37 }
0x1526   :  { %v2071_v9 = vadd.f32 %v2070_v7, %v10219_v52 }
0x1527   :  { %v2088_v39 = vsel %vm1808_vm9, %v2076_v10, -inf  ;;  %v1566_v5 = vadd.f32 %v1563_v3, %v10142_v62  ;;  %v2429_v3 = vld [vmem:[#allocation5 + $0x128] sm:$0xff] }
0x1528   :  { %v2085_v11 = vsel %vm1808_vm9, %v2071_v9, -inf  ;;  %9195 = vmatprep.subr.mxu0 %v2429_v3 }
0x1529   :  { %2086 = vmax.xlane.f32.xlu0 %v2085_v11  ;;  %v1567_v7 = vsel %vm671_vm8, %v1566_v5, 0.0  ;;  %9196 = vmatpush3.msra.mxu0 %v2429_v3 }
0x152d   :  { %2089 = vmax.xlane.f32.xlu0 %v2088_v39 }
0x15b1   :  { %v2084_v12 = vpop.xlane.xlu1 %2083 }
0x15b2   :  { %v2092_v40 = vsub.f32 %v2066_v63, %v2084_v12  ;;  %v2081_v13 = vpop.xlane.xlu0 %2080 }
0x15b3   :  { %v2091_v14 = vsub.f32 %v2061_v0, %v2081_v13 }
0x15b4   :  { %v2097_v15 = vmul.f32 1.442695, %v2092_v40 }
0x15b5   :  { %v2095_v16 = vmul.f32 1.442695, %v2091_v14 }
0x15b6   :  { %9710 = vpow2.f32 %v2097_v15  ;;  %v2087_v17 = vpop.xlane.xlu0 %2086 }
0x15b7   :  { %9712 = vpow2.f32 %v2095_v16  ;;  %v2093_v20 = vsub.f32 %v2071_v9, %v2087_v17 }
0x15b9   :  { %v2099_v22 = vmul.f32 1.442695, %v2093_v20 }
0x15ba   :  { %v2090_v52 = vpop.xlane.xlu0 %2089 }
0x15bb   :  { %9714 = vpow2.f32 %v2099_v22  ;;  %v2094_v45 = vsub.f32 %v2076_v10, %v2090_v52 }
0x15bd   :  { %v2101_v25 = vmul.f32 1.442695, %v2094_v45 }
0x15bf   :  { %9716 = vpow2.f32 %v2101_v25 }
0x15c0   :  { %v9711_v28 = vpop.eup %9710 }
0x15c1   :  { %v9713_v29 = vpop.eup %9712  ;;  %v2106_v30 = vsel %vm1808_vm9, %v9711_v28, 0.0 }
0x15c2   :  { %2107 = vadd.xlane.f32.xlu0 %v2106_v30  ;;  %v2103_v32 = vsel %vm1808_vm9, %v9713_v29, 0.0 }
0x15c3   :  { %2104 = vadd.xlane.f32.xlu1 %v2103_v32 }
0x15c5   :  { %v9715_v33 = vpop.eup %9714 }
0x15c6   :  { %v2109_v34 = vsel %vm1808_vm9, %v9715_v33, 0.0 }
0x15c7   :  { %2110 = vadd.xlane.f32.xlu1 %v2109_v34 }
0x15c9   :  { %v9717_v35 = vpop.eup %9716 }
0x15ca   :  { %v2112_v19 = vsel %vm1808_vm9, %v9717_v35, 0.0 }
0x15cb   :  { %2113 = vadd.xlane.f32.xlu0 %v2112_v19 }
0x15d8   :  { %9663 = vrot.lane.b32.xlu1 %v10169_v23, %s9927_s15 }
0x15e1   :  { %9668 = vrot.lane.b32.xlu0 %v10179_v27, %s9927_s15 }
0x164f   :  { %v2108_v21 = vpop.xlane.xlu0 %2107 }
0x1650   :  { %v2105_v36 = vpop.xlane.xlu1 %2104 }
0x1651   :  { %9718 = vrcp.f32 %v2105_v36 }
0x1652   :  { %9720 = vrcp.f32 %v2108_v21 }
0x1654   :  { %v2111_v38 = vpop.xlane.xlu1 %2110 }
0x1655   :  { %9722 = vrcp.f32 %v2111_v38 }
0x1658   :  { %v9664_v24 = vpop.permute.xlu1 %9663  ;;  %v2114_v26 = vpop.xlane.xlu0 %2113 }
0x1659   :  { %v9666_v41 = vunpack.i.h.bf16 %v9664_v24  ;;  %v9665_v42 = vunpack.i.l.bf16 %v9664_v24  ;;  %9724 = vrcp.f32 %v2114_v26 }
0x165b   :  { %v9719_v43 = vpop.eup %9718  ;;  %v9558_v44 = vpack.c.bf16 %v9666_v41, %v9665_v42 }
0x165c   :  { %v9669_v46 = vpop.permute.xlu0 %9668  ;;  %v2119_v47 = vmul.f32 %v9719_v43, %v9713_v29  ;;  %v9721_v49 = vpop.eup %9720 }
0x165d   :  { %v9671_v48 = vunpack.i.h.bf16 %v9669_v46  ;;  %v9670_v23 = vunpack.i.l.bf16 %v9669_v46  ;;  %9559 = vmatprep.subr.bf16.mxu1 %v9558_v44  ;;  %v2120_v51 = vmul.f32 %v9721_v49, %v9711_v28 }
0x165e   :  { %9561 = vmatpush3.bf16.msra.mxu1 %v9558_v44  ;;  %9181 = vmatprep.mubr.msk.f32.mxu1 %vm1808_vm9, %v2119_v47 }
0x165f   :  { %v9562_v27 = vpack.c.bf16 %v9671_v48, %v9670_v23  ;;  %v9723_v50 = vpop.eup %9722 }
0x1660   :  { %v2121_v54 = vmul.f32 %v9723_v50, %v9715_v33 }
0x1661   :  { %9563 = vmatprep.subr.bf16.mxu1 %v9562_v27 }
0x1662   :  { %9565 = vmatpush3.bf16.msra.mxu1 %v9562_v27 }
0x1663   :  { %v9725_v53 = vpop.eup %9724  ;;  %9187 = vmatprep.subr.mxu1 %v2252_v31 }
0x1664   :  { %v2122_v55 = vmul.f32 %v9725_v53, %v9717_v35  ;;  %v2532_v35 = vld [vmem:[#allocation5 + $0x138] sm:$0xff] }
0x1665   :  { %9182 = vmatmul.mubr.msk.f32.vlgmr.msra.gmra.mrb[20].mxu1 %vm1808_vm9, %v2120_v51 }
0x1666   :  { %9184 = vmatprep.mubr.msk.f32.mxu1 %vm1808_vm9, %v2121_v54  ;;  %9188 = vmatpush3.msra.mxu1 %v2252_v31 }
0x1667   :  { %9203 = vmatprep.subr.mxu1 %v9922_v1 }
0x1669   :  { %9185 = vmatmul.mubr.msk.f32.gmra.mrb[22].mxu1 %vm1808_vm9, %v2122_v55 }
0x1738   :  { %v9183_v60 = vpop.f32.mrb[20].mxu1 }
0x1739   :  { %v2213_v63 = vpop.f32.mrb[21].mxu1 }
0x173a   :  { %2236 = vrot.lane.b32.xlu1 %v2213_v63, %s9929_s17 }
0x173c   :  { %v9186_v18 = vpop.f32.mrb[22].mxu1 }
0x173d   :  { %v2223_v0 = vpop.f32.mrb[23].mxu1 }
0x173e   :  { %2238 = vrot.lane.b32.xlu1 %v9183_v60, %s9929_s17  ;;  %2240 = vrot.lane.b32.xlu0 %v2223_v0, %s9929_s17  ;;  %v8601_v60 = vld [vmem:[#allocation5 + $0xb8] ss:$0 sm:$0xff] }
0x1742   :  { %2242 = vrot.lane.b32.xlu1 %v9186_v18, %s9929_s17  ;;  %v8602_v18 = vld [vmem:[#allocation5 + $0xc0] ss:$0 sm:$0xff] }
0x175d   :  { %1568 = vadd.xlane.f32.xlu0 %v1567_v7 }
0x17ac   :  { %v2237_v9 = vpop.permute.xlu1 %2236 }
0x17ad   :  { %v2248_v10 = vsel %vm255_vm5, %v10259_v57, %v2237_v9  ;;  %v8632_v57 = vld [vmem:[#allocation5 + $0x110] ss:$0 sm:$0xff] }
0x17ae   :  { %9189 = vmatprep.mubr.msk.f32.mxu1 %vm178_vm4, %v2248_v10 }
0x17b0   :  { %v2239_v11 = vpop.permute.xlu1 %2238  ;;  %v2241_v39 = vpop.permute.xlu0 %2240 }
0x17b1   :  { %v2249_v12 = vsel %vm255_vm5, %v10257_v56, %v2239_v11  ;;  %v2250_v40 = vsel %vm255_vm5, %v10263_v59, %v2241_v39 }
0x17b2   :  { %9190 = vmatmul.mubr.msk.f32.vlgmr.msra.gmra.mrb[24].mxu1 %vm178_vm4, %v2249_v12 }
0x17b3   :  { %9192 = vmatprep.mubr.msk.f32.mxu1 %vm178_vm4, %v2250_v40  ;;  %9204 = vmatpush3.msra.mxu1 %v2532_v35 }
0x17b4   :  { %v2243_v62 = vpop.permute.xlu1 %2242 }
0x17b5   :  { %v2251_v37 = vsel %vm255_vm5, %v10261_v58, %v2243_v62 }
0x17b6   :  { %9193 = vmatmul.mubr.msk.f32.gmra.mrb[26].mxu1 %vm178_vm4, %v2251_v37 }
0x17b7   :  { %9205 = vmatprep.mubr.msk.f32.mxu1 %vm9923_vm0, %v9922_v1 }
0x17ea   :  { %v1569_v13 = vpop.xlane.xlu0 %1568 }
0x17eb   :  { %v1570_v16 = vmul.f32 0.125, %v1569_v13 }
0x17ed   :  { %v1571_v25 = vsub.f32 %v1566_v5, %v1570_v16 }
0x17ef   :  { %v1572_v34 = vmul.f32 %v1571_v25, %v1571_v25 }
0x1885   :  { %v9191_v14 = vpop.f32.mrb[24].mxu1 }
0x1886   :  { %v2342_v56 = vadd.f32 %v9191_v14, %v8632_v57  ;;  %v2336_v15 = vpop.f32.mrb[25].mxu1 }
0x1887   :  { %v2337_v59 = vadd.f32 %v8632_v57, %v2336_v15 }
0x1888   :  { %v2356_v17 = vadd.f32 %v2342_v56, %v10148_v4  ;;  %v8637_v56 = vld [vmem:[#allocation5 + $0x118] ss:$0 sm:$0xff] }
0x1889   :  { %v9194_v20 = vpop.f32.mrb[26].mxu1  ;;  %v2355_v22 = vadd.f32 %v2337_v59, %v10140_v61  ;;  %v1573_v61 = vsel %vm671_vm8, %v1572_v34, 0.0  ;;  %v8644_v34 = vld [vmem:[#allocation5 + $0x140] ss:$0 sm:$0xff] }
0x188a   :  { %v2352_v52 = vadd.f32 %v9194_v20, %v8632_v57  ;;  %v2346_v45 = vpop.f32.mrb[27].mxu1  ;;  %v2362_v58 = vsel %vm178_vm4, %v2356_v17, 0.0  ;;  %v8638_v20 = vld [vmem:[#allocation5 + $0x120] ss:$0 sm:$0xff] }
0x188b   :  { %v2347_v28 = vadd.f32 %v8632_v57, %v2346_v45  ;;  %2363 = vadd.xlane.f32.xlu0 %v2362_v58  ;;  %v2359_v29 = vsel %vm178_vm4, %v2355_v22, 0.0 }
0x188c   :  { %2360 = vadd.xlane.f32.xlu1 %v2359_v29  ;;  %v2358_v30 = vadd.f32 %v2352_v52, %v10156_v8 }
0x188d   :  { %v2357_v32 = vadd.f32 %v2347_v28, %v10150_v6 }
0x188e   :  { %v2368_v33 = vsel %vm178_vm4, %v2358_v30, 0.0 }
0x188f   :  { %v2365_v4 = vsel %vm178_vm4, %v2357_v32, 0.0 }
0x1890   :  { %2366 = vadd.xlane.f32.xlu0 %v2365_v4  ;;  %2369 = vadd.xlane.f32.xlu1 %v2368_v33 }
0x1894   :  { %1574 = vadd.xlane.f32.xlu0 %v1573_v61 }
0x1918   :  { %v2364_v19 = vpop.xlane.xlu0 %2363 }
0x1919   :  { %v2372_v36 = vmul.f32 0.125, %v2364_v19  ;;  %v2361_v21 = vpop.xlane.xlu1 %2360 }
0x191a   :  { %v2371_v38 = vmul.f32 0.125, %v2361_v21  ;;  %v8639_v21 = vld [vmem:[#allocation5 + $0x130] ss:$0 sm:$0xff] }
0x191b   :  { %v2376_v24 = vsub.f32 %v2356_v17, %v2372_v36 }
0x191c   :  { %v2375_v8 = vsub.f32 %v2355_v22, %v2371_v38 }
0x191d   :  { %v2367_v26 = vpop.xlane.xlu0 %2366  ;;  %v2370_v6 = vpop.xlane.xlu1 %2369  ;;  %v2380_v41 = vmul.f32 %v2376_v24, %v2376_v24 }
0x191e   :  { %v2373_v42 = vmul.f32 0.125, %v2367_v26  ;;  %v2374_v43 = vmul.f32 0.125, %v2370_v6  ;;  %v2379_v44 = vmul.f32 %v2375_v8, %v2375_v8 }
0x191f   :  { %v2386_v46 = vsel %vm178_vm4, %v2380_v41, 0.0 }
0x1920   :  { %v2377_v47 = vsub.f32 %v2357_v32, %v2373_v42  ;;  %v2378_v48 = vsub.f32 %v2358_v30, %v2374_v43  ;;  %2387 = vadd.xlane.f32.xlu0 %v2386_v46  ;;  %v2383_v23 = vsel %vm178_vm4, %v2379_v44, 0.0 }
0x1921   :  { %v1575_v27 = vpop.xlane.xlu0 %1574  ;;  %2384 = vadd.xlane.f32.xlu1 %v2383_v23  ;;  %v67_v23 = vld [vmem:[#allocation5 + $0x470] sm:$0xff] }
0x1922   :  { %v1576_v49 = vmul.f32 0.125, %v1575_v27  ;;  %v2381_v50 = vmul.f32 %v2377_v47, %v2377_v47  ;;  %v2382_v51 = vmul.f32 %v2378_v48, %v2378_v48  ;;  %v66_v27 = vld [vmem:[#allocation5 + $0x468] sm:$0xff] }
0x1924   :  { %v1577_v53 = vadd.f32 1e-05, %v1576_v49  ;;  %v2389_v54 = vsel %vm178_vm4, %v2381_v50, 0.0  ;;  %v2392_v55 = vsel %vm178_vm4, %v2382_v51, 0.0 }
0x1925   :  { %2390 = vadd.xlane.f32.xlu1 %v2389_v54  ;;  %2393 = vadd.xlane.f32.xlu0 %v2392_v55  ;;  %v69_v55 = vld [vmem:[#allocation5 + $0x480] sm:$0xff] }
0x1926   :  { %9726 = vrsqrt.f32 %v1577_v53 }
0x1930   :  { %v9727_v31 = vpop.eup %9726 }
0x1931   :  { %v1579_v63 = vmul.f32 %v9727_v31, %v1571_v25 }
0x1933   :  { %v1585_v0 = vmul.f32 %v8601_v60, %v1579_v63  ;;  %v68_v60 = vld [vmem:[#allocation5 + $0x478] sm:$0xff] }
0x1935   :  { %v1591_v2 = vadd.f32 %v8602_v18, %v1585_v0 }
0x1937   :  { %9206 = vmatmul.mubr.msk.f32.vlgmr.msra.gmra.mrb[28].mxu1 %vm178_vm4, %v1591_v2 }
0x19ad   :  { %v2388_v5 = vpop.xlane.xlu0 %2387 }
0x19ae   :  { %v2396_v7 = vmul.f32 0.125, %v2388_v5  ;;  %v2385_v9 = vpop.xlane.xlu1 %2384 }
0x19af   :  { %v2395_v10 = vmul.f32 0.125, %v2385_v9 }
0x19b0   :  { %v2400_v11 = vadd.f32 1e-05, %v2396_v7 }
0x19b1   :  { %v2399_v39 = vadd.f32 1e-05, %v2395_v10 }
0x19b2   :  { %9728 = vrsqrt.f32 %v2400_v11  ;;  %v2394_v12 = vpop.xlane.xlu0 %2393  ;;  %v2391_v40 = vpop.xlane.xlu1 %2390 }
0x19b3   :  { %9730 = vrsqrt.f32 %v2399_v39  ;;  %v2398_v62 = vmul.f32 0.125, %v2394_v12  ;;  %v2397_v37 = vmul.f32 0.125, %v2391_v40 }
0x19b5   :  { %v2402_v57 = vadd.f32 1e-05, %v2398_v62  ;;  %v2401_v13 = vadd.f32 1e-05, %v2397_v37 }
0x19b7   :  { %9732 = vrsqrt.f32 %v2402_v57 }
0x19b8   :  { %9734 = vrsqrt.f32 %v2401_v13 }
0x19bc   :  { %v9729_v14 = vpop.eup %9728 }
0x19bd   :  { %v9731_v15 = vpop.eup %9730  ;;  %v2408_v16 = vmul.f32 %v9729_v14, %v2376_v24 }
0x19be   :  { %v2407_v59 = vmul.f32 %v9731_v15, %v2375_v8 }
0x19bf   :  { %v2417_v17 = vmul.f32 %v8637_v56, %v2408_v16 }
0x19c0   :  { %v2416_v22 = vmul.f32 %v8637_v56, %v2407_v59 }
0x19c1   :  { %v9733_v52 = vpop.eup %9732  ;;  %v10323_v28 = vadd.f32 %v8638_v20, %v2417_v17 }
0x19c2   :  { %v9735_v45 = vpop.eup %9734  ;;  %v10321_v58 = vadd.f32 %v8638_v20, %v2416_v22  ;;  %v2410_v25 = vmul.f32 %v9733_v52, %v2378_v48 }
0x19c3   :  { %v2409_v29 = vmul.f32 %v9735_v45, %v2377_v47 }
0x19c4   :  { %9197 = vmatprep.mubr.msk.f32.mxu0 %vm178_vm4, %v10321_v58  ;;  %v2419_v30 = vmul.f32 %v8637_v56, %v2410_v25 }
0x19c5   :  { %9198 = vmatmul.mubr.msk.f32.vlgmr.msra.gmra.mrb[28].mxu0 %vm178_vm4, %v10323_v28  ;;  %v2418_v32 = vmul.f32 %v8637_v56, %v2409_v29 }
0x19c6   :  { %v10329_v33 = vadd.f32 %v8638_v20, %v2419_v30 }
0x19c7   :  { %v10331_v4 = vadd.f32 %v8638_v20, %v2418_v32 }
0x19c9   :  { %9200 = vmatprep.mubr.msk.f32.mxu0 %vm178_vm4, %v10331_v4 }
0x19ca   :  { %9201 = vmatmul.mubr.msk.f32.gmra.mrb[30].mxu0 %vm178_vm4, %v10329_v33 }
0x1a0a   :  { %v2607_v61 = vpop.f32.mrb[28].mxu1 }
0x1a0b   :  { %v10337_v35 = vadd.f32 %v8644_v34, %v2607_v61  ;;  %v9207_v19 = vpop.f32.mrb[29].mxu1 }
0x1a0d   :  { %9208 = vmatprep.subr.msk.mxu0 %vm255_vm5, %v10337_v35  ;;  %2864 = vrot.lane.b32.xlu1 %v10337_v35, %s9924_s4 }
0x1a0e   :  { %9209 = vmatpush3.xpose.msk.msra.mxu0 %vm255_vm5, %v10337_v35 }
0x1a7f   :  { %v2865_v36 = vpop.permute.xlu1 %2864 }
0x1a80   :  { %9224 = vmatprep.subr.msk.mxu0 %vm255_vm5, %v2865_v36 }
0x1a98   :  { %v9199_v38 = vpop.f32.mrb[28].mxu0 }
0x1a99   :  { %v2519_v24 = vadd.f32 %v9199_v38, %v8639_v21  ;;  %v2513_v8 = vpop.f32.mrb[29].mxu0 }
0x1a9a   :  { %v2514_v26 = vadd.f32 %v8639_v21, %v2513_v8 }
0x1a9b   :  { %2858 = vrot.lane.b32.xlu1 %v2519_v24, %s9924_s4 }
0x1a9c   :  { %2856 = vrot.lane.b32.xlu0 %v2514_v26, %s9924_s4  ;;  %9210 = vmatprep.mubr.msk.f32.mxu0 %vm255_vm5, %v2514_v26 }
0x1a9d   :  { %v9202_v6 = vpop.f32.mrb[30].mxu0  ;;  %9211 = vmatmul.mubr.msk.f32.vlgmr.msra.gmra.mrb[32].mxu0 %vm255_vm5, %v2519_v24 }
0x1a9e   :  { %v2529_v41 = vadd.f32 %v9202_v6, %v8639_v21  ;;  %v2523_v42 = vpop.f32.mrb[31].mxu0  ;;  %9225 = vmatpush3.xpose.msk.msra.mxu0 %vm255_vm5, %v2865_v36 }
0x1a9f   :  { %v2524_v43 = vadd.f32 %v8639_v21, %v2523_v42 }
0x1aa0   :  { %2862 = vrot.lane.b32.xlu0 %v2529_v41, %s9924_s4 }
0x1aa1   :  { %2860 = vrot.lane.b32.xlu1 %v2524_v43, %s9924_s4  ;;  %9213 = vmatprep.mubr.msk.f32.mxu0 %vm255_vm5, %v2524_v43 }
0x1aa2   :  { %9214 = vmatmul.mubr.msk.f32.gmra.mrb[34].mxu0 %vm255_vm5, %v2529_v41 }
0x1b0d   :  { %v2859_v44 = vpop.permute.xlu1 %2858 }
0x1b0e   :  { %v2857_v46 = vpop.permute.xlu0 %2856 }
0x1b0f   :  { %9226 = vmatprep.mubr.msk.f32.mxu0 %vm255_vm5, %v2857_v46 }
0x1b10   :  { %9227 = vmatmul.mubr.msk.f32.vlgmr.msra.gmra.mrb[36].mxu0 %vm255_vm5, %v2859_v44 }
0x1b12   :  { %v2863_v47 = vpop.permute.xlu0 %2862 }
0x1b13   :  { %v2861_v48 = vpop.permute.xlu1 %2860 }
0x1b14   :  { %9229 = vmatprep.mubr.msk.f32.mxu0 %vm255_vm5, %v2861_v48 }
0x1b15   :  { %9230 = vmatmul.mubr.msk.f32.gmra.mrb[38].mxu0 %vm255_vm5, %v2863_v47 }
0x1b70   :  { %v9212_v49 = vpop.f32.mrb[32].mxu0 }
0x1b71   :  { %v2698_v50 = vadd.f32 %v9212_v49, %v67_v23  ;;  %v2692_v51 = vpop.f32.mrb[33].mxu0 }
0x1b72   :  { %v2693_v53 = vadd.f32 %v2692_v51, %v66_v27 }
0x1b73   :  { %v2714_v54 = vsel %vm255_vm5, %v2698_v50, -inf }
0x1b74   :  { %2715 = vmax.xlane.f32.xlu0 %v2714_v54  ;;  %v2711_v31 = vsel %vm255_vm5, %v2693_v53, -inf }
0x1b75   :  { %v9215_v63 = vpop.f32.mrb[34].mxu0  ;;  %2712 = vmax.xlane.f32.xlu1 %v2711_v31 }
0x1b76   :  { %v2708_v18 = vadd.f32 %v9215_v63, %v69_v55  ;;  %v2702_v0 = vpop.f32.mrb[35].mxu0 }
0x1b77   :  { %v2703_v2 = vadd.f32 %v2702_v0, %v68_v60 }
0x1b78   :  { %v2720_v3 = vsel %vm255_vm5, %v2708_v18, -inf }
0x1b79   :  { %2721 = vmax.xlane.f32.xlu1 %v2720_v3  ;;  %v2717_v5 = vsel %vm255_vm5, %v2703_v2, -inf }
0x1b7a   :  { %2718 = vmax.xlane.f32.xlu0 %v2717_v5 }
0x1be3   :  { %v9228_v7 = vpop.f32.mrb[36].mxu0 }
0x1be4   :  { %v2948_v9 = vadd.f32 %v9228_v7, %v67_v23  ;;  %v2942_v10 = vpop.f32.mrb[37].mxu0 }
0x1be5   :  { %v2943_v11 = vadd.f32 %v2942_v10, %v66_v27 }
0x1be6   :  { %v2964_v39 = vsel %vm255_vm5, %v2948_v9, -inf }
0x1be7   :  { %2965 = vmax.xlane.f32.xlu1 %v2964_v39  ;;  %v2961_v12 = vsel %vm255_vm5, %v2943_v11, -inf }
0x1be8   :  { %v9231_v40 = vpop.f32.mrb[38].mxu0  ;;  %2962 = vmax.xlane.f32.xlu0 %v2961_v12 }
0x1be9   :  { %v2958_v62 = vadd.f32 %v9231_v40, %v69_v55  ;;  %v2952_v37 = vpop.f32.mrb[39].mxu0 }
0x1bea   :  { %v2953_v57 = vadd.f32 %v2952_v37, %v68_v60 }
0x1beb   :  { %v2970_v13 = vsel %vm255_vm5, %v2958_v62, -inf }
0x1bec   :  { %2971 = vmax.xlane.f32.xlu1 %v2970_v13  ;;  %v2967_v14 = vsel %vm255_vm5, %v2953_v57, -inf }
0x1bed   :  { %2968 = vmax.xlane.f32.xlu0 %v2967_v14 }
0x1c01   :  { %v2716_v56 = vpop.xlane.xlu0 %2715 }
0x1c02   :  { %v2724_v15 = vsub.f32 %v2698_v50, %v2716_v56  ;;  %v2713_v16 = vpop.xlane.xlu1 %2712 }
0x1c03   :  { %v2723_v59 = vsub.f32 %v2693_v53, %v2713_v16 }
0x1c04   :  { %v2729_v17 = vmul.f32 1.442695, %v2724_v15 }
0x1c05   :  { %v2727_v20 = vmul.f32 1.442695, %v2723_v59 }
0x1c06   :  { %9736 = vpow2.f32 %v2729_v17  ;;  %v2722_v22 = vpop.xlane.xlu1 %2721 }
0x1c07   :  { %9738 = vpow2.f32 %v2727_v20  ;;  %v2719_v52 = vpop.xlane.xlu0 %2718  ;;  %v2726_v45 = vsub.f32 %v2708_v18, %v2722_v22 }
0x1c08   :  { %v2725_v25 = vsub.f32 %v2703_v2, %v2719_v52  ;;  %v3126_v52 = vld [vmem:[#allocation5 + $0x148] sm:$0xff] }
0x1c09   :  { %v2733_v29 = vmul.f32 1.442695, %v2726_v45  ;;  %9240 = vmatprep.subr.mxu0 %v3126_v52 }
0x1c0a   :  { %v2731_v30 = vmul.f32 1.442695, %v2725_v25  ;;  %9241 = vmatpush3.msra.mxu0 %v3126_v52 }
0x1c0b   :  { %9740 = vpow2.f32 %v2733_v29 }
0x1c0c   :  { %9742 = vpow2.f32 %v2731_v30 }
0x1c10   :  { %v10367_v32 = vpop.eup %9736 }
0x1c11   :  { %v9739_v34 = vpop.eup %9738  ;;  %v2738_v61 = vsel %vm255_vm5, %v10367_v32, 0.0 }
0x1c12   :  { %2739 = vadd.xlane.f32.xlu1 %v2738_v61  ;;  %v2735_v19 = vsel %vm255_vm5, %v9739_v34, 0.0 }
0x1c13   :  { %2736 = vadd.xlane.f32.xlu0 %v2735_v19 }
0x1c15   :  { %v10372_v36 = vpop.eup %9740 }
0x1c16   :  { %v9743_v21 = vpop.eup %9742  ;;  %v2744_v38 = vsel %vm255_vm5, %v10372_v36, 0.0 }
0x1c17   :  { %v2741_v24 = vsel %vm255_vm5, %v9743_v21, 0.0  ;;  %2745 = vadd.xlane.f32.xlu1 %v2744_v38 }
0x1c18   :  { %2742 = vadd.xlane.f32.xlu0 %v2741_v24 }
0x1c74   :  { %v2966_v8 = vpop.xlane.xlu1 %2965 }
0x1c75   :  { %v2974_v26 = vsub.f32 %v2948_v9, %v2966_v8  ;;  %v2963_v6 = vpop.xlane.xlu0 %2962 }
0x1c76   :  { %v2973_v41 = vsub.f32 %v2943_v11, %v2963_v6 }
0x1c77   :  { %v2979_v42 = vmul.f32 1.442695, %v2974_v26 }
0x1c78   :  { %v2977_v43 = vmul.f32 1.442695, %v2973_v41 }
0x1c79   :  { %9744 = vpow2.f32 %v2979_v42  ;;  %v2972_v44 = vpop.xlane.xlu1 %2971  ;;  %v8666_v42 = vld [vmem:[#allocation5 + $0x150] ss:$0 sm:$0xff] }
0x1c7a   :  { %9746 = vpow2.f32 %v2977_v43  ;;  %v2976_v46 = vsub.f32 %v2958_v62, %v2972_v44  ;;  %v2969_v47 = vpop.xlane.xlu0 %2968 }
0x1c7b   :  { %v2975_v48 = vsub.f32 %v2953_v57, %v2969_v47 }
0x1c7c   :  { %v2983_v23 = vmul.f32 1.442695, %v2976_v46 }
0x1c7d   :  { %v2981_v27 = vmul.f32 1.442695, %v2975_v48 }
0x1c7e   :  { %9748 = vpow2.f32 %v2983_v23 }
0x1c7f   :  { %9750 = vpow2.f32 %v2981_v27 }
0x1c83   :  { %v9745_v49 = vpop.eup %9744 }
0x1c84   :  { %v9747_v50 = vpop.eup %9746  ;;  %v2988_v51 = vsel %vm255_vm5, %v9745_v49, 0.0 }
0x1c85   :  { %2989 = vadd.xlane.f32.xlu1 %v2988_v51  ;;  %v2985_v53 = vsel %vm255_vm5, %v9747_v50, 0.0 }
0x1c86   :  { %2986 = vadd.xlane.f32.xlu0 %v2985_v53 }
0x1c88   :  { %v9749_v54 = vpop.eup %9748 }
0x1c89   :  { %v9751_v55 = vpop.eup %9750  ;;  %v2994_v31 = vsel %vm255_vm5, %v9749_v54, 0.0 }
0x1c8a   :  { %2995 = vadd.xlane.f32.xlu1 %v2994_v31  ;;  %v2991_v60 = vsel %vm255_vm5, %v9751_v55, 0.0 }
0x1c8b   :  { %2992 = vadd.xlane.f32.xlu0 %v2991_v60 }
0x1c9b   :  { %3005 = vrot.lane.b32.xlu1 %v10337_v35, %s9926_s14 }
0x1c9f   :  { %v2740_v2 = vpop.xlane.xlu1 %2739 }
0x1ca0   :  { %v2737_v63 = vpop.xlane.xlu0 %2736 }
0x1ca1   :  { %2755 = vrot.lane.b32.xlu0 %v10337_v35, %s9925_s13  ;;  %9752 = vrcp.f32 %v2737_v63 }
0x1ca2   :  { %9754 = vrcp.f32 %v2740_v2 }
0x1ca4   :  { %v2746_v5 = vpop.xlane.xlu1 %2745 }
0x1ca5   :  { %v2743_v3 = vpop.xlane.xlu0 %2742 }
0x1ca6   :  { %9756 = vrcp.f32 %v2743_v3 }
0x1ca7   :  { %9758 = vrcp.f32 %v2746_v5 }
0x1cab   :  { %v9753_v18 = vpop.eup %9752 }
0x1cac   :  { %v2751_v0 = vmul.f32 %v9753_v18, %v9739_v34  ;;  %v9755_v39 = vpop.eup %9754 }
0x1cad   :  { %v2752_v40 = vmul.f32 %v9755_v39, %v10367_v32 }
0x1cae   :  { %9218 = vmatprep.mubr.msk.f32.mxu1 %vm255_vm5, %v2751_v0 }
0x1cb0   :  { %v9757_v35 = vpop.eup %9756 }
0x1cb1   :  { %v9759_v62 = vpop.eup %9758  ;;  %v2753_v57 = vmul.f32 %v9757_v35, %v9743_v21 }
0x1cb2   :  { %v2754_v14 = vmul.f32 %v9759_v62, %v10372_v36 }
0x1d12   :  { %v2990_v7 = vpop.xlane.xlu1 %2989 }
0x1d13   :  { %v2987_v9 = vpop.xlane.xlu0 %2986 }
0x1d14   :  { %9760 = vrcp.f32 %v2987_v9 }
0x1d15   :  { %9762 = vrcp.f32 %v2990_v7 }
0x1d17   :  { %v2996_v10 = vpop.xlane.xlu1 %2995 }
0x1d18   :  { %v2993_v11 = vpop.xlane.xlu0 %2992 }
0x1d19   :  { %9764 = vrcp.f32 %v2993_v11 }
0x1d1a   :  { %9766 = vrcp.f32 %v2996_v10 }
0x1d1b   :  { %v3006_v37 = vpop.permute.xlu1 %3005 }
0x1d1c   :  { %v2756_v12 = vpop.permute.xlu0 %2755 }
0x1d1d   :  { %9216 = vmatprep.subr.msk.mxu1 %vm347_vm7, %v2756_v12 }
0x1d1e   :  { %9217 = vmatpush3.msk.msra.mxu1 %vm347_vm7, %v2756_v12  ;;  %v9761_v13 = vpop.eup %9760 }
0x1d1f   :  { %9219 = vmatmul.mubr.msk.f32.vlgmr.msra.gmra.mrb[30].mxu1 %vm255_vm5, %v2752_v40  ;;  %9232 = vmatprep.subr.msk.mxu1 %vm347_vm7, %v3006_v37  ;;  %v9763_v56 = vpop.eup %9762  ;;  %v3001_v15 = vmul.f32 %v9761_v13, %v9747_v50  ;;  %v3303_v13 = vld [vmem:[#allocation5 + $0x168] sm:$0xff] }
0x1d20   :  { %9221 = vmatprep.mubr.msk.f32.mxu1 %vm255_vm5, %v2753_v57  ;;  %9233 = vmatpush3.msk.msra.mxu1 %vm347_vm7, %v3006_v37  ;;  %v3002_v59 = vmul.f32 %v9763_v56, %v9745_v49 }
0x1d21   :  { %9248 = vmatprep.subr.mxu1 %v3303_v13 }
0x1d23   :  { %v9765_v16 = vpop.eup %9764  ;;  %9222 = vmatmul.mubr.msk.f32.gmra.mrb[32].mxu1 %vm255_vm5, %v2754_v14 }
0x1d24   :  { %9234 = vmatprep.mubr.msk.f32.mxu1 %vm255_vm5, %v3001_v15  ;;  %v9767_v17 = vpop.eup %9766  ;;  %v3003_v20 = vmul.f32 %v9765_v16, %v9751_v55 }
0x1d25   :  { %v3004_v22 = vmul.f32 %v9767_v17, %v9749_v54 }
0x1d27   :  { %9235 = vmatmul.mubr.msk.f32.vlgmr.msra.gmra.mrb[34].mxu1 %vm255_vm5, %v3002_v59 }
0x1d28   :  { %9237 = vmatprep.mubr.msk.f32.mxu1 %vm255_vm5, %v3003_v20  ;;  %9249 = vmatpush3.msra.mxu1 %v3303_v13 }
0x1d2b   :  { %9238 = vmatmul.mubr.msk.f32.gmra.mrb[36].mxu1 %vm255_vm5, %v3004_v22 }
0x1df2   :  { %v9220_v45 = vpop.f32.mrb[30].mxu1 }
0x1df3   :  { %v2837_v25 = vpop.f32.mrb[31].mxu1 }
0x1df6   :  { %v9223_v29 = vpop.f32.mrb[32].mxu1 }
0x1df7   :  { %v2847_v30 = vpop.f32.mrb[33].mxu1 }
0x1dfa   :  { %v9236_v32 = vpop.f32.mrb[34].mxu1 }
0x1dfb   :  { %3112 = vrot.lane.b32.xlu0 %v9236_v32, %s9929_s17  ;;  %v3087_v34 = vpop.f32.mrb[35].mxu1  ;;  %v8671_v32 = vld [vmem:[#allocation5 + $0x158] ss:$0 sm:$0xff] }
0x1dfc   :  { %3110 = vrot.lane.b32.xlu1 %v3087_v34, %s9929_s17 }
0x1dfe   :  { %v9239_v61 = vpop.f32.mrb[36].mxu1 }
0x1dff   :  { %3116 = vrot.lane.b32.xlu0 %v9239_v61, %s9929_s17  ;;  %v3097_v19 = vpop.f32.mrb[37].mxu1 }
0x1e00   :  { %3114 = vrot.lane.b32.xlu1 %v3097_v19, %s9929_s17 }
0x1e6d   :  { %v3113_v36 = vpop.permute.xlu0 %3112 }
0x1e6e   :  { %v3111_v21 = vpop.permute.xlu1 %3110  ;;  %v3123_v24 = vsel %vm255_vm5, %v9220_v45, %v3113_v36 }
0x1e6f   :  { %v3122_v38 = vsel %vm255_vm5, %v2837_v25, %v3111_v21  ;;  %v8672_v21 = vld [vmem:[#allocation5 + $0x160] ss:$0 sm:$0xff] }
0x1e70   :  { %9242 = vmatprep.mubr.msk.f32.mxu0 %vm178_vm4, %v3122_v38 }
0x1e71   :  { %9243 = vmatmul.mubr.msk.f32.vlgmr.msra.gmra.mrb[40].mxu0 %vm178_vm4, %v3123_v24  ;;  %v3117_v8 = vpop.permute.xlu0 %3116 }
0x1e72   :  { %v3115_v26 = vpop.permute.xlu1 %3114  ;;  %v3125_v41 = vsel %vm255_vm5, %v9223_v29, %v3117_v8 }
0x1e73   :  { %v3124_v6 = vsel %vm255_vm5, %v2847_v30, %v3115_v26 }
0x1e74   :  { %9245 = vmatprep.mubr.msk.f32.mxu0 %vm178_vm4, %v3124_v6 }
0x1e75   :  { %9246 = vmatmul.mubr.msk.f32.gmra.mrb[42].mxu0 %vm178_vm4, %v3125_v41 }
0x1f44   :  { %v9244_v43 = vpop.f32.mrb[40].mxu0 }
0x1f45   :  { %v3216_v44 = vadd.f32 %v9244_v43, %v8666_v42  ;;  %v3210_v46 = vpop.f32.mrb[41].mxu0 }
0x1f46   :  { %v3211_v47 = vadd.f32 %v8666_v42, %v3210_v46 }
0x1f47   :  { %v3230_v48 = vadd.f32 %v3216_v44, %v10323_v28 }
0x1f48   :  { %v3229_v23 = vadd.f32 %v3211_v47, %v10321_v58  ;;  %v9247_v27 = vpop.f32.mrb[42].mxu0 }
0x1f49   :  { %v3226_v49 = vadd.f32 %v9247_v27, %v8666_v42  ;;  %v3220_v50 = vpop.f32.mrb[43].mxu0  ;;  %v3236_v51 = vsel %vm178_vm4, %v3230_v48, 0.0 }
0x1f4a   :  { %v3221_v53 = vadd.f32 %v8666_v42, %v3220_v50  ;;  %3237 = vadd.xlane.f32.xlu0 %v3236_v51  ;;  %v3233_v54 = vsel %vm178_vm4, %v3229_v23, 0.0 }
0x1f4b   :  { %v3232_v55 = vadd.f32 %v3226_v49, %v10329_v33  ;;  %3234 = vadd.xlane.f32.xlu1 %v3233_v54 }
0x1f4c   :  { %v3231_v31 = vadd.f32 %v3221_v53, %v10331_v4 }
0x1f4d   :  { %v3242_v60 = vsel %vm178_vm4, %v3232_v55, 0.0 }
0x1f4e   :  { %v3239_v28 = vsel %vm178_vm4, %v3231_v31, 0.0 }
0x1f4f   :  { %3243 = vadd.xlane.f32.xlu1 %v3242_v60  ;;  %3240 = vadd.xlane.f32.xlu0 %v3239_v28 }
0x1fd7   :  { %v3238_v58 = vpop.xlane.xlu0 %3237 }
0x1fd8   :  { %v3246_v63 = vmul.f32 0.125, %v3238_v58  ;;  %v3235_v18 = vpop.xlane.xlu1 %3234 }
0x1fd9   :  { %v3245_v0 = vmul.f32 0.125, %v3235_v18 }
0x1fda   :  { %v3250_v2 = vsub.f32 %v3230_v48, %v3246_v63  ;;  %v3418_v48 = vld [vmem:[#allocation5 + $0x178] sm:$0xff] }
0x1fdb   :  { %v3249_v3 = vsub.f32 %v3229_v23, %v3245_v0  ;;  %9256 = vmatprep.subr.mxu0 %v3418_v48  ;;  %v8673_v23 = vld [vmem:[#allocation5 + $0x170] ss:$0 sm:$0xff] }
0x1fdc   :  { %v3241_v5 = vpop.xlane.xlu0 %3240  ;;  %v3244_v7 = vpop.xlane.xlu1 %3243  ;;  %v3254_v9 = vmul.f32 %v3250_v2, %v3250_v2  ;;  %9257 = vmatpush3.msra.mxu0 %v3418_v48 }
0x1fdd   :  { %v3247_v10 = vmul.f32 0.125, %v3241_v5  ;;  %v3248_v33 = vmul.f32 0.125, %v3244_v7  ;;  %v3253_v11 = vmul.f32 %v3249_v3, %v3249_v3  ;;  %v8678_v5 = vld [vmem:[#allocation5 + $0x180] ss:$0 sm:$0xff] }
0x1fde   :  { %v3260_v4 = vsel %vm178_vm4, %v3254_v9, 0.0 }
0x1fdf   :  { %v3251_v39 = vsub.f32 %v3231_v31, %v3247_v10  ;;  %v3252_v35 = vsub.f32 %v3232_v55, %v3248_v33  ;;  %3261 = vadd.xlane.f32.xlu1 %v3260_v4  ;;  %v3257_v12 = vsel %vm178_vm4, %v3253_v11, 0.0 }
0x1fe0   :  { %3258 = vadd.xlane.f32.xlu0 %v3257_v12 }
0x1fe1   :  { %v3255_v40 = vmul.f32 %v3251_v39, %v3251_v39  ;;  %v3256_v62 = vmul.f32 %v3252_v35, %v3252_v35 }
0x1fe3   :  { %v3263_v37 = vsel %vm178_vm4, %v3255_v40, 0.0  ;;  %v3266_v57 = vsel %vm178_vm4, %v3256_v62, 0.0 }
0x1fe4   :  { %3264 = vadd.xlane.f32.xlu0 %v3263_v37  ;;  %3267 = vadd.xlane.f32.xlu1 %v3266_v57 }
0x206c   :  { %v3262_v14 = vpop.xlane.xlu1 %3261 }
0x206d   :  { %v3270_v56 = vmul.f32 0.125, %v3262_v14  ;;  %v3259_v15 = vpop.xlane.xlu0 %3258 }
0x206e   :  { %v3269_v16 = vmul.f32 0.125, %v3259_v15 }
0x206f   :  { %v3274_v59 = vadd.f32 1e-05, %v3270_v56 }
0x2070   :  { %v3273_v17 = vadd.f32 1e-05, %v3269_v16 }
0x2071   :  { %9768 = vrsqrt.f32 %v3274_v59  ;;  %v3265_v20 = vpop.xlane.xlu0 %3264  ;;  %v3268_v22 = vpop.xlane.xlu1 %3267 }
0x2072   :  { %9770 = vrsqrt.f32 %v3273_v17  ;;  %v3271_v52 = vmul.f32 0.125, %v3265_v20  ;;  %v3272_v45 = vmul.f32 0.125, %v3268_v22 }
0x2074   :  { %v3275_v25 = vadd.f32 1e-05, %v3271_v52  ;;  %v3276_v29 = vadd.f32 1e-05, %v3272_v45 }
0x2076   :  { %9772 = vrsqrt.f32 %v3275_v25 }
0x2077   :  { %9774 = vrsqrt.f32 %v3276_v29 }
0x207b   :  { %v9769_v30 = vpop.eup %9768 }
0x207c   :  { %v9771_v34 = vpop.eup %9770  ;;  %v3282_v61 = vmul.f32 %v9769_v30, %v3250_v2 }
0x207d   :  { %v3281_v19 = vmul.f32 %v9771_v34, %v3249_v3 }
0x207e   :  { %v3291_v36 = vmul.f32 %v8671_v32, %v3282_v61 }
0x207f   :  { %v3290_v38 = vmul.f32 %v8671_v32, %v3281_v19 }
0x2080   :  { %v9773_v24 = vpop.eup %9772  ;;  %v3300_v41 = vadd.f32 %v8672_v21, %v3291_v36 }
0x2081   :  { %v9775_v8 = vpop.eup %9774  ;;  %v3299_v26 = vadd.f32 %v8672_v21, %v3290_v38  ;;  %v3283_v6 = vmul.f32 %v9773_v24, %v3251_v39 }
0x2082   :  { %v3284_v42 = vmul.f32 %v9775_v8, %v3252_v35 }
0x2083   :  { %9250 = vmatprep.mubr.msk.f32.mxu1 %vm178_vm4, %v3299_v26  ;;  %v3292_v43 = vmul.f32 %v8671_v32, %v3283_v6  ;;  %v3595_v6 = vld [vmem:[#allocation6] sm:$0xff] }
0x2084   :  { %9251 = vmatmul.mubr.msk.f32.vlgmr.msra.gmra.mrb[38].mxu1 %vm178_vm4, %v3300_v41  ;;  %v3293_v44 = vmul.f32 %v8671_v32, %v3284_v42  ;;  %v3597_v42 = vld [vmem:[#allocation6 + $0x10] sm:$0xff] }
0x2085   :  { %v3301_v46 = vadd.f32 %v8672_v21, %v3292_v43 }
0x2086   :  { %v3302_v47 = vadd.f32 %v8672_v21, %v3293_v44 }
0x2087   :  { %9253 = vmatprep.mubr.msk.f32.mxu1 %vm178_vm4, %v3301_v46 }
0x2088   :  { %9254 = vmatmul.mubr.msk.f32.gmra.mrb[40].mxu1 %vm178_vm4, %v3302_v47 }
0x2089   :  { %3675 = vmatprep.mubr.f32.mxu1 %v9922_v1 }
0x2157   :  { %v9252_v27 = vpop.f32.mrb[38].mxu1 }
0x2158   :  { %v3393_v49 = vadd.f32 %v9252_v27, %v8673_v23  ;;  %v3387_v50 = vpop.f32.mrb[39].mxu1 }
0x2159   :  { %v3388_v51 = vadd.f32 %v8673_v23, %v3387_v50 }
0x215a   :  { %v3411_v53 = vmul.f32 0.01, %v3393_v49  ;;  %vm3407_vm10 = vcmp.gt.f32.partialorder %v3393_v49, 0.0 }
0x215b   :  { %vm3406_vm11 = vcmp.gt.f32.partialorder %v3388_v51, 0.0  ;;  %v3410_v54 = vmul.f32 0.01, %v3388_v51  ;;  %v9255_v55 = vpop.f32.mrb[40].mxu1 }
0x215c   :  { %v3403_v31 = vadd.f32 %v9255_v55, %v8673_v23  ;;  %v3397_v60 = vpop.f32.mrb[41].mxu1  ;;  %v3415_v63 = vsel %vm3407_vm10, %v3393_v49, %v3411_v53 }
0x215d   :  { %v3398_v28 = vadd.f32 %v8673_v23, %v3397_v60  ;;  %v3414_v58 = vsel %vm3406_vm11, %v3388_v51, %v3410_v54  ;;  %v8683_v60 = vld [vmem:[#allocation5 + $0x188] ss:$0 sm:$0xff] }
0x215e   :  { %v3413_v18 = vmul.f32 0.01, %v3403_v31  ;;  %9258 = vmatprep.mubr.msk.f32.mxu0 %vm178_vm4, %v3414_v58  ;;  %vm3409_vm12 = vcmp.gt.f32.partialorder %v3403_v31, 0.0 }
0x215f   :  { %vm3408_vm13 = vcmp.gt.f32.partialorder %v3398_v28, 0.0  ;;  %v3412_v0 = vmul.f32 0.01, %v3398_v28  ;;  %9259 = vmatmul.mubr.msk.f32.vlgmr.msra.gmra.mrb[44].mxu0 %vm178_vm4, %v3415_v63  ;;  %v8684_v63 = vld [vmem:[#allocation5 + $0x190] ss:$0 sm:$0xff] }
0x2160   :  { %v3417_v3 = vsel %vm3409_vm12, %v3403_v31, %v3413_v18 }
0x2161   :  { %v3416_v2 = vsel %vm3408_vm13, %v3398_v28, %v3412_v0 }
0x2162   :  { %9261 = vmatprep.mubr.msk.f32.mxu0 %vm178_vm4, %v3416_v2 }
0x2163   :  { %9262 = vmatmul.mubr.msk.f32.gmra.mrb[46].mxu0 %vm178_vm4, %v3417_v3 }
0x2164   :  { %3764 = vmatprep.mubr.f32.mxu0 %v9922_v1 }
0x2232   :  { %v9260_v7 = vpop.f32.mrb[44].mxu0 }
0x2233   :  { %v3508_v9 = vadd.f32 %v9260_v7, %v8678_v5  ;;  %v3502_v10 = vpop.f32.mrb[45].mxu0 }
0x2234   :  { %v3503_v33 = vadd.f32 %v8678_v5, %v3502_v10 }
0x2235   :  { %v3522_v11 = vadd.f32 %v3508_v9, %v3300_v41  ;;  %v3598_v41 = vld [vmem:[#allocation6 + $0x18] sm:$0xff] }
0x2236   :  { %v3521_v4 = vadd.f32 %v3503_v33, %v3299_v26  ;;  %v9263_v39 = vpop.f32.mrb[46].mxu0  ;;  %v3596_v26 = vld [vmem:[#allocation6 + $0x8] sm:$0xff]  ;;  %3700 = vmatprep.subr.mxu0 %v3598_v41  ;;  %v3799_v41 = vld [vmem:[#allocation6 + $0x70] sm:$0xff] }
0x2237   :  { %v3518_v35 = vadd.f32 %v9263_v39, %v8678_v5  ;;  %v3512_v12 = vpop.f32.mrb[47].mxu0  ;;  %v3528_v40 = vsel %vm178_vm4, %v3522_v11, 0.0  ;;  %3611 = vmatprep.subr.mxu1 %v3596_v26  ;;  %3701 = vmatpush1.msra.mxu0 %v3597_v42 }
0x2238   :  { %v3513_v62 = vadd.f32 %v8678_v5, %v3512_v12  ;;  %3529 = vadd.xlane.f32.xlu1 %v3528_v40  ;;  %v3525_v37 = vsel %vm178_vm4, %v3521_v4, 0.0  ;;  %3612 = vmatpush1.msra.mxu1 %v3595_v6  ;;  %v3789_v40 = vld [vmem:[#allocation6 + $0x20] sm:$0xff] }
0x2239   :  { %v3524_v57 = vadd.f32 %v3518_v35, %v3302_v47  ;;  %3526 = vadd.xlane.f32.xlu0 %v3525_v37  ;;  %v3797_v6 = vld [vmem:[#allocation6 + $0x60] sm:$0xff] }
0x223a   :  { %v3523_v13 = vadd.f32 %v3513_v62, %v3301_v46  ;;  %v3791_v62 = vld [vmem:[#allocation6 + $0x30] sm:$0xff] }
0x223b   :  { %v3534_v14 = vsel %vm178_vm4, %v3524_v57, 0.0 }
0x223c   :  { %3535 = vadd.xlane.f32.xlu1 %v3534_v14  ;;  %v3531_v56 = vsel %vm178_vm4, %v3523_v13, 0.0  ;;  %v3793_v14 = vld [vmem:[#allocation6 + $0x40] sm:$0xff] }
0x223d   :  { %3532 = vadd.xlane.f32.xlu0 %v3531_v56  ;;  %v3795_v56 = vld [vmem:[#allocation6 + $0x50] sm:$0xff] }
0x22c5   :  { %v3530_v15 = vpop.xlane.xlu1 %3529 }
0x22c6   :  { %v3538_v16 = vmul.f32 0.125, %v3530_v15  ;;  %v3527_v59 = vpop.xlane.xlu0 %3526  ;;  %v3792_v15 = vld [vmem:[#allocation6 + $0x38] sm:$0xff] }
0x22c7   :  { %v3537_v17 = vmul.f32 0.125, %v3527_v59  ;;  %v3796_v59 = vld [vmem:[#allocation6 + $0x58] sm:$0xff] }
0x22c8   :  { %v3542_v20 = vsub.f32 %v3522_v11, %v3538_v16  ;;  %v3794_v16 = vld [vmem:[#allocation6 + $0x48] sm:$0xff] }
0x22c9   :  { %v3541_v22 = vsub.f32 %v3521_v4, %v3537_v17  ;;  %v3536_v52 = vpop.xlane.xlu1 %3535 }
0x22ca   :  { %v3540_v45 = vmul.f32 0.125, %v3536_v52  ;;  %v3533_v25 = vpop.xlane.xlu0 %3532  ;;  %v3546_v29 = vmul.f32 %v3542_v20, %v3542_v20 }
0x22cb   :  { %v3539_v30 = vmul.f32 0.125, %v3533_v25  ;;  %v3545_v32 = vmul.f32 %v3541_v22, %v3541_v22 }
0x22cc   :  { %v3544_v34 = vsub.f32 %v3524_v57, %v3540_v45  ;;  %v3552_v61 = vsel %vm178_vm4, %v3546_v29, 0.0 }
0x22cd   :  { %v3543_v19 = vsub.f32 %v3523_v13, %v3539_v30  ;;  %3553 = vadd.xlane.f32.xlu1 %v3552_v61  ;;  %v3549_v36 = vsel %vm178_vm4, %v3545_v32, 0.0  ;;  %v3790_v13 = vld [vmem:[#allocation6 + $0x28] sm:$0xff] }
0x22ce   :  { %3550 = vadd.xlane.f32.xlu0 %v3549_v36  ;;  %v3548_v21 = vmul.f32 %v3544_v34, %v3544_v34 }
0x22cf   :  { %v3547_v38 = vmul.f32 %v3543_v19, %v3543_v19 }
0x22d0   :  { %v3558_v24 = vsel %vm178_vm4, %v3548_v21, 0.0 }
0x22d1   :  { %3559 = vadd.xlane.f32.xlu1 %v3558_v24  ;;  %v3555_v8 = vsel %vm178_vm4, %v3547_v38, 0.0 }
0x22d2   :  { %3556 = vadd.xlane.f32.xlu0 %v3555_v8 }
0x235a   :  { %v3554_v43 = vpop.xlane.xlu1 %3553 }
0x235b   :  { %v3562_v44 = vmul.f32 0.125, %v3554_v43  ;;  %v3551_v46 = vpop.xlane.xlu0 %3550 }
0x235c   :  { %v3561_v47 = vmul.f32 0.125, %v3551_v46  ;;  %v3801_v46 = vld [vmem:[#allocation6 + $0x80] sm:$0xff] }
0x235d   :  { %v3566_v48 = vadd.f32 1e-05, %v3562_v44  ;;  %v3798_v44 = vld [vmem:[#allocation6 + $0x68] sm:$0xff] }
0x235e   :  { %v3565_v23 = vadd.f32 1e-05, %v3561_v47  ;;  %v3560_v27 = vpop.xlane.xlu1 %3559  ;;  %v3803_v47 = vld [vmem:[#allocation6 + $0x90] sm:$0xff] }
0x235f   :  { %9776 = vrsqrt.f32 %v3566_v48  ;;  %v3564_v49 = vmul.f32 0.125, %v3560_v27  ;;  %v3557_v50 = vpop.xlane.xlu0 %3556  ;;  %v3800_v48 = vld [vmem:[#allocation6 + $0x78] sm:$0xff] }
0x2360   :  { %9778 = vrsqrt.f32 %v3565_v23  ;;  %v3563_v51 = vmul.f32 0.125, %v3557_v50  ;;  %v3802_v23 = vld [vmem:[#allocation6 + $0x88] sm:$0xff]  ;;  %v3804_v27 = vld [vmem:[#allocation6 + $0x98] sm:$0xff] }
0x2361   :  { %v3568_v53 = vadd.f32 1e-05, %v3564_v49 }
0x2362   :  { %v3567_v54 = vadd.f32 1e-05, %v3563_v51 }
0x2364   :  { %9780 = vrsqrt.f32 %v3567_v54 }
0x2365   :  { %9782 = vrsqrt.f32 %v3568_v53 }
0x2369   :  { %v9777_v55 = vpop.eup %9776 }
0x236a   :  { %v9779_v31 = vpop.eup %9778  ;;  %v3574_v58 = vmul.f32 %v9777_v55, %v3542_v20 }
0x236b   :  { %v3573_v28 = vmul.f32 %v9779_v31, %v3541_v22 }
0x236c   :  { %v3583_v3 = vmul.f32 %v8683_v60, %v3574_v58  ;;  %v3972_v58 = vld [vmem:[#allocation6 + $0xc8] sm:$0xff] }
0x236d   :  { %v3582_v18 = vmul.f32 %v8683_v60, %v3573_v28  ;;  %v3968_v28 = vld [vmem:[#allocation6 + $0xa8] sm:$0xff] }
0x236e   :  { %v9781_v0 = vpop.eup %9780  ;;  %v3592_v9 = vadd.f32 %v8684_v63, %v3583_v3 }
0x236f   :  { %v3591_v2 = vadd.f32 %v8684_v63, %v3582_v18  ;;  %v3575_v5 = vmul.f32 %v9781_v0, %v3543_v19  ;;  %v9783_v7 = vpop.eup %9782 }
0x2370   :  { %v3576_v33 = vmul.f32 %v9783_v7, %v3544_v34 }
0x2371   :  { %8685 = vmatmul.mubr.msk.f32.vlgmr.msra.gmra.mrb[42].mxu1 %vm178_vm4, %v3591_v2  ;;  %8689 = vmatmul.mubr.msk.f32.vlgmr.msra.gmra.mrb[48].mxu0 %vm178_vm4, %v3591_v2  ;;  %v3584_v10 = vmul.f32 %v8683_v60, %v3575_v5 }
0x2372   :  { %3681 = vmatprep.mubr.f32.mxu1 %v9922_v1  ;;  %3770 = vmatprep.mubr.f32.mxu0 %v9922_v1  ;;  %v3585_v4 = vmul.f32 %v8683_v60, %v3576_v33  ;;  %v3821_v33 = vld [vmem:[#allocation5 + $0x198] sm:$0x3] }
0x2373   :  { %v3593_v11 = vadd.f32 %v8684_v63, %v3584_v10  ;;  %v9582_v10 = vpack.c.bf16 %v3972_v58, %v3968_v28  ;;  %v8708_v28 = vld [vmem:[%s10005_s6 + $0x16] ss:$0 sm:$0xff] }
0x2374   :  { %v3594_v39 = vadd.f32 %v8684_v63, %v3585_v4  ;;  %v3971_v4 = vld [vmem:[#allocation6 + $0xc0] sm:$0xff]  ;;  %v8709_v58 = vld [vmem:[%s10010_s9 + $0x16] ss:$0 sm:$0xff] }
0x2375   :  { %8686 = vmatmul.mubr.msk.f32.gmra.mrb[44].mxu1 %vm178_vm4, %v3592_v9  ;;  %8690 = vmatmul.mubr.msk.f32.gmra.mrb[50].mxu0 %vm178_vm4, %v3592_v9 }
0x2376   :  { %3687 = vmatprep.mubr.f32.mxu1 %v9922_v1  ;;  %3776 = vmatprep.mubr.f32.mxu0 %v9922_v1 }
0x2379   :  { %8687 = vmatmul.mubr.msk.f32.gmra.mrb[46].mxu1 %vm178_vm4, %v3593_v11  ;;  %8691 = vmatmul.mubr.msk.f32.gmra.mrb[52].mxu0 %vm178_vm4, %v3593_v11  ;;  %v3967_v11 = vld [vmem:[#allocation6 + $0xa0] sm:$0xff] }
0x237a   :  { %3693 = vmatprep.mubr.f32.mxu1 %v9922_v1  ;;  %3782 = vmatprep.mubr.f32.mxu0 %v9922_v1 }
0x237d   :  { %8688 = vmatmul.mubr.msk.f32.gmra.mrb[48].mxu1 %vm178_vm4, %v3594_v39  ;;  %8692 = vmatmul.mubr.msk.f32.gmra.mrb[54].mxu0 %vm178_vm4, %v3594_v39  ;;  %v3976_v39 = vld [vmem:[#allocation6 + $0xe8] sm:$0xff] }
0x237e   :  { %3889 = vmatprep.mubr.f32.mxu1 %v9922_v1  ;;  %3960 = vmatprep.mubr.f32.mxu0 %v9922_v1 }
0x2444   :  { %v3677_v35 = vpop.f32.mrb[42].mxu1  ;;  %v3766_v12 = vpop.f32.mrb[48].mxu0 }
0x2445   :  { %v3679_v37 = vpop.f32.mrb[43].mxu1  ;;  %v3768_v57 = vpop.f32.mrb[49].mxu0  ;;  %v3805_v22 = vmul.f32 %v3789_v40, %v3677_v35  ;;  %v3807_v52 = vmul.f32 %v3791_v62, %v3766_v12  ;;  %v3980_v35 = vld [vmem:[#allocation6 + $0x108] sm:$0xff]  ;;  %v9584_v12 = vpack.c.bf16 %v3971_v4, %v3967_v11  ;;  %v3975_v62 = vld [vmem:[#allocation6 + $0xe0] sm:$0xff] }
0x2446   :  { %v3806_v32 = vmul.f32 %v3790_v13, %v3679_v37  ;;  %v3808_v34 = vmul.f32 %v3792_v15, %v3768_v57  ;;  %v9586_v40 = vpack.c.bf16 %v3980_v35, %v3976_v39  ;;  %v3979_v37 = vld [vmem:[#allocation6 + $0x100] sm:$0xff]  ;;  %v3970_v13 = vld [vmem:[#allocation6 + $0xb8] sm:$0xff]  ;;  %v4131_v15 = vld [vmem:[#allocation5 + $0x1a8] sm:$0xff] }
0x2447   :  { %v9588_v57 = vpack.c.bf16 %v3979_v37, %v3975_v62  ;;  %v4431_v11 = vld [vmem:[#allocation5 + $0x220] sm:$0xf]  ;;  %v4433_v39 = vld [vmem:[#allocation5 + $0x228] sm:$0xff]  ;;  %v8711_v62 = vld [vmem:[#allocation5 + $0x230] ss:$0 sm:$0xff] }
0x2448   :  { %v3683_v17 = vpop.f32.mrb[44].mxu1  ;;  %v3772_v20 = vpop.f32.mrb[50].mxu0 }
0x2449   :  { %v3809_v45 = vmul.f32 %v3793_v14, %v3683_v17  ;;  %v3811_v25 = vmul.f32 %v3795_v56, %v3772_v20  ;;  %v3685_v29 = vpop.f32.mrb[45].mxu1  ;;  %v3774_v30 = vpop.f32.mrb[51].mxu0  ;;  %v3974_v14 = vld [vmem:[#allocation6 + $0xd8] sm:$0xff]  ;;  %v3969_v20 = vld [vmem:[#allocation6 + $0xb0] sm:$0xff] }
0x244a   :  { %v3810_v61 = vmul.f32 %v3794_v16, %v3685_v29  ;;  %v3812_v19 = vmul.f32 %v3796_v59, %v3774_v30  ;;  %v9590_v56 = vpack.c.bf16 %v3974_v14, %v3970_v13  ;;  %v4132_v16 = vld [vmem:[#allocation5 + $0x1b0] sm:$0xff]  ;;  %v9931_v59 = vmov 0.0|0.0  }
0x244b   :  { %v9568_v36 = vpack.c.bf16 %v3809_v45, %v3805_v22  ;;  %v9576_v21 = vpack.c.bf16 %v3811_v25, %v3807_v52  ;;  %v9599_v17 = vpack.c.bf16 %v4132_v16, %v4131_v15  ;;  %v3973_v22 = vld [vmem:[#allocation6 + $0xd0] sm:$0xff]  ;;  %v3978_v52 = vld [vmem:[#allocation6 + $0xf8] sm:$0xff] }
0x244c   :  { %v9566_v38 = vpack.c.bf16 %v3810_v61, %v3806_v32  ;;  %v9574_v24 = vpack.c.bf16 %v3812_v19, %v3808_v34  ;;  %v3689_v8 = vpop.f32.mrb[46].mxu1  ;;  %v3778_v26 = vpop.f32.mrb[52].mxu0  ;;  %v3982_v45 = vld [vmem:[#allocation6 + $0x118] sm:$0xff]  ;;  %v9592_v29 = vpack.c.bf16 %v3973_v22, %v3969_v20  ;;  %v3977_v19 = vld [vmem:[#allocation6 + $0xf0] sm:$0xff] }
0x244d   :  { %v3691_v42 = vpop.f32.mrb[47].mxu1  ;;  %v3780_v43 = vpop.f32.mrb[53].mxu0  ;;  %v3813_v51 = vmul.f32 %v3797_v6, %v3689_v8  ;;  %v3815_v53 = vmul.f32 %v3799_v41, %v3778_v26  ;;  %v9594_v34 = vpack.c.bf16 %v3982_v45, %v3978_v52  ;;  %v8695_v26 = vld [vmem:[#allocation5 + $0x1a0] ss:$0 sm:$0xff]  ;;  %v4216_v41 = vld [vmem:[#allocation5 + $0x1d0] sm:$0xff] }
0x244e   :  { %9567 = vmatprep.subr.bf16.mxu1 %v9566_v38  ;;  %9575 = vmatprep.subr.bf16.mxu0 %v9574_v24  ;;  %v3814_v63 = vmul.f32 %v3798_v44, %v3691_v42  ;;  %v3816_v18 = vmul.f32 %v3800_v48, %v3780_v43  ;;  %v4133_v38 = vld [vmem:[#allocation5 + $0x1b8] sm:$0xff]  ;;  %v4134_v24 = vld [vmem:[#allocation5 + $0x1c0] sm:$0xff] }
0x244f   :  { %9569 = vmatpush1.bf16.msra.mxu1 %v9568_v36  ;;  %9577 = vmatpush1.bf16.msra.mxu0 %v9576_v21  ;;  %v3981_v36 = vld [vmem:[#allocation6 + $0x110] sm:$0xff]  ;;  %v9602_v8 = vpack.c.bf16 %v4134_v24, %v4133_v38  ;;  %v4217_v42 = vld [vmem:[#allocation5 + $0x1d8] sm:$0xff] }
0x2450   :  { %v3695_v49 = vpop.f32.mrb[48].mxu1  ;;  %v3784_v50 = vpop.f32.mrb[54].mxu0  ;;  %v9596_v21 = vpack.c.bf16 %v3981_v36, %v3977_v19 }
0x2451   :  { %v3817_v54 = vmul.f32 %v3801_v46, %v3695_v49  ;;  %v3819_v55 = vmul.f32 %v3803_v47, %v3784_v50  ;;  %v3697_v31 = vpop.f32.mrb[49].mxu1  ;;  %v3786_v60 = vpop.f32.mrb[55].mxu0  ;;  %v9605_v47 = vpack.c.bf16 %v4217_v42, %v4216_v41  ;;  %v8696_v50 = vld [vmem:[#allocation5 + $0x1c8] ss:$0 sm:$0xff] }
0x2452   :  { %v3818_v0 = vmul.f32 %v3802_v23, %v3697_v31  ;;  %v3820_v2 = vmul.f32 %v3804_v27, %v3786_v60  ;;  %v4218_v23 = vld [vmem:[#allocation5 + $0x1e0] sm:$0xff]  ;;  %v4219_v27 = vld [vmem:[#allocation5 + $0x1e8] sm:$0xff]  ;;  %v8704_v60 = vld [vmem:[%s9999_s1 + $0x16] sm:$0x1] }
0x2453   :  { %v9572_v3 = vpack.c.bf16 %v3817_v54, %v3813_v51  ;;  %v9580_v5 = vpack.c.bf16 %v3819_v55, %v3815_v53  ;;  %v9608_v49 = vpack.c.bf16 %v4219_v27, %v4218_v23 }
0x2454   :  { %v9570_v7 = vpack.c.bf16 %v3818_v0, %v3814_v63  ;;  %v9578_v9 = vpack.c.bf16 %v3820_v2, %v3816_v18  ;;  %v8710_v63 = vld [vmem:[%s10017_s12 + $0x16] ss:$0 sm:$0xff]  ;;  %v4428_v18 = vsel %vm164_vm1, %v8704_v60, %v8708_v28 }
0x2455   :  { %v4429_v0 = vsel %vm166_vm2, %v4428_v18, %v8709_v58 }
0x2456   :  { %9571 = vmatprep.subr.bf16.mxu1 %v9570_v7  ;;  %9579 = vmatprep.subr.bf16.mxu0 %v9578_v9  ;;  %v4430_v2 = vsel %vm168_vm3, %v4429_v0, %v8710_v63 }
0x2457   :  { %9573 = vmatpush1.bf16.msra.mxu1 %v9572_v3  ;;  %9581 = vmatpush1.bf16.msra.mxu0 %v9580_v5  ;;  %v8698_v3 = vld [vmem:[#allocation5 + $0x1f0] ss:$0 sm:$0xff]  ;;  %v10480_v35 = vadd.f32 %v4431_v11, %v4430_v2  ;;  %v8723_v11 = vld [vmem:[#allocation5 + $0x248] ss:$0 sm:$0xff] }
0x2458   :  { %9583 = vmatprep.subr.bf16.mxu1 %v9582_v10  ;;  %9598 = vmatprep.subr.bf16.mxu0 %v9931_v59 }
0x245a   :  { %8693 = vmatmul.mubr.msk.f32.vlgmr.msra.gmra.mrb[50].mxu1 %vm1808_vm9, %v3821_v33  ;;  %8694 = vmatmul.mubr.msk.f32.vlgmr.msra.gmra.mrb[56].mxu0 %vm1808_vm9, %v3821_v33  ;;  %v4301_v33 = vld [vmem:[#allocation5 + $0x1f8] sm:$0xff] }
0x245b   :  { %9272 = vmatprep.mubr.msk.f32.mxu0 %vm9923_vm0, %v9922_v1  ;;  %9600 = vmatpush3.bf16.msra.mxu0 %v9599_v17 }
0x245c   :  { %9601 = vmatprep.subr.bf16.mxu0 %v9931_v59 }
0x245f   :  { %9603 = vmatpush3.bf16.msra.mxu0 %v9602_v8 }
0x2460   :  { %9585 = vmatpush1.bf16.xpose.msra.mxu1 %v9584_v12  ;;  %9604 = vmatprep.subr.bf16.mxu0 %v9931_v59 }
0x2461   :  { %9587 = vmatprep.subr.bf16.mxu1 %v9586_v40 }
0x2468   :  { %9589 = vmatpush1.bf16.xpose.msra.mxu1 %v9588_v57 }
0x2469   :  { %9591 = vmatprep.subr.bf16.mxu1 %v9590_v56 }
0x252d   :  { %v3891_v25 = vpop.f32.mrb[50].mxu1  ;;  %v3962_v30 = vpop.f32.mrb[56].mxu0 }
0x252e   :  { %v3893_v32 = vpop.f32.mrb[51].mxu1  ;;  %v3964_v61 = vpop.f32.mrb[57].mxu0 }
0x252f   :  { %4052 = vmatprep.mubr.f32.mxu1 %v3893_v32 }
0x2530   :  { %4053 = vmatmul.mubr.f32.vlgmr.msra.gmra.mrb[52].mxu1 %v3891_v25 }
0x2531   :  { %9593 = vmatpush1.bf16.xpose.msra.mxu1 %v9592_v29  ;;  %4122 = vmatprep.mubr.f32.mxu1 %v3964_v61 }
0x2532   :  { %9595 = vmatprep.subr.bf16.mxu1 %v9594_v34 }
0x2539   :  { %9597 = vmatpush1.bf16.xpose.msra.mxu1 %v9596_v21 }
0x253a   :  { %9301 = vmatprep.subr.mxu1 %v9922_v1 }
0x2540   :  { %4123 = vmatmul.mubr.f32.vlgmr.msra.gmra.mrb[52].mxu1 %v3962_v30 }
0x2541   :  { %9303 = vmatprep.mubr.msk.f32.mxu1 %vm9923_vm0, %v9922_v1 }
0x2613   :  { %v4124_v6 = vpop.f32.mrb[52].mxu1 }
0x2614   :  { %v9610_v43 = vadd.f32 %v8695_v26, %v4124_v6  ;;  %v4126_v44 = vpop.f32.mrb[53].mxu1 }
0x2616   :  { %vm4128_vm14 = vcmp.gt.f32.partialorder %v9610_v43, 0.0  ;;  %v4129_v46 = vmul.f32 0.01, %v9610_v43 }
0x2618   :  { %v4130_v48 = vsel %vm4128_vm14, %v9610_v43, %v4129_v46 }
0x2619   :  { %9273 = vmatmul.mubr.msk.f32.vlgmr.msra.gmra.mrb[58].mxu0 %vm1808_vm9, %v4130_v48  ;;  %v4848_v48 = vld [vmem:[#allocation5 + $0x238] sm:$0xff] }
0x261a   :  { %9606 = vmatpush3.bf16.msra.mxu0 %v9605_v47  ;;  %9283 = vmatprep.mubr.msk.f32.mxu0 %vm9923_vm0, %v9922_v1 }
0x261b   :  { %9607 = vmatprep.subr.bf16.mxu0 %v9931_v59  ;;  %v10504_v59 = vld [vmem:[#allocation5 + $0x440] sm:$0xf] }
0x261e   :  { %9609 = vmatpush3.bf16.msra.mxu0 %v9608_v49 }
0x261f   :  { %9286 = vmatprep.subr.mxu0 %v9922_v1 }
0x26ec   :  { %v4209_v51 = vpop.f32.mrb[58].mxu0 }
0x26ed   :  { %v4210_v53 = vadd.f32 %v8696_v50, %v4209_v51  ;;  %v9274_v54 = vpop.f32.mrb[59].mxu0 }
0x26ee   :  { %v8721_v54 = vld [vmem:[#allocation5 + $0x240] ss:$0 sm:$0xff] }
0x26ef   :  { %vm4213_vm15 = vcmp.gt.f32.partialorder %v4210_v53, 0.0  ;;  %v4214_v55 = vmul.f32 0.01, %v4210_v53 }
0x26f1   :  { %v4215_v31 = vsel %vm4213_vm15, %v4210_v53, %v4214_v55 }
0x26f2   :  { %9284 = vmatmul.mubr.msk.f32.vlgmr.msra.gmra.mrb[60].mxu0 %vm1808_vm9, %v4215_v31  ;;  %vm4302_vm9 = vcmask 15360  }
0x26f3   :  { %9288 = vmatprep.mubr.msk.f32.mxu0 %vm9923_vm0, %v9922_v1 }
0x27c5   :  { %v4294_v5 = vpop.f32.mrb[60].mxu0 }
0x27c6   :  { %v4295_v7 = vadd.f32 %v8698_v3, %v4294_v5  ;;  %v9285_v9 = vpop.f32.mrb[61].mxu0  ;;  %v4953_v5 = vld [vmem:[#allocation5 + $0x258] sm:$0xff] }
0x27c8   :  { %vm4298_vm10 = vcmp.gt.f32.partialorder %v4295_v7, 0.0  ;;  %v4299_v10 = vmul.f32 0.01, %v4295_v7 }
0x27ca   :  { %v4300_v4 = vsel %vm4298_vm10, %v4295_v7, %v4299_v10 }
0x27cb   :  { %9287 = vmatpush3.msk.msra.mxu0 %vm166_vm2, %v4300_v4 }
0x27cc   :  { %9289 = vmatmul.mubr.msk.f32.vlgmr.msra.gmra.mrb[62].mxu0 %vm4302_vm9, %v4301_v33  ;;  %9291 = vmatprep.subr.mxu0 %v9922_v1 }
0x27cd   :  { %9292 = vmatpush3.msra.mxu0 %v4433_v39  ;;  %9293 = vmatprep.mubr.msk.f32.mxu0 %vm9923_vm0, %v9922_v1  ;;  %v8724_v39 = vld [vmem:[#allocation5 + $0x250] ss:$0 sm:$0xff] }
0x27ce   :  { %9296 = vmatprep.subr.mxu0 %v9922_v1 }
0x27d0   :  { %9294 = vmatmul.mubr.msk.f32.vlgmr.msra.gmra.mrb[64].mxu0 %vm178_vm4, %v10480_v35 }
0x27d1   :  { %9298 = vmatprep.mubr.msk.f32.mxu0 %vm9923_vm0, %v9922_v1 }
0x289f   :  { %v10489_v12 = vpop.f32.mrb[62].mxu0 }
0x28a0   :  { %v9290_v40 = vpop.f32.mrb[63].mxu0 }
0x28a3   :  { %v4508_v37 = vpop.f32.mrb[64].mxu0 }
0x28a4   :  { %v4509_v57 = vadd.f32 %v8711_v62, %v4508_v37  ;;  %v9295_v13 = vpop.f32.mrb[65].mxu0  ;;  %v5035_v62 = vld [vmem:[#allocation5 + $0x268] sm:$0xff]  ;;  %v8725_v37 = vld [vmem:[#allocation5 + $0x260] ss:$0 sm:$0xff] }
0x28a6   :  { %4679 = vrot.lane.b32.xlu1 %v4509_v57, %s9926_s14  ;;  %4513 = vrot.lane.b32.xlu0 %v4509_v57, %s9925_s13 }
0x28aa   :  { %4677 = vrot.lane.b32.xlu1 %v4509_v57, %s9924_s4 }
0x2918   :  { %v4514_v14 = vpop.permute.xlu0 %4513  ;;  %v4680_v56 = vpop.permute.xlu1 %4679 }
0x2919   :  { %9297 = vmatpush3.xpose.msk.msra.mxu0 %vm255_vm5, %v4514_v14 }
0x291a   :  { %9306 = vmatprep.subr.mxu0 %v9922_v1 }
0x291c   :  { %9299 = vmatmul.mubr.msk.f32.vlgmr.msra.gmra.mrb[66].mxu0 %vm255_vm5, %v4509_v57  ;;  %v4678_v15 = vpop.permute.xlu1 %4677 }
0x291d   :  { %9307 = vmatpush3.xpose.msk.msra.mxu0 %vm255_vm5, %v4680_v56  ;;  %9308 = vmatprep.mubr.msk.f32.mxu0 %vm9923_vm0, %v9922_v1 }
0x291e   :  { %9316 = vmatprep.subr.mxu0 %v9922_v1 }
0x2920   :  { %9309 = vmatmul.mubr.msk.f32.vlgmr.msra.gmra.mrb[68].mxu0 %vm255_vm5, %v4678_v15 }
0x2921   :  { %9318 = vmatprep.mubr.msk.f32.mxu0 %vm9923_vm0, %v9922_v1  ;;  %9317 = vmatpush3.msra.mxu0 %v4848_v48 }
0x2922   :  { %9326 = vmatprep.subr.mxu0 %v9922_v1 }
0x29ef   :  { %v4585_v16 = vpop.f32.mrb[66].mxu0 }
0x29f0   :  { %v4586_v17 = vadd.f32 %v10504_v59, %v4585_v16  ;;  %v9300_v20 = vpop.f32.mrb[67].mxu0  ;;  %v8727_v16 = vld [vmem:[#allocation5 + $0x270] ss:$0 sm:$0xff] }
0x29f2   :  { %v4589_v22 = vsel %vm330_vm6, %v4586_v17, -inf }
0x29f3   :  { %4590 = vmax.xlane.f32.xlu0 %v4589_v22  ;;  %v4751_v52 = vpop.f32.mrb[68].mxu0 }
0x29f4   :  { %v4752_v45 = vadd.f32 %v10504_v59, %v4751_v52  ;;  %v9310_v25 = vpop.f32.mrb[69].mxu0 }
0x29f6   :  { %v4755_v29 = vsel %vm330_vm6, %v4752_v45, -inf }
0x29f7   :  { %4756 = vmax.xlane.f32.xlu1 %v4755_v29 }
0x2a08   :  { %4600 = vrot.lane.b32.xlu1 %v4509_v57, %s9928_s16 }
0x2a80   :  { %v4591_v30 = vpop.xlane.xlu0 %4590 }
0x2a81   :  { %v4592_v32 = vsub.f32 %v4586_v17, %v4591_v30 }
0x2a83   :  { %v4593_v34 = vmul.f32 1.442695, %v4592_v32 }
0x2a84   :  { %v4757_v61 = vpop.xlane.xlu1 %4756 }
0x2a85   :  { %9784 = vpow2.f32 %v4593_v34  ;;  %v4758_v19 = vsub.f32 %v4752_v45, %v4757_v61  ;;  %v5140_v61 = vld [vmem:[#allocation5 + $0x288] sm:$0xff] }
0x2a87   :  { %v4759_v36 = vmul.f32 1.442695, %v4758_v19 }
0x2a88   :  { %v4601_v21 = vpop.permute.xlu1 %4600 }
0x2a89   :  { %9786 = vpow2.f32 %v4759_v36  ;;  %9302 = vmatpush3.msk.msra.mxu1 %vm347_vm7, %v4601_v21 }
0x2a8a   :  { %9311 = vmatprep.subr.mxu1 %v9922_v1 }
0x2a8f   :  { %v9785_v38 = vpop.eup %9784 }
0x2a90   :  { %v4595_v24 = vsel %vm330_vm6, %v9785_v38, 0.0 }
0x2a91   :  { %4596 = vadd.xlane.f32.xlu0 %v4595_v24  ;;  %v8729_v24 = vld [vmem:[#allocation5 + $0x278] ss:$0 sm:$0xff] }
0x2a93   :  { %v9787_v8 = vpop.eup %9786 }
0x2a94   :  { %v4761_v26 = vsel %vm330_vm6, %v9787_v8, 0.0 }
0x2a95   :  { %4762 = vadd.xlane.f32.xlu0 %v4761_v26  ;;  %v8730_v26 = vld [vmem:[#allocation5 + $0x280] ss:$0 sm:$0xff] }
0x2aab   :  { %4766 = vrot.lane.b32.xlu0 %v4509_v57, %s9927_s15 }
0x2b1e   :  { %v4597_v6 = vpop.xlane.xlu0 %4596 }
0x2b1f   :  { %9788 = vrcp.f32 %v4597_v6 }
0x2b22   :  { %v4763_v41 = vpop.xlane.xlu0 %4762 }
0x2b23   :  { %9790 = vrcp.f32 %v4763_v41 }
0x2b26   :  { %v4767_v44 = vpop.permute.xlu0 %4766 }
0x2b29   :  { %v9789_v42 = vpop.eup %9788 }
0x2b2a   :  { %v4599_v43 = vmul.f32 %v9789_v42, %v9785_v38  ;;  %v8731_v42 = vld [vmem:[#allocation5 + $0x290] ss:$0 sm:$0xff] }
0x2b2c   :  { %9304 = vmatmul.mubr.msk.f32.vlgmr.msra.gmra.mrb[54].mxu1 %vm255_vm5, %v4599_v43 }
0x2b2d   :  { %v9791_v46 = vpop.eup %9790  ;;  %9312 = vmatpush3.msk.msra.mxu1 %vm347_vm7, %v4767_v44  ;;  %9313 = vmatprep.mubr.msk.f32.mxu1 %vm9923_vm0, %v9922_v1 }
0x2b2e   :  { %v4765_v47 = vmul.f32 %v9791_v46, %v9787_v8  ;;  %9321 = vmatprep.subr.mxu1 %v9922_v1 }
0x2b30   :  { %9314 = vmatmul.mubr.msk.f32.vlgmr.msra.gmra.mrb[56].mxu1 %vm255_vm5, %v4765_v47 }
0x2b31   :  { %9323 = vmatprep.mubr.msk.f32.mxu1 %vm9923_vm0, %v9922_v1  ;;  %9322 = vmatpush3.msra.mxu1 %v4953_v5 }
0x2b32   :  { %9331 = vmatprep.subr.mxu1 %v9922_v1 }
0x2bff   :  { %v4673_v23 = vpop.f32.mrb[54].mxu1 }
0x2c00   :  { %v9305_v27 = vpop.f32.mrb[55].mxu1 }
0x2c03   :  { %v4839_v49 = vpop.f32.mrb[56].mxu1 }
0x2c04   :  { %4844 = vrot.lane.b32.xlu1 %v4839_v49, %s9929_s17  ;;  %v9315_v50 = vpop.f32.mrb[57].mxu1 }
0x2c76   :  { %v4845_v51 = vpop.permute.xlu1 %4844 }
0x2c77   :  { %v4847_v53 = vsel %vm255_vm5, %v4673_v23, %v4845_v51 }
0x2c78   :  { %9319 = vmatmul.mubr.msk.f32.vlgmr.msra.gmra.mrb[70].mxu0 %vm178_vm4, %v4847_v53 }
0x2c79   :  { %9328 = vmatprep.mubr.msk.f32.mxu0 %vm9923_vm0, %v9922_v1  ;;  %9327 = vmatpush3.msra.mxu0 %v5035_v62 }
0x2c7a   :  { %9336 = vmatprep.subr.mxu0 %v9922_v1 }
0x2d4b   :  { %v4923_v55 = vpop.f32.mrb[70].mxu0 }
0x2d4c   :  { %v4924_v31 = vadd.f32 %v8721_v54, %v4923_v55  ;;  %v9320_v60 = vpop.f32.mrb[71].mxu0 }
0x2d4e   :  { %v4927_v28 = vadd.f32 %v4924_v31, %v10480_v35 }
0x2d50   :  { %v4928_v58 = vsel %vm671_vm8, %v4927_v28, 0.0 }
0x2d51   :  { %4929 = vadd.xlane.f32.xlu1 %v4928_v58 }
0x2dde   :  { %v4930_v63 = vpop.xlane.xlu1 %4929 }
0x2ddf   :  { %v4931_v18 = vmul.f32 0.125, %v4930_v63 }
0x2de1   :  { %v4932_v0 = vsub.f32 %v4927_v28, %v4931_v18 }
0x2de3   :  { %v4933_v2 = vmul.f32 %v4932_v0, %v4932_v0 }
0x2de5   :  { %v4934_v3 = vsel %vm671_vm8, %v4933_v2, 0.0 }
0x2de6   :  { %4935 = vadd.xlane.f32.xlu0 %v4934_v3 }
0x2e73   :  { %v4936_v7 = vpop.xlane.xlu0 %4935 }
0x2e74   :  { %v4937_v9 = vmul.f32 0.125, %v4936_v7 }
0x2e76   :  { %v4938_v10 = vadd.f32 1e-05, %v4937_v9 }
0x2e78   :  { %9792 = vrsqrt.f32 %v4938_v10 }
0x2e82   :  { %v9793_v33 = vpop.eup %9792 }
0x2e83   :  { %v4940_v4 = vmul.f32 %v9793_v33, %v4932_v0 }
0x2e85   :  { %v4946_v35 = vmul.f32 %v8723_v11, %v4940_v4 }
0x2e87   :  { %v4952_v40 = vadd.f32 %v8724_v39, %v4946_v35 }
0x2e89   :  { %9324 = vmatmul.mubr.msk.f32.vlgmr.msra.gmra.mrb[58].mxu1 %vm178_vm4, %v4952_v40 }
0x2e8a   :  { %9333 = vmatprep.mubr.msk.f32.mxu1 %vm9923_vm0, %v9922_v1  ;;  %9332 = vmatpush3.msra.mxu1 %v5140_v61 }
0x2e8b   :  { %9341 = vmatprep.subr.mxu1 %v9922_v1 }
0x2f5c   :  { %v5028_v57 = vpop.f32.mrb[58].mxu1 }
0x2f5d   :  { %v5029_v13 = vadd.f32 %v8725_v37, %v5028_v57  ;;  %v9325_v14 = vpop.f32.mrb[59].mxu1 }
0x2f5f   :  { %vm5032_vm1 = vcmp.gt.f32.partialorder %v5029_v13, 0.0  ;;  %v5033_v56 = vmul.f32 0.01, %v5029_v13 }
0x2f61   :  { %v5034_v15 = vsel %vm5032_vm1, %v5029_v13, %v5033_v56 }
0x2f62   :  { %9329 = vmatmul.mubr.msk.f32.vlgmr.msra.gmra.mrb[72].mxu0 %vm178_vm4, %v5034_v15  ;;  %v8741_v15 = vld [vmem:[#allocation5 + $0x2a0] ss:$0 sm:$0xff] }
0x2f63   :  { %9338 = vmatprep.mubr.msk.f32.mxu0 %vm9923_vm0, %v9922_v1 }
0x3035   :  { %v5110_v17 = vpop.f32.mrb[72].mxu0 }
0x3036   :  { %v5111_v20 = vadd.f32 %v8727_v16, %v5110_v17  ;;  %v9330_v22 = vpop.f32.mrb[73].mxu0 }
0x3038   :  { %v5114_v52 = vadd.f32 %v5111_v20, %v4952_v40  ;;  %v5555_v40 = vld [vmem:[#allocation5 + $0x298] sm:$0xff] }
0x303a   :  { %v5115_v45 = vsel %vm671_vm8, %v5114_v52, 0.0 }
0x303b   :  { %5116 = vadd.xlane.f32.xlu0 %v5115_v45 }
0x30c8   :  { %v5117_v25 = vpop.xlane.xlu0 %5116 }
0x30c9   :  { %v5118_v29 = vmul.f32 0.125, %v5117_v25 }
0x30cb   :  { %v5119_v30 = vsub.f32 %v5114_v52, %v5118_v29 }
0x30cd   :  { %v5120_v32 = vmul.f32 %v5119_v30, %v5119_v30 }
0x30cf   :  { %v5121_v34 = vsel %vm671_vm8, %v5120_v32, 0.0 }
0x30d0   :  { %5122 = vadd.xlane.f32.xlu1 %v5121_v34 }
0x315d   :  { %v5123_v19 = vpop.xlane.xlu1 %5122 }
0x315e   :  { %v5124_v36 = vmul.f32 0.125, %v5123_v19 }
0x3160   :  { %v5125_v21 = vadd.f32 1e-05, %v5124_v36  ;;  %v5660_v36 = vld [vmem:[#allocation5 + $0x2b8] sm:$0xff] }
0x3162   :  { %9794 = vrsqrt.f32 %v5125_v21 }
0x316c   :  { %v9795_v38 = vpop.eup %9794 }
0x316d   :  { %v5127_v8 = vmul.f32 %v9795_v38, %v5119_v30  ;;  %v4379_v30 = vld [vmem:[#allocation5 + $0x200] sm:$0xff] }
0x316e   :  { %v4380_v34 = vmul.f32 %v4379_v30, %v10489_v12 }
0x316f   :  { %v5133_v6 = vmul.f32 %v8729_v24, %v5127_v8  ;;  %v8702_v8 = vld [vmem:[#allocation5 + $0x208] ss:$0 sm:$0xff] }
0x3170   :  { %v4381_v19 = vsel %vm255_vm5, %v4380_v34, 0.0 }
0x3171   :  { %v10544_v41 = vadd.f32 %v8730_v26, %v5133_v6 }
0x3173   :  { %9334 = vmatmul.mubr.msk.f32.vlgmr.msra.gmra.mrb[60].mxu1 %vm178_vm4, %v10544_v41 }
0x3174   :  { %9343 = vmatprep.mubr.msk.f32.mxu1 %vm9923_vm0, %v9922_v1 }
0x3246   :  { %v5215_v43 = vpop.f32.mrb[60].mxu1 }
0x3247   :  { %v5216_v44 = vadd.f32 %v8731_v42, %v5215_v43  ;;  %v9335_v46 = vpop.f32.mrb[61].mxu1  ;;  %v8703_v43 = vld [vmem:[#allocation5 + $0x210] ss:$0 sm:$0xff] }
0x3249   :  { %5386 = vrot.lane.b32.xlu1 %v5216_v44, %s9926_s14  ;;  %5220 = vrot.lane.b32.xlu0 %v5216_v44, %s9925_s13 }
0x324d   :  { %5384 = vrot.lane.b32.xlu1 %v5216_v44, %s9924_s4 }
0x32bb   :  { %v5221_v47 = vpop.permute.xlu0 %5220  ;;  %v5387_v48 = vpop.permute.xlu1 %5386 }
0x32bc   :  { %9337 = vmatpush3.xpose.msk.msra.mxu0 %vm255_vm5, %v5221_v47 }
0x32bd   :  { %9346 = vmatprep.subr.mxu0 %v9922_v1 }
0x32bf   :  { %9339 = vmatmul.mubr.msk.f32.vlgmr.msra.gmra.mrb[74].mxu0 %vm255_vm5, %v5216_v44  ;;  %v5385_v23 = vpop.permute.xlu1 %5384 }
0x32c0   :  { %9347 = vmatpush3.xpose.msk.msra.mxu0 %vm255_vm5, %v5387_v48  ;;  %9348 = vmatprep.mubr.msk.f32.mxu0 %vm9923_vm0, %v9922_v1 }
0x32c1   :  { %9356 = vmatprep.subr.mxu0 %v9922_v1 }
0x32c3   :  { %9349 = vmatmul.mubr.msk.f32.vlgmr.msra.gmra.mrb[76].mxu0 %vm255_vm5, %v5385_v23  ;;  %v5847_v23 = vld [vmem:[#allocation5 + $0x2e8] sm:$0xff] }
0x32c4   :  { %9358 = vmatprep.mubr.msk.f32.mxu0 %vm9923_vm0, %v9922_v1  ;;  %9357 = vmatpush3.msra.mxu0 %v5555_v40 }
0x32c5   :  { %9366 = vmatprep.subr.mxu0 %v9922_v1 }
0x3392   :  { %v5292_v27 = vpop.f32.mrb[74].mxu0 }
0x3393   :  { %v5293_v49 = vadd.f32 %v10504_v59, %v5292_v27  ;;  %v9340_v50 = vpop.f32.mrb[75].mxu0  ;;  %v4396_v27 = vld [vmem:[#allocation5 + $0x218] sm:$0xff] }
0x3394   :  { %v5742_v50 = vld [vmem:[#allocation5 + $0x2c8] sm:$0xff] }
0x3395   :  { %v5296_v51 = vsel %vm330_vm6, %v5293_v49, -inf }
0x3396   :  { %5297 = vmax.xlane.f32.xlu0 %v5296_v51  ;;  %v5458_v53 = vpop.f32.mrb[76].mxu0  ;;  %v8745_v51 = vld [vmem:[#allocation5 + $0x2c0] ss:$0 sm:$0xff] }
0x3397   :  { %v5459_v54 = vadd.f32 %v10504_v59, %v5458_v53  ;;  %v9350_v55 = vpop.f32.mrb[77].mxu0 }
0x3399   :  { %v5462_v31 = vsel %vm330_vm6, %v5459_v54, -inf }
0x339a   :  { %5463 = vmax.xlane.f32.xlu1 %v5462_v31  ;;  %v8751_v31 = vld [vmem:[#allocation5 + $0x2f0] ss:$0 sm:$0xff] }
0x33ab   :  { %5307 = vrot.lane.b32.xlu1 %v5216_v44, %s9928_s16 }
0x3423   :  { %v5298_v60 = vpop.xlane.xlu0 %5297 }
0x3424   :  { %v5299_v28 = vsub.f32 %v5293_v49, %v5298_v60 }
0x3426   :  { %v5300_v58 = vmul.f32 1.442695, %v5299_v28 }
0x3427   :  { %v5464_v63 = vpop.xlane.xlu1 %5463 }
0x3428   :  { %9796 = vpow2.f32 %v5300_v58  ;;  %v5465_v18 = vsub.f32 %v5459_v54, %v5464_v63 }
0x342a   :  { %v5466_v0 = vmul.f32 1.442695, %v5465_v18 }
0x342b   :  { %v5308_v2 = vpop.permute.xlu1 %5307 }
0x342c   :  { %9798 = vpow2.f32 %v5466_v0  ;;  %9342 = vmatpush3.msk.msra.mxu1 %vm347_vm7, %v5308_v2 }
0x342d   :  { %9351 = vmatprep.subr.mxu1 %v9922_v1 }
0x3432   :  { %v9797_v59 = vpop.eup %9796 }
0x3433   :  { %v5302_v3 = vsel %vm330_vm6, %v9797_v59, 0.0 }
0x3434   :  { %5303 = vadd.xlane.f32.xlu0 %v5302_v3 }
0x3436   :  { %v9799_v5 = vpop.eup %9798 }
0x3437   :  { %v5468_v7 = vsel %vm330_vm6, %v9799_v5, 0.0 }
0x3438   :  { %5469 = vadd.xlane.f32.xlu0 %v5468_v7  ;;  %v10623_v7 = vld [vmem:[#allocation5 + $0x488] sm:$0xff] }
0x344e   :  { %5473 = vrot.lane.b32.xlu0 %v5216_v44, %s9927_s15  ;;  %v8744_v44 = vld [vmem:[#allocation5 + $0x2b0] ss:$0 sm:$0xff] }
0x34c1   :  { %v5304_v9 = vpop.xlane.xlu0 %5303 }
0x34c2   :  { %9800 = vrcp.f32 %v5304_v9 }
0x34c5   :  { %v5470_v10 = vpop.xlane.xlu0 %5469 }
0x34c6   :  { %9802 = vrcp.f32 %v5470_v10 }
0x34c9   :  { %v5474_v4 = vpop.permute.xlu0 %5473 }
0x34cc   :  { %v9801_v33 = vpop.eup %9800 }
0x34cd   :  { %v5306_v11 = vmul.f32 %v9801_v33, %v9797_v59 }
0x34cf   :  { %9344 = vmatmul.mubr.msk.f32.vlgmr.msra.gmra.mrb[62].mxu1 %vm255_vm5, %v5306_v11 }
0x34d0   :  { %v9803_v39 = vpop.eup %9802  ;;  %9352 = vmatpush3.msk.msra.mxu1 %vm347_vm7, %v5474_v4  ;;  %9353 = vmatprep.mubr.msk.f32.mxu1 %vm9923_vm0, %v9922_v1 }
0x34d1   :  { %v5472_v35 = vmul.f32 %v9803_v39, %v9799_v5  ;;  %9361 = vmatprep.subr.mxu1 %v9922_v1 }
0x34d3   :  { %9354 = vmatmul.mubr.msk.f32.vlgmr.msra.gmra.mrb[64].mxu1 %vm255_vm5, %v5472_v35 }
0x34d4   :  { %9363 = vmatprep.mubr.msk.f32.mxu1 %vm9923_vm0, %v9922_v1  ;;  %9362 = vmatpush3.msra.mxu1 %v5660_v36 }
0x34d5   :  { %9371 = vmatprep.subr.mxu1 %v9922_v1 }
0x35a2   :  { %v5380_v62 = vpop.f32.mrb[62].mxu1 }
0x35a3   :  { %v9345_v37 = vpop.f32.mrb[63].mxu1 }
0x35a6   :  { %v5546_v57 = vpop.f32.mrb[64].mxu1 }
0x35a7   :  { %5551 = vrot.lane.b32.xlu1 %v5546_v57, %s9929_s17  ;;  %v9355_v13 = vpop.f32.mrb[65].mxu1 }
0x3619   :  { %v5552_v14 = vpop.permute.xlu1 %5551 }
0x361a   :  { %v5554_v56 = vsel %vm255_vm5, %v5380_v62, %v5552_v14 }
0x361b   :  { %9359 = vmatmul.mubr.msk.f32.vlgmr.msra.gmra.mrb[78].mxu0 %vm178_vm4, %v5554_v56 }
0x361c   :  { %9368 = vmatprep.mubr.msk.f32.mxu0 %vm9923_vm0, %v9922_v1  ;;  %9367 = vmatpush3.msra.mxu0 %v5742_v50  ;;  %v8749_v50 = vld [vmem:[#allocation5 + $0x2d8] ss:$0 sm:$0xff] }
0x361d   :  { %9376 = vmatprep.subr.mxu0 %v9922_v1 }
0x36ee   :  { %v5630_v16 = vpop.f32.mrb[78].mxu0 }
0x36ef   :  { %v5631_v17 = vadd.f32 %v8741_v15, %v5630_v16  ;;  %v9360_v20 = vpop.f32.mrb[79].mxu0 }
0x36f1   :  { %v5634_v22 = vadd.f32 %v5631_v17, %v10544_v41  ;;  %v8743_v41 = vld [vmem:[#allocation5 + $0x2a8] ss:$0 sm:$0xff] }
0x36f3   :  { %v5635_v52 = vsel %vm671_vm8, %v5634_v22, 0.0 }
0x36f4   :  { %5636 = vadd.xlane.f32.xlu1 %v5635_v52 }
0x3781   :  { %v5637_v45 = vpop.xlane.xlu1 %5636 }
0x3782   :  { %v5638_v25 = vmul.f32 0.125, %v5637_v45 }
0x3784   :  { %v5639_v29 = vsub.f32 %v5634_v22, %v5638_v25  ;;  %v8747_v22 = vld [vmem:[#allocation5 + $0x2d0] ss:$0 sm:$0xff] }
0x3786   :  { %v5640_v32 = vmul.f32 %v5639_v29, %v5639_v29 }
0x3788   :  { %v5641_v61 = vsel %vm671_vm8, %v5640_v32, 0.0 }
0x3789   :  { %5642 = vadd.xlane.f32.xlu0 %v5641_v61 }
0x378d   :  { %4382 = vadd.xlane.f32.xlu0 %v4381_v19 }
0x3816   :  { %v5643_v21 = vpop.xlane.xlu0 %5642 }
0x3817   :  { %v5644_v38 = vmul.f32 0.125, %v5643_v21 }
0x3819   :  { %v5645_v24 = vadd.f32 1e-05, %v5644_v38 }
0x381a   :  { %v4383_v26 = vpop.xlane.xlu0 %4382 }
0x381b   :  { %9804 = vrsqrt.f32 %v5645_v24  ;;  %v4389_v12 = vmul.f32 %v8702_v8, %v4383_v26 }
0x381d   :  { %v4395_v47 = vadd.f32 %v8703_v43, %v4389_v12 }
0x381f   :  { %v10599_v49 = vadd.f32 %v4396_v27, %v4395_v47 }
0x3825   :  { %v9805_v6 = vpop.eup %9804 }
0x3826   :  { %v5647_v42 = vmul.f32 %v9805_v6, %v5639_v29 }
0x3828   :  { %v5653_v46 = vmul.f32 %v8743_v41, %v5647_v42  ;;  %v6260_v41 = vld [vmem:[#allocation5 + $0x2f8] sm:$0xff] }
0x382a   :  { %v10593_v48 = vadd.f32 %v8744_v44, %v5653_v46 }
0x382c   :  { %9364 = vmatmul.mubr.msk.f32.vlgmr.msra.gmra.mrb[66].mxu1 %vm178_vm4, %v10593_v48 }
0x382d   :  { %9372 = vmatpush3.msra.mxu1 %v5847_v23  ;;  %9373 = vmatprep.mubr.msk.f32.mxu1 %vm9923_vm0, %v9922_v1 }
0x382e   :  { %9381 = vmatprep.subr.mxu1 %v9922_v1 }
0x3830   :  { %9374 = vmatmul.mubr.msk.f32.vlgmr.msra.gmra.mrb[68].mxu1 %vm178_vm4, %v10599_v49 }
0x3831   :  { %9383 = vmatprep.mubr.msk.f32.mxu1 %vm9923_vm0, %v9922_v1 }
0x38ff   :  { %v5735_v53 = vpop.f32.mrb[66].mxu1 }
0x3900   :  { %v5736_v54 = vadd.f32 %v8745_v51, %v5735_v53  ;;  %v9365_v55 = vpop.f32.mrb[67].mxu1  ;;  %v6444_v53 = vld [vmem:[#allocation5 + $0x328] sm:$0xff] }
0x3902   :  { %vm5739_vm2 = vcmp.gt.f32.partialorder %v5736_v54, 0.0  ;;  %v5740_v60 = vmul.f32 0.01, %v5736_v54 }
0x3903   :  { %v5922_v28 = vpop.f32.mrb[68].mxu1 }
0x3904   :  { %v5741_v58 = vsel %vm5739_vm2, %v5736_v54, %v5740_v60  ;;  %v5923_v63 = vadd.f32 %v8751_v31, %v5922_v28  ;;  %v9375_v18 = vpop.f32.mrb[69].mxu1  ;;  %v8750_v31 = vld [vmem:[#allocation5 + $0x2e0] ss:$0 sm:$0xff] }
0x3905   :  { %9369 = vmatmul.mubr.msk.f32.vlgmr.msra.gmra.mrb[80].mxu0 %vm178_vm4, %v5741_v58  ;;  %v8759_v28 = vld [vmem:[#allocation5 + $0x300] ss:$0 sm:$0xff] }
0x3906   :  { %6092 = vrot.lane.b32.xlu0 %v5923_v63, %s9926_s14  ;;  %5927 = vrot.lane.b32.xlu1 %v5923_v63, %s9925_s13 }
0x3907   :  { %9378 = vmatprep.mubr.msk.f32.mxu0 %vm9923_vm0, %v9922_v1 }
0x390a   :  { %6090 = vrot.lane.b32.xlu1 %v5923_v63, %s9924_s4 }
0x3978   :  { %v5928_v0 = vpop.permute.xlu1 %5927  ;;  %v6093_v2 = vpop.permute.xlu0 %6092 }
0x3979   :  { %9377 = vmatpush3.xpose.msk.msra.mxu0 %vm255_vm5, %v5928_v0 }
0x397a   :  { %9386 = vmatprep.subr.mxu0 %v9922_v1 }
0x397c   :  { %9379 = vmatmul.mubr.msk.f32.vlgmr.msra.gmra.mrb[82].mxu0 %vm255_vm5, %v5923_v63  ;;  %v6091_v59 = vpop.permute.xlu1 %6090 }
0x397d   :  { %9387 = vmatpush3.xpose.msk.msra.mxu0 %vm255_vm5, %v6093_v2  ;;  %9388 = vmatprep.mubr.msk.f32.mxu0 %vm9923_vm0, %v9922_v1 }
0x397e   :  { %9396 = vmatprep.subr.mxu0 %v9922_v1 }
0x3980   :  { %9389 = vmatmul.mubr.msk.f32.vlgmr.msra.gmra.mrb[84].mxu0 %vm255_vm5, %v6091_v59 }
0x3981   :  { %9398 = vmatprep.mubr.msk.f32.mxu0 %vm9923_vm0, %v9922_v1  ;;  %9397 = vmatpush3.msra.mxu0 %v6260_v41 }
0x3982   :  { %9406 = vmatprep.subr.mxu0 %v9922_v1 }
0x39d8   :  { %v5817_v3 = vpop.f32.mrb[80].mxu0 }
0x39d9   :  { %v9370_v5 = vpop.f32.mrb[81].mxu0  ;;  %v5818_v52 = vadd.f32 %v8747_v22, %v5817_v3 }
0x39da   :  { %v8765_v5 = vld [vmem:[#allocation5 + $0x330] ss:$0 sm:$0xff] }
0x39db   :  { %v5821_v45 = vadd.f32 %v5818_v52, %v10593_v48 }
0x39dd   :  { %v5822_v25 = vsel %vm671_vm8, %v5821_v45, 0.0 }
0x3a4f   :  { %v5999_v9 = vpop.f32.mrb[82].mxu0 }
0x3a50   :  { %v6000_v10 = vadd.f32 %v5999_v9, %v10623_v7  ;;  %v9380_v33 = vpop.f32.mrb[83].mxu0 }
0x3a52   :  { %v6003_v11 = vsel %vm178_vm4, %v6000_v10, -inf }
0x3a53   :  { %6004 = vmax.xlane.f32.xlu1 %v6003_v11  ;;  %v6164_v4 = vpop.f32.mrb[84].mxu0 }
0x3a54   :  { %v6165_v39 = vadd.f32 %v6164_v4, %v10623_v7  ;;  %v9390_v35 = vpop.f32.mrb[85].mxu0 }
0x3a55   :  { %v6365_v35 = vld [vmem:[#allocation5 + $0x318] sm:$0xff] }
0x3a56   :  { %v6168_v40 = vsel %vm178_vm4, %v6165_v39, -inf }
0x3a57   :  { %6169 = vmax.xlane.f32.xlu0 %v6168_v40 }
0x3ae0   :  { %v6005_v62 = vpop.xlane.xlu1 %6004 }
0x3ae1   :  { %v6006_v37 = vsub.f32 %v6000_v10, %v6005_v62 }
0x3ae3   :  { %v6007_v57 = vmul.f32 1.442695, %v6006_v37 }
0x3ae4   :  { %v6170_v13 = vpop.xlane.xlu0 %6169 }
0x3ae5   :  { %9806 = vpow2.f32 %v6007_v57  ;;  %v6171_v14 = vsub.f32 %v6165_v39, %v6170_v13  ;;  %v8761_v57 = vld [vmem:[#allocation5 + $0x308] ss:$0 sm:$0xff] }
0x3ae7   :  { %v6172_v56 = vmul.f32 1.442695, %v6171_v14  ;;  %v8762_v14 = vld [vmem:[#allocation5 + $0x310] ss:$0 sm:$0xff] }
0x3ae9   :  { %9808 = vpow2.f32 %v6172_v56 }
0x3aef   :  { %v9807_v15 = vpop.eup %9806 }
0x3af0   :  { %v6009_v16 = vsel %vm178_vm4, %v9807_v15, 0.0 }
0x3af1   :  { %6010 = vadd.xlane.f32.xlu0 %v6009_v16  ;;  %v8763_v16 = vld [vmem:[#allocation5 + $0x320] ss:$0 sm:$0xff] }
0x3af3   :  { %v9809_v17 = vpop.eup %9808 }
0x3af4   :  { %v6174_v20 = vsel %vm178_vm4, %v9809_v17, 0.0 }
0x3af5   :  { %6175 = vadd.xlane.f32.xlu1 %v6174_v20 }
0x3b06   :  { %6179 = vrot.lane.b32.xlu1 %v5923_v63, %s9927_s15 }
0x3b07   :  { %6014 = vrot.lane.b32.xlu0 %v5923_v63, %s9928_s16 }
0x3b26   :  { %5823 = vadd.xlane.f32.xlu0 %v5822_v25  ;;  %v10683_v25 = vld [vmem:[#allocation5 + $0x490] sm:$0xff] }
0x3b7e   :  { %v6011_v29 = vpop.xlane.xlu0 %6010 }
0x3b7f   :  { %9810 = vrcp.f32 %v6011_v29 }
0x3b82   :  { %v6176_v30 = vpop.xlane.xlu1 %6175  ;;  %v6015_v32 = vpop.permute.xlu0 %6014 }
0x3b83   :  { %9812 = vrcp.f32 %v6176_v30  ;;  %9382 = vmatpush3.msra.mxu1 %v6015_v32 }
0x3b84   :  { %9391 = vmatprep.subr.mxu1 %v9922_v1 }
0x3b86   :  { %v6180_v19 = vpop.permute.xlu1 %6179 }
0x3b89   :  { %v9811_v34 = vpop.eup %9810 }
0x3b8a   :  { %v6013_v61 = vmul.f32 %v9811_v34, %v9807_v15 }
0x3b8c   :  { %9384 = vmatmul.mubr.msk.f32.vlgmr.msra.gmra.mrb[70].mxu1 %vm178_vm4, %v6013_v61 }
0x3b8d   :  { %v9813_v36 = vpop.eup %9812  ;;  %9392 = vmatpush3.msra.mxu1 %v6180_v19  ;;  %9393 = vmatprep.mubr.msk.f32.mxu1 %vm9923_vm0, %v9922_v1 }
0x3b8e   :  { %v6178_v21 = vmul.f32 %v9813_v36, %v9809_v17  ;;  %9401 = vmatprep.subr.mxu1 %v9922_v1 }
0x3b90   :  { %9394 = vmatmul.mubr.msk.f32.vlgmr.msra.gmra.mrb[72].mxu1 %vm178_vm4, %v6178_v21 }
0x3b91   :  { %9403 = vmatprep.mubr.msk.f32.mxu1 %vm9923_vm0, %v9922_v1  ;;  %9402 = vmatpush3.msra.mxu1 %v6365_v35  ;;  %v6963_v35 = vld [vmem:[#allocation5 + $0x358] sm:$0xff] }
0x3b92   :  { %9411 = vmatprep.subr.mxu1 %v9922_v1 }
0x3bb3   :  { %v5824_v38 = vpop.xlane.xlu0 %5823 }
0x3bb4   :  { %v5825_v24 = vmul.f32 0.125, %v5824_v38 }
0x3bb6   :  { %v5826_v8 = vsub.f32 %v5821_v45, %v5825_v24 }
0x3bb8   :  { %v5827_v26 = vmul.f32 %v5826_v8, %v5826_v8 }
0x3bba   :  { %v5828_v6 = vsel %vm671_vm8, %v5827_v26, 0.0 }
0x3bbb   :  { %5829 = vadd.xlane.f32.xlu0 %v5828_v6 }
0x3c48   :  { %v5830_v46 = vpop.xlane.xlu0 %5829 }
0x3c49   :  { %v5831_v47 = vmul.f32 0.125, %v5830_v46 }
0x3c4b   :  { %v5832_v48 = vadd.f32 1e-05, %v5831_v47 }
0x3c4d   :  { %9814 = vrsqrt.f32 %v5832_v48 }
0x3c57   :  { %v9815_v23 = vpop.eup %9814 }
0x3c58   :  { %v5834_v27 = vmul.f32 %v9815_v23, %v5826_v8 }
0x3c5a   :  { %v5840_v54 = vmul.f32 %v8749_v50, %v5834_v27 }
0x3c5c   :  { %v10650_v60 = vadd.f32 %v8750_v31, %v5840_v54  ;;  %v6858_v31 = vld [vmem:[#allocation5 + $0x338] sm:$0xff] }
0x3c5f   :  { %v6086_v42 = vpop.f32.mrb[70].mxu1 }
0x3c60   :  { %v9385_v12 = vpop.f32.mrb[71].mxu1 }
0x3c63   :  { %v6251_v43 = vpop.f32.mrb[72].mxu1 }
0x3c64   :  { %6256 = vrot.lane.b32.xlu1 %v6251_v43, %s9929_s17  ;;  %v9395_v44 = vpop.f32.mrb[73].mxu1 }
0x3cd6   :  { %v6257_v51 = vpop.permute.xlu1 %6256 }
0x3cd7   :  { %v6259_v55 = vsel %vm255_vm5, %v6086_v42, %v6257_v51 }
0x3cd8   :  { %9399 = vmatmul.mubr.msk.f32.vlgmr.msra.gmra.mrb[86].mxu0 %vm178_vm4, %v6259_v55 }
0x3cd9   :  { %9407 = vmatpush3.msra.mxu0 %v6444_v53  ;;  %9408 = vmatprep.mubr.msk.f32.mxu0 %vm9923_vm0, %v9922_v1 }
0x3cda   :  { %9416 = vmatprep.subr.mxu0 %v9922_v1 }
0x3cdc   :  { %9409 = vmatmul.mubr.msk.f32.vlgmr.msra.gmra.mrb[88].mxu0 %vm178_vm4, %v10650_v60 }
0x3cdd   :  { %9418 = vmatprep.mubr.msk.f32.mxu0 %vm9923_vm0, %v9922_v1 }
0x3dab   :  { %v6335_v58 = vpop.f32.mrb[86].mxu0 }
0x3dac   :  { %v6336_v63 = vadd.f32 %v8759_v28, %v6335_v58  ;;  %v9400_v18 = vpop.f32.mrb[87].mxu0 }
0x3dae   :  { %v6339_v0 = vadd.f32 %v6336_v63, %v10599_v49 }
0x3daf   :  { %v6519_v2 = vpop.f32.mrb[88].mxu0 }
0x3db0   :  { %v9410_v59 = vpop.f32.mrb[89].mxu0  ;;  %v6340_v3 = vsel %vm178_vm4, %v6339_v0, 0.0  ;;  %v10659_v9 = vadd.f32 %v8765_v5, %v6519_v2 }
0x3db1   :  { %6341 = vadd.xlane.f32.xlu1 %v6340_v3 }
0x3dc2   :  { %6689 = vrot.lane.b32.xlu1 %v10659_v9, %s9924_s4 }
0x3e3e   :  { %v6342_v10 = vpop.xlane.xlu1 %6341 }
0x3e3f   :  { %v6343_v33 = vmul.f32 0.125, %v6342_v10 }
0x3e41   :  { %v6344_v11 = vsub.f32 %v6339_v0, %v6343_v33  ;;  %v8775_v0 = vld [vmem:[#allocation5 + $0x340] ss:$0 sm:$0xff] }
0x3e42   :  { %v6690_v52 = vpop.permute.xlu1 %6689 }
0x3e43   :  { %v6345_v4 = vmul.f32 %v6344_v11, %v6344_v11 }
0x3e45   :  { %v6346_v39 = vsel %vm178_vm4, %v6345_v4, 0.0 }
0x3e46   :  { %6347 = vadd.xlane.f32.xlu0 %v6346_v39 }
0x3ed3   :  { %v6348_v49 = vpop.xlane.xlu0 %6347 }
0x3ed4   :  { %v6349_v40 = vmul.f32 0.125, %v6348_v49 }
0x3ed6   :  { %v6350_v62 = vadd.f32 1e-05, %v6349_v40 }
0x3ed8   :  { %9816 = vrsqrt.f32 %v6350_v62 }
0x3ee2   :  { %v9817_v37 = vpop.eup %9816 }
0x3ee3   :  { %v6352_v13 = vmul.f32 %v9817_v37, %v6344_v11 }
0x3ee5   :  { %v6358_v56 = vmul.f32 %v8761_v57, %v6352_v13  ;;  %v8777_v57 = vld [vmem:[#allocation5 + $0x348] ss:$0 sm:$0xff] }
0x3ee7   :  { %v10665_v15 = vadd.f32 %v8762_v14, %v6358_v56  ;;  %v8778_v14 = vld [vmem:[#allocation5 + $0x350] ss:$0 sm:$0xff] }
0x3ee9   :  { %9404 = vmatmul.mubr.msk.f32.vlgmr.msra.gmra.mrb[74].mxu1 %vm178_vm4, %v10665_v15 }
0x3eea   :  { %9412 = vmatpush3.xpose.msk.msra.mxu1 %vm255_vm5, %v10659_v9  ;;  %9413 = vmatprep.mubr.msk.f32.mxu1 %vm9923_vm0, %v9922_v1 }
0x3eeb   :  { %9421 = vmatprep.subr.mxu1 %v9922_v1 }
0x3fbc   :  { %v6440_v17 = vpop.f32.mrb[74].mxu1 }
0x3fbd   :  { %v6441_v20 = vadd.f32 %v8763_v16, %v6440_v17  ;;  %v9405_v22 = vpop.f32.mrb[75].mxu1  ;;  %v7045_v16 = vld [vmem:[#allocation5 + $0x368] sm:$0xff]  ;;  %v8779_v17 = vld [vmem:[#allocation5 + $0x360] ss:$0 sm:$0xff] }
0x3fbf   :  { %6687 = vrot.lane.b32.xlu0 %v6441_v20, %s9924_s4  ;;  %9414 = vmatmul.mubr.msk.f32.vlgmr.msra.gmra.mrb[76].mxu1 %vm255_vm5, %v6441_v20 }
0x3fc0   :  { %9422 = vmatpush3.xpose.msk.msra.mxu1 %vm255_vm5, %v6690_v52  ;;  %9423 = vmatprep.mubr.msk.f32.mxu1 %vm9923_vm0, %v9922_v1 }
0x3fc1   :  { %9431 = vmatprep.subr.mxu1 %v9922_v1 }
0x4031   :  { %v6688_v45 = vpop.permute.xlu0 %6687 }
0x4032   :  { %9424 = vmatmul.mubr.msk.f32.vlgmr.msra.gmra.mrb[78].mxu1 %vm255_vm5, %v6688_v45 }
0x4033   :  { %9433 = vmatprep.mubr.msk.f32.mxu1 %vm9923_vm0, %v9922_v1  ;;  %9432 = vmatpush3.msra.mxu1 %v6858_v31 }
0x4034   :  { %9441 = vmatprep.subr.mxu1 %v9922_v1 }
0x4092   :  { %v6595_v29 = vpop.f32.mrb[76].mxu1 }
0x4093   :  { %v6596_v30 = vadd.f32 %v6595_v29, %v10683_v25  ;;  %v9415_v32 = vpop.f32.mrb[77].mxu1 }
0x4095   :  { %v6599_v34 = vsel %vm255_vm5, %v6596_v30, -inf }
0x4096   :  { %6600 = vmax.xlane.f32.xlu1 %v6599_v34 }
0x4105   :  { %v6761_v61 = vpop.f32.mrb[78].mxu1 }
0x4106   :  { %v6762_v19 = vadd.f32 %v6761_v61, %v10683_v25  ;;  %v9425_v36 = vpop.f32.mrb[79].mxu1 }
0x4108   :  { %v6765_v21 = vsel %vm255_vm5, %v6762_v19, -inf }
0x4109   :  { %6766 = vmax.xlane.f32.xlu0 %v6765_v21 }
0x4123   :  { %v6601_v38 = vpop.xlane.xlu1 %6600 }
0x4124   :  { %v6602_v24 = vsub.f32 %v6596_v30, %v6601_v38  ;;  %v8781_v30 = vld [vmem:[#allocation5 + $0x370] ss:$0 sm:$0xff] }
0x4126   :  { %v6603_v8 = vmul.f32 1.442695, %v6602_v24 }
0x4128   :  { %9818 = vpow2.f32 %v6603_v8 }
0x4132   :  { %v9819_v26 = vpop.eup %9818 }
0x4133   :  { %v6605_v6 = vsel %vm255_vm5, %v9819_v26, 0.0 }
0x4134   :  { %6606 = vadd.xlane.f32.xlu1 %v6605_v6  ;;  %v7150_v6 = vld [vmem:[#allocation5 + $0x388] sm:$0xff] }
0x4145   :  { %6610 = vrot.lane.b32.xlu1 %v10659_v9, %s9925_s13 }
0x4196   :  { %v6767_v41 = vpop.xlane.xlu0 %6766 }
0x4197   :  { %v6768_v42 = vsub.f32 %v6762_v19, %v6767_v41 }
0x4199   :  { %v6769_v12 = vmul.f32 1.442695, %v6768_v42 }
0x419b   :  { %9820 = vpow2.f32 %v6769_v12 }
0x41a5   :  { %v9821_v43 = vpop.eup %9820 }
0x41a6   :  { %v6771_v44 = vsel %vm255_vm5, %v9821_v43, 0.0 }
0x41a7   :  { %6772 = vadd.xlane.f32.xlu0 %v6771_v44  ;;  %v8783_v44 = vld [vmem:[#allocation5 + $0x378] ss:$0 sm:$0xff] }
0x41bd   :  { %6776 = vrot.lane.b32.xlu0 %v10659_v9, %s9926_s14 }
0x41c1   :  { %v6607_v46 = vpop.xlane.xlu1 %6606 }
0x41c2   :  { %9822 = vrcp.f32 %v6607_v46 }
0x41c5   :  { %v6611_v47 = vpop.permute.xlu1 %6610 }
0x41c6   :  { %9417 = vmatpush3.msk.msra.mxu0 %vm347_vm7, %v6611_v47  ;;  %v8784_v47 = vld [vmem:[#allocation5 + $0x380] ss:$0 sm:$0xff] }
0x41c7   :  { %9426 = vmatprep.subr.mxu0 %v9922_v1 }
0x41cc   :  { %v9823_v48 = vpop.eup %9822 }
0x41cd   :  { %v6609_v23 = vmul.f32 %v9823_v48, %v9819_v26 }
0x41cf   :  { %9419 = vmatmul.mubr.msk.f32.vlgmr.msra.gmra.mrb[90].mxu0 %vm255_vm5, %v6609_v23 }
0x41d0   :  { %9428 = vmatprep.mubr.msk.f32.mxu0 %vm9923_vm0, %v9922_v1 }
0x4234   :  { %v6773_v27 = vpop.xlane.xlu0 %6772 }
0x4235   :  { %9824 = vrcp.f32 %v6773_v27  ;;  %v8785_v27 = vld [vmem:[#allocation5 + $0x390] ss:$0 sm:$0xff] }
0x4238   :  { %v6777_v50 = vpop.permute.xlu0 %6776 }
0x4239   :  { %9427 = vmatpush3.msk.msra.mxu0 %vm347_vm7, %v6777_v50 }
0x423a   :  { %9436 = vmatprep.subr.mxu0 %v9922_v1 }
0x423f   :  { %v9825_v51 = vpop.eup %9824 }
0x4240   :  { %v6775_v53 = vmul.f32 %v9825_v51, %v9821_v43 }
0x4242   :  { %9429 = vmatmul.mubr.msk.f32.vlgmr.msra.gmra.mrb[92].mxu0 %vm255_vm5, %v6775_v53 }
0x4243   :  { %9438 = vmatprep.mubr.msk.f32.mxu0 %vm9923_vm0, %v9922_v1  ;;  %9437 = vmatpush3.msra.mxu0 %v6963_v35 }
0x4244   :  { %9446 = vmatprep.subr.mxu0 %v9922_v1 }
0x42a2   :  { %v6683_v54 = vpop.f32.mrb[90].mxu0 }
0x42a3   :  { %v9420_v55 = vpop.f32.mrb[91].mxu0 }
0x4315   :  { %v6849_v28 = vpop.f32.mrb[92].mxu0 }
0x4316   :  { %6854 = vrot.lane.b32.xlu1 %v6849_v28, %s9929_s17  ;;  %v9430_v58 = vpop.f32.mrb[93].mxu0 }
0x4388   :  { %v6855_v63 = vpop.permute.xlu1 %6854 }
0x4389   :  { %v6857_v18 = vsel %vm255_vm5, %v6683_v54, %v6855_v63 }
0x438a   :  { %9434 = vmatmul.mubr.msk.f32.vlgmr.msra.gmra.mrb[80].mxu1 %vm178_vm4, %v6857_v18 }
0x438b   :  { %9443 = vmatprep.mubr.msk.f32.mxu1 %vm9923_vm0, %v9922_v1  ;;  %9442 = vmatpush3.msra.mxu1 %v7045_v16  ;;  %v7563_v16 = vld [vmem:[#allocation5 + $0x398] sm:$0xff] }
0x438c   :  { %9451 = vmatprep.subr.mxu1 %v9922_v1 }
0x445d   :  { %v6933_v2 = vpop.f32.mrb[80].mxu1 }
0x445e   :  { %v6934_v59 = vadd.f32 %v8775_v0, %v6933_v2  ;;  %v9435_v3 = vpop.f32.mrb[81].mxu1 }
0x4460   :  { %v6937_v5 = vadd.f32 %v6934_v59, %v10665_v15 }
0x4462   :  { %v6938_v9 = vsel %vm178_vm4, %v6937_v5, 0.0 }
0x4463   :  { %6939 = vadd.xlane.f32.xlu1 %v6938_v9 }
0x44f0   :  { %v6940_v10 = vpop.xlane.xlu1 %6939 }
0x44f1   :  { %v6941_v33 = vmul.f32 0.125, %v6940_v10 }
0x44f3   :  { %v6942_v11 = vsub.f32 %v6937_v5, %v6941_v33 }
0x44f5   :  { %v6943_v4 = vmul.f32 %v6942_v11, %v6942_v11 }
0x44f7   :  { %v6944_v39 = vsel %vm178_vm4, %v6943_v4, 0.0 }
0x44f8   :  { %6945 = vadd.xlane.f32.xlu0 %v6944_v39 }
0x4585   :  { %v6946_v49 = vpop.xlane.xlu0 %6945 }
0x4586   :  { %v6947_v40 = vmul.f32 0.125, %v6946_v49 }
0x4588   :  { %v6948_v62 = vadd.f32 1e-05, %v6947_v40 }
0x458a   :  { %9826 = vrsqrt.f32 %v6948_v62 }
0x4594   :  { %v9827_v37 = vpop.eup %9826 }
0x4595   :  { %v6950_v13 = vmul.f32 %v9827_v37, %v6942_v11 }
0x4597   :  { %v6956_v56 = vmul.f32 %v8777_v57, %v6950_v13 }
0x4599   :  { %v6962_v15 = vadd.f32 %v8778_v14, %v6956_v56 }
0x459b   :  { %9439 = vmatmul.mubr.msk.f32.vlgmr.msra.gmra.mrb[94].mxu0 %vm178_vm4, %v6962_v15 }
0x459c   :  { %9448 = vmatprep.mubr.msk.f32.mxu0 %vm9923_vm0, %v9922_v1  ;;  %9447 = vmatpush3.msra.mxu0 %v7150_v6 }
0x459d   :  { %9456 = vmatprep.subr.mxu0 %v9922_v1 }
0x466e   :  { %v7038_v20 = vpop.f32.mrb[94].mxu0 }
0x466f   :  { %v7039_v22 = vadd.f32 %v8779_v17, %v7038_v20  ;;  %v9440_v52 = vpop.f32.mrb[95].mxu0 }
0x4671   :  { %vm7042_vm3 = vcmp.gt.f32.partialorder %v7039_v22, 0.0  ;;  %v7043_v45 = vmul.f32 0.01, %v7039_v22 }
0x4673   :  { %v7044_v29 = vsel %vm7042_vm3, %v7039_v22, %v7043_v45 }
0x4674   :  { %9444 = vmatmul.mubr.msk.f32.vlgmr.msra.gmra.mrb[82].mxu1 %vm178_vm4, %v7044_v29  ;;  %v7747_v29 = vld [vmem:[#allocation5 + $0x3c8] sm:$0xff] }
0x4675   :  { %9453 = vmatprep.mubr.msk.f32.mxu1 %vm9923_vm0, %v9922_v1 }
0x4747   :  { %v7120_v32 = vpop.f32.mrb[82].mxu1 }
0x4748   :  { %v7121_v34 = vadd.f32 %v8781_v30, %v7120_v32  ;;  %v9445_v61 = vpop.f32.mrb[83].mxu1  ;;  %v8793_v32 = vld [vmem:[#allocation5 + $0x3a0] ss:$0 sm:$0xff] }
0x474a   :  { %v7124_v19 = vadd.f32 %v7121_v34, %v6962_v15 }
0x474c   :  { %v7125_v36 = vsel %vm178_vm4, %v7124_v19, 0.0 }
0x474d   :  { %7126 = vadd.xlane.f32.xlu0 %v7125_v36 }
0x47da   :  { %v7127_v21 = vpop.xlane.xlu0 %7126 }
0x47db   :  { %v7128_v38 = vmul.f32 0.125, %v7127_v21 }
0x47dd   :  { %v7129_v24 = vsub.f32 %v7124_v19, %v7128_v38 }
0x47df   :  { %v7130_v8 = vmul.f32 %v7129_v24, %v7129_v24 }
0x47e1   :  { %v7131_v26 = vsel %vm178_vm4, %v7130_v8, 0.0 }
0x47e2   :  { %7132 = vadd.xlane.f32.xlu1 %v7131_v26 }
0x486f   :  { %v7133_v41 = vpop.xlane.xlu1 %7132 }
0x4870   :  { %v7134_v42 = vmul.f32 0.125, %v7133_v41 }
0x4872   :  { %v7135_v12 = vadd.f32 1e-05, %v7134_v42  ;;  %v8799_v42 = vld [vmem:[#allocation5 + $0x3d0] ss:$0 sm:$0xff] }
0x4874   :  { %9828 = vrsqrt.f32 %v7135_v12 }
0x487e   :  { %v9829_v43 = vpop.eup %9828 }
0x487f   :  { %v7137_v46 = vmul.f32 %v9829_v43, %v7129_v24  ;;  %v7668_v43 = vld [vmem:[#allocation5 + $0x3b8] sm:$0xff] }
0x4881   :  { %v7143_v48 = vmul.f32 %v8783_v44, %v7137_v46 }
0x4883   :  { %v10725_v23 = vadd.f32 %v8784_v47, %v7143_v48 }
0x4885   :  { %9449 = vmatmul.mubr.msk.f32.vlgmr.msra.gmra.mrb[96].mxu0 %vm178_vm4, %v10725_v23 }
0x4886   :  { %9458 = vmatprep.mubr.msk.f32.mxu0 %vm9923_vm0, %v9922_v1 }
0x4958   :  { %v7225_v50 = vpop.f32.mrb[96].mxu0 }
0x4959   :  { %v7226_v51 = vadd.f32 %v8785_v27, %v7225_v50  ;;  %v9450_v53 = vpop.f32.mrb[97].mxu0  ;;  %v8796_v50 = vld [vmem:[#allocation5 + $0x3b0] ss:$0 sm:$0xff] }
0x495b   :  { %7395 = vrot.lane.b32.xlu1 %v7226_v51, %s9926_s14  ;;  %7230 = vrot.lane.b32.xlu0 %v7226_v51, %s9925_s13 }
0x495f   :  { %7393 = vrot.lane.b32.xlu1 %v7226_v51, %s9924_s4 }
0x49cd   :  { %v7231_v54 = vpop.permute.xlu0 %7230  ;;  %v7396_v55 = vpop.permute.xlu1 %7395 }
0x49ce   :  { %9452 = vmatpush3.xpose.msk.msra.mxu1 %vm255_vm5, %v7231_v54  ;;  %v8797_v54 = vld [vmem:[#allocation5 + $0x3c0] ss:$0 sm:$0xff] }
0x49cf   :  { %9461 = vmatprep.subr.mxu1 %v9922_v1 }
0x49d1   :  { %9454 = vmatmul.mubr.msk.f32.vlgmr.msra.gmra.mrb[84].mxu1 %vm255_vm5, %v7226_v51  ;;  %v7394_v31 = vpop.permute.xlu1 %7393 }
0x49d2   :  { %9462 = vmatpush3.xpose.msk.msra.mxu1 %vm255_vm5, %v7396_v55  ;;  %9463 = vmatprep.mubr.msk.f32.mxu1 %vm9923_vm0, %v9922_v1 }
0x49d3   :  { %9471 = vmatprep.subr.mxu1 %v9922_v1 }
0x49d5   :  { %9464 = vmatmul.mubr.msk.f32.vlgmr.msra.gmra.mrb[86].mxu1 %vm255_vm5, %v7394_v31 }
0x49d6   :  { %9473 = vmatprep.mubr.msk.f32.mxu1 %vm9923_vm0, %v9922_v1  ;;  %9472 = vmatpush3.msra.mxu1 %v7563_v16 }
0x49d7   :  { %9481 = vmatprep.subr.mxu1 %v9922_v1 }
0x4aa4   :  { %v7302_v28 = vpop.f32.mrb[84].mxu1 }
0x4aa5   :  { %v7303_v58 = vadd.f32 %v7302_v28, %v10623_v7  ;;  %v9455_v63 = vpop.f32.mrb[85].mxu1 }
0x4aa7   :  { %v7306_v18 = vsel %vm178_vm4, %v7303_v58, -inf }
0x4aa8   :  { %7307 = vmax.xlane.f32.xlu0 %v7306_v18  ;;  %v7467_v0 = vpop.f32.mrb[86].mxu1 }
0x4aa9   :  { %v7468_v2 = vadd.f32 %v7467_v0, %v10623_v7  ;;  %v9465_v59 = vpop.f32.mrb[87].mxu1 }
0x4aab   :  { %v7471_v3 = vsel %vm178_vm4, %v7468_v2, -inf }
0x4aac   :  { %7472 = vmax.xlane.f32.xlu1 %v7471_v3 }
0x4abd   :  { %7317 = vrot.lane.b32.xlu1 %v7226_v51, %s9928_s16 }
0x4b35   :  { %v7308_v5 = vpop.xlane.xlu0 %7307 }
0x4b36   :  { %v7309_v9 = vsub.f32 %v7303_v58, %v7308_v5 }
0x4b38   :  { %v7310_v10 = vmul.f32 1.442695, %v7309_v9 }
0x4b39   :  { %v7473_v33 = vpop.xlane.xlu1 %7472 }
0x4b3a   :  { %9830 = vpow2.f32 %v7310_v10  ;;  %v7474_v11 = vsub.f32 %v7468_v2, %v7473_v33 }
0x4b3c   :  { %v7475_v4 = vmul.f32 1.442695, %v7474_v11 }
0x4b3d   :  { %v7318_v39 = vpop.permute.xlu1 %7317 }
0x4b3e   :  { %9832 = vpow2.f32 %v7475_v4  ;;  %9457 = vmatpush3.msra.mxu0 %v7318_v39 }
0x4b3f   :  { %9466 = vmatprep.subr.mxu0 %v9922_v1 }
0x4b44   :  { %v9831_v35 = vpop.eup %9830 }
0x4b45   :  { %v7312_v7 = vsel %vm178_vm4, %v9831_v35, 0.0 }
0x4b46   :  { %7313 = vadd.xlane.f32.xlu0 %v7312_v7 }
0x4b48   :  { %v9833_v49 = vpop.eup %9832 }
0x4b49   :  { %v7477_v40 = vsel %vm178_vm4, %v9833_v49, 0.0 }
0x4b4a   :  { %7478 = vadd.xlane.f32.xlu0 %v7477_v40 }
0x4b60   :  { %7482 = vrot.lane.b32.xlu0 %v7226_v51, %s9927_s15 }
0x4bd3   :  { %v7314_v62 = vpop.xlane.xlu0 %7313 }
0x4bd4   :  { %9834 = vrcp.f32 %v7314_v62 }
0x4bd7   :  { %v7479_v37 = vpop.xlane.xlu0 %7478 }
0x4bd8   :  { %9836 = vrcp.f32 %v7479_v37 }
0x4bdb   :  { %v7483_v14 = vpop.permute.xlu0 %7482 }
0x4bde   :  { %v9835_v57 = vpop.eup %9834 }
0x4bdf   :  { %v7316_v13 = vmul.f32 %v9835_v57, %v9831_v35 }
0x4be1   :  { %9459 = vmatmul.mubr.msk.f32.vlgmr.msra.gmra.mrb[98].mxu0 %vm178_vm4, %v7316_v13 }
0x4be2   :  { %v9837_v56 = vpop.eup %9836  ;;  %9467 = vmatpush3.msra.mxu0 %v7483_v14  ;;  %9468 = vmatprep.mubr.msk.f32.mxu0 %vm9923_vm0, %v9922_v1 }
0x4be3   :  { %v7481_v15 = vmul.f32 %v9837_v56, %v9833_v49  ;;  %9476 = vmatprep.subr.mxu0 %v9922_v1 }
0x4be5   :  { %9469 = vmatmul.mubr.msk.f32.vlgmr.msra.gmra.mrb[100].mxu0 %vm178_vm4, %v7481_v15 }
0x4be6   :  { %9478 = vmatprep.mubr.msk.f32.mxu0 %vm9923_vm0, %v9922_v1  ;;  %9477 = vmatpush3.msra.mxu0 %v7668_v43 }
0x4be7   :  { %9486 = vmatprep.subr.mxu0 %v9922_v1 }
0x4cb4   :  { %v7389_v17 = vpop.f32.mrb[98].mxu0 }
0x4cb5   :  { %v9460_v20 = vpop.f32.mrb[99].mxu0 }
0x4cb8   :  { %v7554_v22 = vpop.f32.mrb[100].mxu0 }
0x4cb9   :  { %7559 = vrot.lane.b32.xlu1 %v7554_v22, %s9929_s17  ;;  %v9470_v52 = vpop.f32.mrb[101].mxu0 }
0x4cba   :  { %v8158_v52 = vld [vmem:[#allocation5 + $0x3d8] sm:$0xff] }
0x4d2b   :  { %v7560_v45 = vpop.permute.xlu1 %7559 }
0x4d2c   :  { %v7562_v30 = vsel %vm255_vm5, %v7389_v17, %v7560_v45 }
0x4d2d   :  { %9474 = vmatmul.mubr.msk.f32.vlgmr.msra.gmra.mrb[88].mxu1 %vm178_vm4, %v7562_v30 }
0x4d2e   :  { %9482 = vmatpush3.msra.mxu1 %v7747_v29  ;;  %9483 = vmatprep.mubr.msk.f32.mxu1 %vm9923_vm0, %v9922_v1 }
0x4d2f   :  { %9491 = vmatprep.subr.mxu1 %v9922_v1 }
0x4d31   :  { %9484 = vmatmul.mubr.msk.f32.vlgmr.msra.gmra.mrb[90].mxu1 %vm178_vm4, %v10650_v60 }
0x4d32   :  { %9493 = vmatprep.mubr.msk.f32.mxu1 %vm9923_vm0, %v9922_v1 }
0x4e00   :  { %v7638_v34 = vpop.f32.mrb[88].mxu1 }
0x4e01   :  { %v7639_v61 = vadd.f32 %v8793_v32, %v7638_v34  ;;  %v9475_v19 = vpop.f32.mrb[89].mxu1  ;;  %v8809_v34 = vld [vmem:[#allocation5 + $0x3e0] ss:$0 sm:$0xff] }
0x4e03   :  { %v7642_v36 = vadd.f32 %v7639_v61, %v10725_v23  ;;  %v8795_v23 = vld [vmem:[#allocation5 + $0x3a8] ss:$0 sm:$0xff] }
0x4e04   :  { %v7819_v21 = vpop.f32.mrb[90].mxu1 }
0x4e05   :  { %v9485_v38 = vpop.f32.mrb[91].mxu1  ;;  %v7643_v24 = vsel %vm178_vm4, %v7642_v36, 0.0  ;;  %v7820_v12 = vadd.f32 %v8799_v42, %v7819_v21 }
0x4e06   :  { %7644 = vadd.xlane.f32.xlu1 %v7643_v24 }
0x4e93   :  { %v7645_v8 = vpop.xlane.xlu1 %7644 }
0x4e94   :  { %v7646_v26 = vmul.f32 0.125, %v7645_v8 }
0x4e96   :  { %v7647_v6 = vsub.f32 %v7642_v36, %v7646_v26 }
0x4e98   :  { %v7648_v41 = vmul.f32 %v7647_v6, %v7647_v6 }
0x4e9a   :  { %v7649_v60 = vsel %vm178_vm4, %v7648_v41, 0.0 }
0x4e9b   :  { %7650 = vadd.xlane.f32.xlu0 %v7649_v60  ;;  %v8263_v60 = vld [vmem:[#allocation5 + $0x3f8] sm:$0xff] }
0x4eb1   :  { %7989 = vrot.lane.b32.xlu0 %v7820_v12, %s9924_s4 }
0x4f28   :  { %v7651_v44 = vpop.xlane.xlu0 %7650 }
0x4f29   :  { %v7652_v46 = vmul.f32 0.125, %v7651_v44 }
0x4f2b   :  { %v7653_v47 = vadd.f32 1e-05, %v7652_v46  ;;  %v8811_v46 = vld [vmem:[#allocation5 + $0x3e8] ss:$0 sm:$0xff] }
0x4f2c   :  { %v7990_v58 = vpop.permute.xlu0 %7989 }
0x4f2d   :  { %9838 = vrsqrt.f32 %v7653_v47 }
0x4f37   :  { %v9839_v48 = vpop.eup %9838 }
0x4f38   :  { %v7655_v27 = vmul.f32 %v9839_v48, %v7647_v6  ;;  %v8812_v48 = vld [vmem:[#allocation5 + $0x3f0] ss:$0 sm:$0xff] }
0x4f3a   :  { %v7661_v51 = vmul.f32 %v8795_v23, %v7655_v27 }
0x4f3c   :  { %v10776_v53 = vadd.f32 %v8796_v50, %v7661_v51  ;;  %v8345_v50 = vld [vmem:[#allocation5 + $0x408] sm:$0xff]  ;;  %v8813_v51 = vld [vmem:[#allocation5 + $0x400] ss:$0 sm:$0xff] }
0x4f3e   :  { %9479 = vmatmul.mubr.msk.f32.vlgmr.msra.gmra.mrb[102].mxu0 %vm178_vm4, %v10776_v53 }
0x4f3f   :  { %9487 = vmatpush3.xpose.msk.msra.mxu0 %vm255_vm5, %v7820_v12  ;;  %9488 = vmatprep.mubr.msk.f32.mxu0 %vm9923_vm0, %v9922_v1 }
0x4f40   :  { %9496 = vmatprep.subr.mxu0 %v9922_v1 }
0x5011   :  { %v7743_v55 = vpop.f32.mrb[102].mxu0 }
0x5012   :  { %v7744_v31 = vadd.f32 %v8797_v54, %v7743_v55  ;;  %v9480_v28 = vpop.f32.mrb[103].mxu0 }
0x5014   :  { %7987 = vrot.lane.b32.xlu1 %v7744_v31, %s9924_s4  ;;  %9489 = vmatmul.mubr.msk.f32.vlgmr.msra.gmra.mrb[104].mxu0 %vm255_vm5, %v7744_v31 }
0x5015   :  { %9497 = vmatpush3.xpose.msk.msra.mxu0 %vm255_vm5, %v7990_v58  ;;  %9498 = vmatprep.mubr.msk.f32.mxu0 %vm9923_vm0, %v9922_v1  ;;  %v8815_v58 = vld [vmem:[#allocation5 + $0x410] ss:$0 sm:$0xff] }
0x5016   :  { %9506 = vmatprep.subr.mxu0 %v9922_v1 }
0x5086   :  { %v7988_v63 = vpop.permute.xlu1 %7987 }
0x5087   :  { %9499 = vmatmul.mubr.msk.f32.vlgmr.msra.gmra.mrb[106].mxu0 %vm255_vm5, %v7988_v63 }
0x5088   :  { %9508 = vmatprep.mubr.msk.f32.mxu0 %vm9923_vm0, %v9922_v1  ;;  %9507 = vmatpush3.msra.mxu0 %v8158_v52 }
0x5089   :  { %9516 = vmatprep.subr.mxu0 %v9922_v1 }
0x50e7   :  { %v7895_v18 = vpop.f32.mrb[104].mxu0 }
0x50e8   :  { %v7896_v0 = vadd.f32 %v7895_v18, %v10683_v25  ;;  %v9490_v2 = vpop.f32.mrb[105].mxu0 }
0x50ea   :  { %v7899_v59 = vsel %vm255_vm5, %v7896_v0, -inf }
0x50eb   :  { %7900 = vmax.xlane.f32.xlu1 %v7899_v59 }
0x515a   :  { %v8061_v3 = vpop.f32.mrb[106].mxu0 }
0x515b   :  { %v8062_v5 = vadd.f32 %v8061_v3, %v10683_v25  ;;  %v9500_v9 = vpop.f32.mrb[107].mxu0 }
0x515d   :  { %v8065_v10 = vsel %vm255_vm5, %v8062_v5, -inf }
0x515e   :  { %8066 = vmax.xlane.f32.xlu0 %v8065_v10 }
0x5178   :  { %v7901_v33 = vpop.xlane.xlu1 %7900 }
0x5179   :  { %v7902_v11 = vsub.f32 %v7896_v0, %v7901_v33 }
0x517b   :  { %v7903_v4 = vmul.f32 1.442695, %v7902_v11 }
0x517d   :  { %9840 = vpow2.f32 %v7903_v4 }
0x5187   :  { %v9841_v39 = vpop.eup %9840 }
0x5188   :  { %v7905_v35 = vsel %vm255_vm5, %v9841_v39, 0.0 }
0x5189   :  { %7906 = vadd.xlane.f32.xlu0 %v7905_v35  ;;  %v8817_v35 = vld [vmem:[#allocation5 + $0x418] ss:$0 sm:$0xff] }
0x519f   :  { %7910 = vrot.lane.b32.xlu0 %v7820_v12, %s9925_s13 }
0x51eb   :  { %v8067_v7 = vpop.xlane.xlu0 %8066 }
0x51ec   :  { %v8068_v49 = vsub.f32 %v8062_v5, %v8067_v7 }
0x51ee   :  { %v8069_v40 = vmul.f32 1.442695, %v8068_v49  ;;  %v8818_v49 = vld [vmem:[#allocation5 + $0x420] ss:$0 sm:$0xff] }
0x51f0   :  { %9842 = vpow2.f32 %v8069_v40 }
0x51fa   :  { %v9843_v62 = vpop.eup %9842 }
0x51fb   :  { %v8071_v25 = vsel %vm255_vm5, %v9843_v62, 0.0 }
0x51fc   :  { %8072 = vadd.xlane.f32.xlu1 %v8071_v25 }
0x520d   :  { %8076 = vrot.lane.b32.xlu1 %v7820_v12, %s9926_s14 }
0x5216   :  { %v7907_v37 = vpop.xlane.xlu0 %7906 }
0x5217   :  { %9844 = vrcp.f32 %v7907_v37 }
0x521a   :  { %v7911_v57 = vpop.permute.xlu0 %7910 }
0x521b   :  { %9492 = vmatpush3.msk.msra.mxu1 %vm347_vm7, %v7911_v57 }
0x521c   :  { %9501 = vmatprep.subr.mxu1 %v9922_v1 }
0x5221   :  { %v9845_v13 = vpop.eup %9844 }
0x5222   :  { %v7909_v14 = vmul.f32 %v9845_v13, %v9841_v39  ;;  %v8455_v13 = vld [vmem:[#allocation5 + $0x430] sm:$0x3] }
0x5224   :  { %9494 = vmatmul.mubr.msk.f32.vlgmr.msra.gmra.mrb[92].mxu1 %vm255_vm5, %v7909_v14 }
0x5225   :  { %9503 = vmatprep.mubr.msk.f32.mxu1 %vm9923_vm0, %v9922_v1 }
0x5289   :  { %v8073_v56 = vpop.xlane.xlu1 %8072 }
0x528a   :  { %9846 = vrcp.f32 %v8073_v56  ;;  %v8819_v56 = vld [vmem:[#allocation5 + $0x438] ss:$0 sm:$0xff] }
0x528d   :  { %v8077_v15 = vpop.permute.xlu1 %8076 }
0x528e   :  { %9502 = vmatpush3.msk.msra.mxu1 %vm347_vm7, %v8077_v15 }
0x528f   :  { %9511 = vmatprep.subr.mxu1 %v9922_v1 }
0x5294   :  { %v9847_v16 = vpop.eup %9846 }
0x5295   :  { %v8075_v17 = vmul.f32 %v9847_v16, %v9843_v62  ;;  %v8450_v62 = vld [vmem:[#allocation5 + $0x428] sm:$0xff] }
0x5297   :  { %9504 = vmatmul.mubr.msk.f32.vlgmr.msra.gmra.mrb[94].mxu1 %vm255_vm5, %v8075_v17 }
0x5298   :  { %9513 = vmatprep.mubr.msk.f32.mxu1 %vm9923_vm0, %v9922_v1  ;;  %9512 = vmatpush3.msra.mxu1 %v8263_v60 }
0x5299   :  { %9521 = vmatprep.subr.mxu1 %v9922_v1 }
0x52f7   :  { %v7983_v20 = vpop.f32.mrb[92].mxu1 }
0x52f8   :  { %v9495_v22 = vpop.f32.mrb[93].mxu1 }
0x536a   :  { %v8149_v45 = vpop.f32.mrb[94].mxu1 }
0x536b   :  { %8154 = vrot.lane.b32.xlu1 %v8149_v45, %s9929_s17  ;;  %v9505_v29 = vpop.f32.mrb[95].mxu1 }
0x53dd   :  { %v8155_v30 = vpop.permute.xlu1 %8154 }
0x53de   :  { %v8157_v32 = vsel %vm255_vm5, %v7983_v20, %v8155_v30 }
0x53df   :  { %9509 = vmatmul.mubr.msk.f32.vlgmr.msra.gmra.mrb[108].mxu0 %vm178_vm4, %v8157_v32 }
0x53e0   :  { %9518 = vmatprep.mubr.msk.f32.mxu0 %vm9923_vm0, %v9922_v1  ;;  %9517 = vmatpush3.msra.mxu0 %v8345_v50 }
0x54b2   :  { %v8233_v61 = vpop.f32.mrb[108].mxu0 }
0x54b3   :  { %v8234_v19 = vadd.f32 %v8809_v34, %v8233_v61  ;;  %v9510_v36 = vpop.f32.mrb[109].mxu0 }
0x54b5   :  { %v8237_v21 = vadd.f32 %v8234_v19, %v10776_v53 }
0x54b7   :  { %v8238_v38 = vsel %vm178_vm4, %v8237_v21, 0.0 }
0x54b8   :  { %8239 = vadd.xlane.f32.xlu0 %v8238_v38 }
0x5545   :  { %v8240_v24 = vpop.xlane.xlu0 %8239 }
0x5546   :  { %v8241_v8 = vmul.f32 0.125, %v8240_v24 }
0x5548   :  { %v8242_v26 = vsub.f32 %v8237_v21, %v8241_v8 }
0x554a   :  { %v8243_v6 = vmul.f32 %v8242_v26, %v8242_v26 }
0x554c   :  { %v8244_v41 = vsel %vm178_vm4, %v8243_v6, 0.0 }
0x554d   :  { %8245 = vadd.xlane.f32.xlu1 %v8244_v41 }
0x55da   :  { %v8246_v42 = vpop.xlane.xlu1 %8245 }
0x55db   :  { %v8247_v12 = vmul.f32 0.125, %v8246_v42 }
0x55dd   :  { %v8248_v43 = vadd.f32 1e-05, %v8247_v12 }
0x55df   :  { %9848 = vrsqrt.f32 %v8248_v43 }
0x55e9   :  { %v9849_v44 = vpop.eup %9848 }
0x55ea   :  { %v8250_v47 = vmul.f32 %v9849_v44, %v8242_v26 }
0x55ec   :  { %v8256_v23 = vmul.f32 %v8811_v46, %v8250_v47 }
0x55ee   :  { %v8262_v27 = vadd.f32 %v8812_v48, %v8256_v23 }
0x55f0   :  { %9514 = vmatmul.mubr.msk.f32.vlgmr.msra.gmra.mrb[96].mxu1 %vm178_vm4, %v8262_v27 }
0x55f1   :  { %9523 = vmatprep.mubr.msk.f32.mxu1 %vm9923_vm0, %v9922_v1  ;;  %vm8534_vm0 = vcmask 1024  }
0x56c3   :  { %v8338_v53 = vpop.f32.mrb[96].mxu1 }
0x56c4   :  { %v8339_v54 = vadd.f32 %v8813_v51, %v8338_v53  ;;  %v9515_v55 = vpop.f32.mrb[97].mxu1 }
0x56c6   :  { %vm8342_vm5 = vcmp.gt.f32.partialorder %v8339_v54, 0.0  ;;  %v8343_v31 = vmul.f32 0.01, %v8339_v54 }
0x56c8   :  { %v8344_v28 = vsel %vm8342_vm5, %v8339_v54, %v8343_v31 }
0x56c9   :  { %9519 = vmatmul.mubr.msk.f32.vlgmr.msra.gmra.mrb[110].mxu0 %vm178_vm4, %v8344_v28 }
0x579c   :  { %v8420_v63 = vpop.f32.mrb[110].mxu0 }
0x579d   :  { %v8421_v18 = vadd.f32 %v8815_v58, %v8420_v63  ;;  %v9520_v0 = vpop.f32.mrb[111].mxu0 }
0x579f   :  { %v8424_v2 = vadd.f32 %v8421_v18, %v8262_v27 }
0x57a1   :  { %v8425_v59 = vsel %vm178_vm4, %v8424_v2, 0.0 }
0x57a2   :  { %8426 = vadd.xlane.f32.xlu0 %v8425_v59 }
0x582f   :  { %v8427_v1 = vpop.xlane.xlu0 %8426 }
0x5830   :  { %v8428_v3 = vmul.f32 0.125, %v8427_v1 }
0x5832   :  { %v8429_v5 = vsub.f32 %v8424_v2, %v8428_v3 }
0x5834   :  { %v8430_v9 = vmul.f32 %v8429_v5, %v8429_v5 }
0x5836   :  { %v8431_v10 = vsel %vm178_vm4, %v8430_v9, 0.0 }
0x5837   :  { %8432 = vadd.xlane.f32.xlu0 %v8431_v10 }
0x58c4   :  { %v8433_v33 = vpop.xlane.xlu0 %8432 }
0x58c5   :  { %v8434_v11 = vmul.f32 0.125, %v8433_v33 }
0x58c7   :  { %v8435_v4 = vadd.f32 1e-05, %v8434_v11 }
0x58c9   :  { %9850 = vrsqrt.f32 %v8435_v4 }
0x58d3   :  { %v9851_v39 = vpop.eup %9850 }
0x58d4   :  { %v8437_v7 = vmul.f32 %v9851_v39, %v8429_v5 }
0x58d6   :  { %v8443_v40 = vmul.f32 %v8817_v35, %v8437_v7 }
0x58d8   :  { %v8449_v25 = vadd.f32 %v8818_v49, %v8443_v40 }
0x58da   :  { %v8451_v37 = vmul.f32 %v8450_v62, %v8449_v25 }
0x58dc   :  { %v8452_v57 = vsel %vm178_vm4, %v8451_v37, 0.0 }
0x58dd   :  { %8453 = vadd.xlane.f32.xlu1 %v8452_v57 }
0x596a   :  { %v8454_v14 = vpop.xlane.xlu1 %8453 }
0x596b   :  { %9522 = vmatpush3.msra.mxu1 %v8454_v14 }
0x596c   :  { %9524 = vmatmul.mubr.msk.f32.vlgmr.msra.gmra.mrb[98].mxu1 %vm178_vm4, %v8455_v13 }
0x5a3f   :  { %v8530_v15 = vpop.f32.mrb[98].mxu1 }
0x5a40   :  { %v8531_v16 = vadd.f32 %v8819_v56, %v8530_v15  ;;  %v9525_v17 = vpop.f32.mrb[99].mxu1 }
0x5a42   :  { %8535 = vst.msk [vmem:[%s10837_s5] sm:$0x3] %vm8534_vm0, %v8531_v16 }
0x5a43   :  { %8540 = vsyncpa [#allocation3], 1 }
0x5a44   :  { %8541 = vsyncpa [#allocation7], 1 }
0x5a45   :  { %8542 = vsyncpa [#allocation4], 1 }

</bundles_post_ra>
